<compile_context>
chip_gen: v5e
topology: v5e:2x2
jax: 0.10.0
libtpu: 0.0.40
codegen_flags: <defaults>
</compile_context>

<pallas_src>
import jax
import jax.numpy as jnp
from jax.experimental import pallas as pl
from jax.experimental.pallas import tpu as pltpu

EPS = 1e-5


def stn_kernel(x_ref,
               w1_ref, b1_ref, w2_ref, b2_ref, w3_ref, b3_ref,
               wf1_ref, bf1_ref, wf2_ref, bf2_ref, wf3_ref, bf3_ref,
               out_ref, pooled_ref):
    # x_ref block: (TB, CHUNK, dim) bf16, point-major.
    tb, chunk, dim = x_ref.shape
    k = pl.program_id(1)

    @pl.when(k == 0)
    def _():
        # -inf init: we pool the *raw* conv3 output (bias/ReLU deferred).
        pooled_ref[...] = jnp.full_like(pooled_ref, -jnp.inf)

    xc = x_ref[...].reshape(tb * chunk, dim)                              # bf16

    # conv1 + bn1 + relu  (BN folded into w/b; bf16 operands, f32 accum)
    h = jnp.dot(xc, w1_ref[...], preferred_element_type=jnp.float32)
    h = jnp.maximum(h + b1_ref[...], 0.0)                                 # (TB*CHUNK, 64)
    # conv2 + bn2 + relu
    h = jnp.dot(h.astype(jnp.bfloat16), w2_ref[...],
                preferred_element_type=jnp.float32)
    h = jnp.maximum(h + b2_ref[...], 0.0)                                 # (TB*CHUNK, 128)
    # conv3 (bias + relu deferred past the max-pool)
    h = jnp.dot(h.astype(jnp.bfloat16), w3_ref[...],
                preferred_element_type=jnp.float32)                       # (TB*CHUNK, 1024)

    # running global max over the point axis
    h = h.reshape(tb, chunk, 1024)
    pooled_ref[...] = jnp.maximum(pooled_ref[...], jnp.max(h, axis=1))

    @pl.when(k == pl.num_programs(1) - 1)
    def _():
        # deferred conv3 bias + bn3 shift + relu, applied once per batch tile
        pooled = jnp.maximum(pooled_ref[...] + b3_ref[...], 0.0)          # (TB, 1024)
        # fc1 + bn4 + relu
        g = jnp.dot(pooled.astype(jnp.bfloat16), wf1_ref[...],
                    preferred_element_type=jnp.float32)
        g = jnp.maximum(g + bf1_ref[...], 0.0)                            # (TB, 512)
        # fc2 + bn5 + relu
        g = jnp.dot(g.astype(jnp.bfloat16), wf2_ref[...],
                    preferred_element_type=jnp.float32)
        g = jnp.maximum(g + bf2_ref[...], 0.0)                            # (TB, 256)
        # fc3 + identity (identity folded into the zero-padded bias)
        out = jnp.dot(g.astype(jnp.bfloat16), wf3_ref[...],
                      preferred_element_type=jnp.float32) + bf3_ref[...]  # (TB, OUT_W)
        out_ref[...] = out


def fold_bn(w, b, gamma, beta, mean, var, eps=EPS):
    """Fold eval-mode BatchNorm into a (C_in, C_out) weight and bias (f32)."""
    scale = gamma / jnp.sqrt(var + eps)          # (C_out,)
    w_eff = w * scale[None, :]                   # (C_in, C_out)
    b_eff = (b - mean) * scale + beta            # (C_out,)
    return w_eff, b_eff[None, :]                 # bias kept 2D: (1, C_out)


def stn_forward(x, p, dim, num_points, *, tb=None, chunk=None):
    """x: (B, dim, N) float32 -> (B, dim, dim)."""
    B, d, N = x.shape
    assert d == dim and N == num_points
    dd = dim * dim

    # ---- parameter prep (done once, outside the kernel) --------------------
    w1, b1 = fold_bn(p['conv1_w'].T, p['conv1_b'], *p['bn1'])
    w2, b2 = fold_bn(p['conv2_w'].T, p['conv2_b'], *p['bn2'])
    w3, b3 = fold_bn(p['conv3_w'].T, p['conv3_b'], *p['bn3'])
    wf1, bf1 = fold_bn(p['fc1_w'].T, p['fc1_b'], *p['bn4'])
    wf2, bf2 = fold_bn(p['fc2_w'].T, p['fc2_b'], *p['bn5'])

    # fc3: pad to a lane-dense 128-wide output block; fold identity into bias.
    out_w = max(128, ((dd + 127) // 128) * 128)
    wf3 = jnp.zeros((256, out_w), jnp.float32).at[:, :dd].set(p['fc3_w'].T)
    bf3_row = p['fc3_b'] + jnp.eye(dim, dtype=jnp.float32).reshape(dd)
    bf3 = jnp.zeros((1, out_w), jnp.float32).at[0, :dd].set(bf3_row)

    # Single bf16 cast of all matmul weights (biases stay f32).
    w1, w2, w3, wf1, wf2, wf3 = (a.astype(jnp.bfloat16)
                                 for a in (w1, w2, w3, wf1, wf2, wf3))

    # ---- tiling choices -----------------------------------------------------
    if tb is None:
        tb = B if B <= 8 else (16 if B <= 64 else 32)

    try:
        vmem_cap = pltpu.get_tpu_info().vmem_capacity_bytes
    except Exception:
        vmem_cap = 0
    if chunk is None:
        # 512 on 128 MiB VMEM chips (v5e/v6e), 256 on v7x / unknown; keep
        # TB*CHUNK ~2-4k rows when tb grows.
        base = 512 if vmem_cap >= (100 << 20) else 256
        base = max(128, base * 8 // max(tb, 8))
        chunk = min(base, max(N, 16))
    chunk = max(16, (chunk // 16) * 16)   # bf16 sublane pack = 16

    n_pad = ((N + chunk - 1) // chunk) * chunk
    b_pad = ((B + tb - 1) // tb) * tb

    # point-major layout, bf16 for the MXU
    xt = jnp.transpose(x, (0, 2, 1)).astype(jnp.bfloat16)          # (B, N, dim)
    if n_pad > N:
        # pad the point axis by repeating the last point: duplicates never
        # change a global max-pool (even on the raw, pre-ReLU values).
        pad = jnp.broadcast_to(xt[:, -1:, :], (B, n_pad - N, dim))
        xt = jnp.concatenate([xt, pad], axis=1)
    if b_pad > B:
        pad = jnp.broadcast_to(xt[-1:], (b_pad - B, n_pad, dim))
        xt = jnp.concatenate([xt, pad], axis=0)

    operands = (xt, w1, b1, w2, b2, w3, b3, wf1, bf1, wf2, bf2, wf3, bf3)

    def full2d(a):
        return pl.BlockSpec(a.shape, lambda b, k: (0, 0))

    in_specs = [pl.BlockSpec((tb, chunk, dim), lambda b, k: (b, k, 0))]
    in_specs += [full2d(a) for a in operands[1:]]

    # conv3 f32 activation is the dominant intermediate; leave generous
    # headroom but stay inside v7x's 64 MiB.
    vmem_limit = int(min(96 << 20, (24 << 20) + 2 * tb * chunk * 1024 * 4))

    out = pl.pallas_call(
        stn_kernel,
        out_shape=jax.ShapeDtypeStruct((b_pad, out_w), jnp.float32),
        grid_spec=pltpu.PrefetchScalarGridSpec(
            num_scalar_prefetch=0,
            grid=(b_pad // tb, n_pad // chunk),
            in_specs=in_specs,
            out_specs=pl.BlockSpec((tb, out_w), lambda b, k: (b, 0)),
            scratch_shapes=[pltpu.VMEM((tb, 1024), jnp.float32)],
        ),
        compiler_params=pltpu.CompilerParams(
            dimension_semantics=("parallel", "arbitrary"),
            vmem_limit_bytes=vmem_limit),
    )(*operands)

    return out[:B, :dd].reshape(B, dim, dim)


def init_params(key, dim=3):
    """Deterministic synthetic parameters matching the PyTorch module shapes."""
    def uniform(k, shape, fan_in):
        bound = 1.0 / jnp.sqrt(jnp.float32(fan_in))
        return jax.random.uniform(k, shape, jnp.float32, -bound, bound)

    def bn(k, c):
        kg, kb, km, kv = jax.random.split(k, 4)
        gamma = 1.0 + 0.1 * jax.random.normal(kg, (c,), jnp.float32)
        beta = 0.1 * jax.random.normal(kb, (c,), jnp.float32)
        mean = 0.05 * jax.random.normal(km, (c,), jnp.float32)
        var = 1.0 + 0.1 * jax.random.uniform(kv, (c,), jnp.float32)
        return (gamma, beta, mean, var)

    ks = jax.random.split(key, 17)
    p = {
        'conv1_w': uniform(ks[0], (64, dim), dim),
        'conv1_b': uniform(ks[1], (64,), dim),
        'conv2_w': uniform(ks[2], (128, 64), 64),
        'conv2_b': uniform(ks[3], (128,), 64),
        'conv3_w': uniform(ks[4], (1024, 128), 128),
        'conv3_b': uniform(ks[5], (1024,), 128),
        'fc1_w': uniform(ks[6], (512, 1024), 1024),
        'fc1_b': uniform(ks[7], (512,), 1024),
        'fc2_w': uniform(ks[8], (256, 512), 512),
        'fc2_b': uniform(ks[9], (256,), 512),
        'fc3_w': uniform(ks[10], (dim * dim, 256), 256),
        'fc3_b': uniform(ks[11], (dim * dim,), 256),
        'bn1': bn(ks[12], 64),
        'bn2': bn(ks[13], 128),
        'bn3': bn(ks[14], 1024),
        'bn4': bn(ks[15], 512),
        'bn5': bn(ks[16], 256),
    }
    return p


def stn_reference(x, p, dim):
    """Pure-JAX f32 reference (eval-mode BN), mirrors the PyTorch forward."""
    def conv_bn_relu(h, w, b, stats):
        g, bt, m, v = stats
        y = jnp.einsum('bcn,oc->bon', h, w) + b[None, :, None]
        y = (y - m[None, :, None]) / jnp.sqrt(v + EPS)[None, :, None]
        y = y * g[None, :, None] + bt[None, :, None]
        return jnp.maximum(y, 0.0)

    def fc_bn_relu(h, w, b, stats):
        g, bt, m, v = stats
        y = h @ w.T + b
        y = (y - m) / jnp.sqrt(v + EPS) * g + bt
        return jnp.maximum(y, 0.0)

    h = conv_bn_relu(x, p['conv1_w'], p['conv1_b'], p['bn1'])
    h = conv_bn_relu(h, p['conv2_w'], p['conv2_b'], p['bn2'])
    h = conv_bn_relu(h, p['conv3_w'], p['conv3_b'], p['bn3'])
    pooled = jnp.max(h, axis=2)                       # MaxPool1d(num_points)
    g1 = fc_bn_relu(pooled, p['fc1_w'], p['fc1_b'], p['bn4'])
    g2 = fc_bn_relu(g1, p['fc2_w'], p['fc2_b'], p['bn5'])
    out = g2 @ p['fc3_w'].T + p['fc3_b']
    out = out + jnp.eye(dim, dtype=out.dtype).reshape(1, dim * dim)
    return out.reshape(-1, dim, dim)


if __name__ == "__main__":
    B, dim, N = 2, 3, 128   # small num_points for the test (module default is 500)
    key = jax.random.PRNGKey(0)
    kx, kp = jax.random.split(key)
    x = jax.random.normal(kx, (B, dim, N), jnp.float32)
    params = init_params(kp, dim)

    out = stn_forward(x, params, dim=dim, num_points=N)
    out = jax.block_until_ready(out)

    ref = stn_reference(x, params, dim)
    assert out.shape == (B, dim, dim), out.shape
    # bf16 MXU operands with f32 accumulation vs f32 reference -> 2e-2 tol.
    assert jnp.allclose(out, ref, rtol=2e-2, atol=2e-2), \
        f"max abs err {jnp.max(jnp.abs(out - ref))}"
    print("KERNEL_OK")
</pallas_src>

<mosaic_0001>
module attributes {stable_mosaic.version = 11 : i64} {
  func.func @stn_kernel(%arg0: i32, %arg1: i32, %arg2: memref<2x128x3xbf16, #tpu.memory_space<vmem>>, %arg3: memref<3x64xbf16, #tpu.memory_space<vmem>>, %arg4: memref<1x64xf32, #tpu.memory_space<vmem>>, %arg5: memref<64x128xbf16, #tpu.memory_space<vmem>>, %arg6: memref<1x128xf32, #tpu.memory_space<vmem>>, %arg7: memref<128x1024xbf16, #tpu.memory_space<vmem>>, %arg8: memref<1x1024xf32, #tpu.memory_space<vmem>>, %arg9: memref<1024x512xbf16, #tpu.memory_space<vmem>>, %arg10: memref<1x512xf32, #tpu.memory_space<vmem>>, %arg11: memref<512x256xbf16, #tpu.memory_space<vmem>>, %arg12: memref<1x256xf32, #tpu.memory_space<vmem>>, %arg13: memref<256x128xbf16, #tpu.memory_space<vmem>>, %arg14: memref<1x128xf32, #tpu.memory_space<vmem>>, %arg15: memref<2x128xf32, #tpu.memory_space<vmem>>, %arg16: memref<2x1024xf32, #tpu.memory_space<vmem>>) attributes {dimension_semantics = [#tpu.dimension_semantics<parallel>, #tpu.dimension_semantics<arbitrary>], iteration_bounds = array<i64: 1, 1>, scalar_prefetch = 0 : i64, scratch_operands = 1 : i64, tpu.core_type = #tpu.core_type<tc>, window_params = [{transform_indices = @transform_0, window_bounds = array<i64: 2, 128, 3>}, {pipeline_mode = #tpu.pipeline_mode<synchronous>, transform_indices = @transform_1, window_bounds = array<i64: 3, 64>}, {pipeline_mode = #tpu.pipeline_mode<synchronous>, transform_indices = @transform_2, window_bounds = array<i64: 1, 64>}, {pipeline_mode = #tpu.pipeline_mode<synchronous>, transform_indices = @transform_3, window_bounds = array<i64: 64, 128>}, {pipeline_mode = #tpu.pipeline_mode<synchronous>, transform_indices = @transform_4, window_bounds = array<i64: 1, 128>}, {pipeline_mode = #tpu.pipeline_mode<synchronous>, transform_indices = @transform_5, window_bounds = array<i64: 128, 1024>}, {pipeline_mode = #tpu.pipeline_mode<synchronous>, transform_indices = @transform_6, window_bounds = array<i64: 1, 1024>}, {pipeline_mode = #tpu.pipeline_mode<synchronous>, transform_indices = @transform_7, window_bounds = array<i64: 1024, 512>}, {pipeline_mode = #tpu.pipeline_mode<synchronous>, transform_indices = @transform_8, window_bounds = array<i64: 1, 512>}, {pipeline_mode = #tpu.pipeline_mode<synchronous>, transform_indices = @transform_9, window_bounds = array<i64: 512, 256>}, {pipeline_mode = #tpu.pipeline_mode<synchronous>, transform_indices = @transform_10, window_bounds = array<i64: 1, 256>}, {pipeline_mode = #tpu.pipeline_mode<synchronous>, transform_indices = @transform_11, window_bounds = array<i64: 256, 128>}, {pipeline_mode = #tpu.pipeline_mode<synchronous>, transform_indices = @transform_12, window_bounds = array<i64: 1, 128>}, {transform_indices = @transform_13, window_bounds = array<i64: 2, 128>}]} {
    %c0_i32 = arith.constant 0 : i32
    %0 = arith.cmpi eq, %arg1, %c0_i32 : i32
    %1 = arith.extui %0 : i1 to i32
    %c0_i32_0 = arith.constant 0 : i32
    %2 = arith.cmpi ne, %1, %c0_i32_0 : i32
    scf.if %2 {
      %cst_24 = arith.constant 0xFF800000 : f32
      %31 = vector.broadcast %cst_24 : f32 to vector<2x1024xf32>
      %c0_25 = arith.constant 0 : index
      %c0_26 = arith.constant 0 : index
      %32 = vector.load %arg16[%c0_25, %c0_26] : memref<2x1024xf32, #tpu.memory_space<vmem>>, vector<2x1024xf32>
      tpu.vector_store %arg16[%c0_25, %c0_26], %31 {strides = array<i32>} : memref<2x1024xf32, #tpu.memory_space<vmem>>, vector<2x1024xf32>,
    } else {
    }
    %c0 = arith.constant 0 : index
    %c0_1 = arith.constant 0 : index
    %c0_2 = arith.constant 0 : index
    %3 = vector.load %arg2[%c0, %c0_1, %c0_2] : memref<2x128x3xbf16, #tpu.memory_space<vmem>>, vector<2x128x3xbf16>
    %4 = vector.shape_cast %3 : vector<2x128x3xbf16> to vector<256x3xbf16>
    %c0_3 = arith.constant 0 : index
    %c0_4 = arith.constant 0 : index
    %5 = vector.load %arg3[%c0_3, %c0_4] : memref<3x64xbf16, #tpu.memory_space<vmem>>, vector<3x64xbf16>
    %cst = arith.constant dense<0.000000e+00> : vector<256x64xf32>
    %6 = tpu.matmul %4, %5, %cst {dimension_numbers = #tpu.dot_dimension_numbers<[1], [0], [0], [1], [0, 0, 1, 1], [], []>} : vector<256x3xbf16>, vector<3x64xbf16>, vector<256x64xf32> -> vector<256x64xf32>
    %c0_5 = arith.constant 0 : index
    %c0_6 = arith.constant 0 : index
    %7 = vector.load %arg4[%c0_5, %c0_6] : memref<1x64xf32, #tpu.memory_space<vmem>>, vector<1x64xf32>
    %8 = vector.broadcast %7 : vector<1x64xf32> to vector<256x64xf32>
    %9 = arith.addf %6, %8 : vector<256x64xf32>
    %cst_7 = arith.constant 0.000000e+00 : f32
    %10 = vector.broadcast %cst_7 : f32 to vector<256x64xf32>
    %11 = arith.maximumf %9, %10 : vector<256x64xf32>
    %12 = arith.truncf %11 : vector<256x64xf32> to vector<256x64xbf16>
    %c0_8 = arith.constant 0 : index
    %c0_9 = arith.constant 0 : index
    %13 = vector.load %arg5[%c0_8, %c0_9] : memref<64x128xbf16, #tpu.memory_space<vmem>>, vector<64x128xbf16>
    %cst_10 = arith.constant dense<0.000000e+00> : vector<256x128xf32>
    %14 = tpu.matmul %12, %13, %cst_10 {dimension_numbers = #tpu.dot_dimension_numbers<[1], [0], [0], [1], [0, 0, 1, 1], [], []>} : vector<256x64xbf16>, vector<64x128xbf16>, vector<256x128xf32> -> vector<256x128xf32>
    %c0_11 = arith.constant 0 : index
    %c0_12 = arith.constant 0 : index
    %15 = vector.load %arg6[%c0_11, %c0_12] : memref<1x128xf32, #tpu.memory_space<vmem>>, vector<1x128xf32>
    %16 = vector.broadcast %15 : vector<1x128xf32> to vector<256x128xf32>
    %17 = arith.addf %14, %16 : vector<256x128xf32>
    %cst_13 = arith.constant 0.000000e+00 : f32
    %18 = vector.broadcast %cst_13 : f32 to vector<256x128xf32>
    %19 = arith.maximumf %17, %18 : vector<256x128xf32>
    %20 = arith.truncf %19 : vector<256x128xf32> to vector<256x128xbf16>
    %c0_14 = arith.constant 0 : index
    %c0_15 = arith.constant 0 : index
    %21 = vector.load %arg7[%c0_14, %c0_15] : memref<128x1024xbf16, #tpu.memory_space<vmem>>, vector<128x1024xbf16>
    %cst_16 = arith.constant dense<0.000000e+00> : vector<256x1024xf32>
    %22 = tpu.matmul %20, %21, %cst_16 {dimension_numbers = #tpu.dot_dimension_numbers<[1], [0], [0], [1], [0, 0, 1, 1], [], []>} : vector<256x128xbf16>, vector<128x1024xbf16>, vector<256x1024xf32> -> vector<256x1024xf32>
    %23 = vector.shape_cast %22 : vector<256x1024xf32> to vector<2x128x1024xf32>
    %c0_17 = arith.constant 0 : index
    %c0_18 = arith.constant 0 : index
    %24 = vector.load %arg16[%c0_17, %c0_18] : memref<2x1024xf32, #tpu.memory_space<vmem>>, vector<2x1024xf32>
    %cst_19 = arith.constant dense<0xFF800000> : vector<2x1024xf32>
    %25 = vector.multi_reduction <maximumf>, %23, %cst_19 [1] : vector<2x128x1024xf32> to vector<2x1024xf32>
    %26 = arith.maximumf %24, %25 : vector<2x1024xf32>
    %c0_20 = arith.constant 0 : index
    %c0_21 = arith.constant 0 : index
    %27 = vector.load %arg16[%c0_20, %c0_21] : memref<2x1024xf32, #tpu.memory_space<vmem>>, vector<2x1024xf32>
    tpu.vector_store %arg16[%c0_20, %c0_21], %26 {strides = array<i32>} : memref<2x1024xf32, #tpu.memory_space<vmem>>, vector<2x1024xf32>,
    %c0_i32_22 = arith.constant 0 : i32
    %28 = arith.cmpi eq, %arg1, %c0_i32_22 : i32
    %29 = arith.extui %28 : i1 to i32
    %c0_i32_23 = arith.constant 0 : i32
    %30 = arith.cmpi ne, %29, %c0_i32_23 : i32
    scf.if %30 {
      %c0_24 = arith.constant 0 : index
      %c0_25 = arith.constant 0 : index
      %31 = vector.load %arg16[%c0_24, %c0_25] : memref<2x1024xf32, #tpu.memory_space<vmem>>, vector<2x1024xf32>
      %c0_26 = arith.constant 0 : index
      %c0_27 = arith.constant 0 : index
      %32 = vector.load %arg8[%c0_26, %c0_27] : memref<1x1024xf32, #tpu.memory_space<vmem>>, vector<1x1024xf32>
      %33 = vector.broadcast %32 : vector<1x1024xf32> to vector<2x1024xf32>
      %34 = arith.addf %31, %33 : vector<2x1024xf32>
      %cst_28 = arith.constant 0.000000e+00 : f32
      %35 = vector.broadcast %cst_28 : f32 to vector<2x1024xf32>
      %36 = arith.maximumf %34, %35 : vector<2x1024xf32>
      %37 = arith.truncf %36 : vector<2x1024xf32> to vector<2x1024xbf16>
      %c0_29 = arith.constant 0 : index
      %c0_30 = arith.constant 0 : index
      %38 = vector.load %arg9[%c0_29, %c0_30] : memref<1024x512xbf16, #tpu.memory_space<vmem>>, vector<1024x512xbf16>
      %cst_31 = arith.constant dense<0.000000e+00> : vector<2x512xf32>
      %39 = tpu.matmul %37, %38, %cst_31 {dimension_numbers = #tpu.dot_dimension_numbers<[1], [0], [0], [1], [0, 0, 1, 1], [], []>} : vector<2x1024xbf16>, vector<1024x512xbf16>, vector<2x512xf32> -> vector<2x512xf32>
      %c0_32 = arith.constant 0 : index
      %c0_33 = arith.constant 0 : index
      %40 = vector.load %arg10[%c0_32, %c0_33] : memref<1x512xf32, #tpu.memory_space<vmem>>, vector<1x512xf32>
      %41 = vector.broadcast %40 : vector<1x512xf32> to vector<2x512xf32>
      %42 = arith.addf %39, %41 : vector<2x512xf32>
      %cst_34 = arith.constant 0.000000e+00 : f32
      %43 = vector.broadcast %cst_34 : f32 to vector<2x512xf32>
      %44 = arith.maximumf %42, %43 : vector<2x512xf32>
      %45 = arith.truncf %44 : vector<2x512xf32> to vector<2x512xbf16>
      %c0_35 = arith.constant 0 : index
      %c0_36 = arith.constant 0 : index
      %46 = vector.load %arg11[%c0_35, %c0_36] : memref<512x256xbf16, #tpu.memory_space<vmem>>, vector<512x256xbf16>
      %cst_37 = arith.constant dense<0.000000e+00> : vector<2x256xf32>
      %47 = tpu.matmul %45, %46, %cst_37 {dimension_numbers = #tpu.dot_dimension_numbers<[1], [0], [0], [1], [0, 0, 1, 1], [], []>} : vector<2x512xbf16>, vector<512x256xbf16>, vector<2x256xf32> -> vector<2x256xf32>
      %c0_38 = arith.constant 0 : index
      %c0_39 = arith.constant 0 : index
      %48 = vector.load %arg12[%c0_38, %c0_39] : memref<1x256xf32, #tpu.memory_space<vmem>>, vector<1x256xf32>
      %49 = vector.broadcast %48 : vector<1x256xf32> to vector<2x256xf32>
      %50 = arith.addf %47, %49 : vector<2x256xf32>
      %cst_40 = arith.constant 0.000000e+00 : f32
      %51 = vector.broadcast %cst_40 : f32 to vector<2x256xf32>
      %52 = arith.maximumf %50, %51 : vector<2x256xf32>
      %53 = arith.truncf %52 : vector<2x256xf32> to vector<2x256xbf16>
      %c0_41 = arith.constant 0 : index
      %c0_42 = arith.constant 0 : index
      %54 = vector.load %arg13[%c0_41, %c0_42] : memref<256x128xbf16, #tpu.memory_space<vmem>>, vector<256x128xbf16>
      %cst_43 = arith.constant dense<0.000000e+00> : vector<2x128xf32>
      %55 = tpu.matmul %53, %54, %cst_43 {dimension_numbers = #tpu.dot_dimension_numbers<[1], [0], [0], [1], [0, 0, 1, 1], [], []>} : vector<2x256xbf16>, vector<256x128xbf16>, vector<2x128xf32> -> vector<2x128xf32>
      %c0_44 = arith.constant 0 : index
      %c0_45 = arith.constant 0 : index
      %56 = vector.load %arg14[%c0_44, %c0_45] : memref<1x128xf32, #tpu.memory_space<vmem>>, vector<1x128xf32>
      %57 = vector.broadcast %56 : vector<1x128xf32> to vector<2x128xf32>
      %58 = arith.addf %55, %57 : vector<2x128xf32>
      %c0_46 = arith.constant 0 : index
      %c0_47 = arith.constant 0 : index
      %59 = vector.load %arg15[%c0_46, %c0_47] : memref<2x128xf32, #tpu.memory_space<vmem>>, vector<2x128xf32>
      tpu.vector_store %arg15[%c0_46, %c0_47], %58 {strides = array<i32>} : memref<2x128xf32, #tpu.memory_space<vmem>>, vector<2x128xf32>,
    } else {
    }
    return
  }
  func.func @transform_0(%arg0: i32, %arg1: i32) -> (i32, i32, i32) {
    %c0_i32 = arith.constant 0 : i32
    %c0_i32_0 = arith.constant 0 : i32
    return %arg0, %arg1, %c0_i32 : i32, i32, i32
  }
  func.func @transform_1(%arg0: i32, %arg1: i32) -> (i32, i32) {
    %c0_i32 = arith.constant 0 : i32
    %c0_i32_0 = arith.constant 0 : i32
    %c0_i32_1 = arith.constant 0 : i32
    return %c0_i32, %c0_i32_0 : i32, i32
  }
  func.func @transform_2(%arg0: i32, %arg1: i32) -> (i32, i32) {
    %c0_i32 = arith.constant 0 : i32
    %c0_i32_0 = arith.constant 0 : i32
    %c0_i32_1 = arith.constant 0 : i32
    return %c0_i32, %c0_i32_0 : i32, i32
  }
  func.func @transform_3(%arg0: i32, %arg1: i32) -> (i32, i32) {
    %c0_i32 = arith.constant 0 : i32
    %c0_i32_0 = arith.constant 0 : i32
    %c0_i32_1 = arith.constant 0 : i32
    return %c0_i32, %c0_i32_0 : i32, i32
  }
  func.func @transform_4(%arg0: i32, %arg1: i32) -> (i32, i32) {
    %c0_i32 = arith.constant 0 : i32
    %c0_i32_0 = arith.constant 0 : i32
    %c0_i32_1 = arith.constant 0 : i32
    return %c0_i32, %c0_i32_0 : i32, i32
  }
  func.func @transform_5(%arg0: i32, %arg1: i32) -> (i32, i32) {
    %c0_i32 = arith.constant 0 : i32
    %c0_i32_0 = arith.constant 0 : i32
    %c0_i32_1 = arith.constant 0 : i32
    return %c0_i32, %c0_i32_0 : i32, i32
  }
  func.func @transform_6(%arg0: i32, %arg1: i32) -> (i32, i32) {
    %c0_i32 = arith.constant 0 : i32
    %c0_i32_0 = arith.constant 0 : i32
    %c0_i32_1 = arith.constant 0 : i32
    return %c0_i32, %c0_i32_0 : i32, i32
  }
  func.func @transform_7(%arg0: i32, %arg1: i32) -> (i32, i32) {
    %c0_i32 = arith.constant 0 : i32
    %c0_i32_0 = arith.constant 0 : i32
    %c0_i32_1 = arith.constant 0 : i32
    return %c0_i32, %c0_i32_0 : i32, i32
  }
  func.func @transform_8(%arg0: i32, %arg1: i32) -> (i32, i32) {
    %c0_i32 = arith.constant 0 : i32
    %c0_i32_0 = arith.constant 0 : i32
    %c0_i32_1 = arith.constant 0 : i32
    return %c0_i32, %c0_i32_0 : i32, i32
  }
  func.func @transform_9(%arg0: i32, %arg1: i32) -> (i32, i32) {
    %c0_i32 = arith.constant 0 : i32
    %c0_i32_0 = arith.constant 0 : i32
    %c0_i32_1 = arith.constant 0 : i32
    return %c0_i32, %c0_i32_0 : i32, i32
  }
  func.func @transform_10(%arg0: i32, %arg1: i32) -> (i32, i32) {
    %c0_i32 = arith.constant 0 : i32
    %c0_i32_0 = arith.constant 0 : i32
    %c0_i32_1 = arith.constant 0 : i32
    return %c0_i32, %c0_i32_0 : i32, i32
  }
  func.func @transform_11(%arg0: i32, %arg1: i32) -> (i32, i32) {
    %c0_i32 = arith.constant 0 : i32
    %c0_i32_0 = arith.constant 0 : i32
    %c0_i32_1 = arith.constant 0 : i32
    return %c0_i32, %c0_i32_0 : i32, i32
  }
  func.func @transform_12(%arg0: i32, %arg1: i32) -> (i32, i32) {
    %c0_i32 = arith.constant 0 : i32
    %c0_i32_0 = arith.constant 0 : i32
    %c0_i32_1 = arith.constant 0 : i32
    return %c0_i32, %c0_i32_0 : i32, i32
  }
  func.func @transform_13(%arg0: i32, %arg1: i32) -> (i32, i32) {
    %c0_i32 = arith.constant 0 : i32
    %c0_i32_0 = arith.constant 0 : i32
    return %arg0, %c0_i32 : i32, i32
  }
}

</mosaic_0001>

<bundles_post_ra>
// kernel: tpu_custom_call.1
= control target key start
LH: loop header
LB: loop body
LE: loop exit
PB: predicated region body
PF: predicated region fallthrough
CT: control target
= control target key end

     0   :  { %18 = vsyncpa [#allocation4], 0  ;;  %s7997_s0 = inlined_call_operand.vmem [shape: bf16[2,128,3], index: 0, kind: input, shape index: {}]   ;;  %s7998_s1 = inlined_call_operand.hbm [shape: bf16[3,64], index: 1, kind: input, shape index: {}]   ;;  %s7999_s2 = inlined_call_operand.vmem [shape: f32[1,64], index: 2, kind: input, shape index: {}]   ;;  %s8000_s3 = inlined_call_operand.hbm [shape: bf16[64,128], index: 3, kind: input, shape index: {}]   ;;  %s8001_s4 = inlined_call_operand.hbm [shape: f32[1,128], index: 4, kind: input, shape index: {}]   ;;  %s8002_s5 = inlined_call_operand.hbm [shape: bf16[128,1024], index: 5, kind: input, shape index: {}]   ;;  %s8003_s6 = inlined_call_operand.vmem [shape: f32[1,1024], index: 6, kind: input, shape index: {}]   ;;  %s8004_s7 = inlined_call_operand.hbm [shape: bf16[1024,512], index: 7, kind: input, shape index: {}]   ;;  %s8005_s8 = inlined_call_operand.vmem [shape: f32[1,512], index: 8, kind: input, shape index: {}]   ;;  %s8006_s9 = inlined_call_operand.hbm [shape: bf16[512,256], index: 9, kind: input, shape index: {}]   ;;  %s8007_s10 = inlined_call_operand.hbm [shape: f32[1,256], index: 10, kind: input, shape index: {}]   ;;  %s8008_s11 = inlined_call_operand.vmem [shape: bf16[256,128], index: 11, kind: input, shape index: {}]   ;;  %s8009_s12 = inlined_call_operand.vmem [shape: f32[1,128], index: 12, kind: input, shape index: {}]   ;;  %s8010_s13 = inlined_call_operand.hbm [shape: f32[2,128], index: 13, kind: output, shape index: {}]  }
   0x1   :  { %19 = vsyncpa [#allocation7], 0 }
   0x2   :  { %20 = vsyncpa [#allocation10], 0 }
   0x3   :  { %21 = vsyncpa [#allocation13], 0  ;;  %s42_s27 = sshll.u32 %s8000_s3, 4  ;;  %s43_s27 = int_to_ptr.hbm [resolvable:$true] %s42_s27 }
   0x4   :  { %22 = vsyncpa [#allocation5], 0  ;;  %s7254_s28 = smov [#allocation6]   ;;  %s66_s15 = sshll.u32 %s8002_s5, 4  ;;  %s67_s15 = int_to_ptr.hbm [resolvable:$true] %s66_s15 }
   0x5   :  { %s44_s29 = sshll.u32 %s7254_s28, 4  ;;  %s7255_s16 = smov 64   ;;  %s45_s29 = int_to_ptr.vmem [resolvable:$true] %s44_s29 }
   0x6   :  { %s7256_s17 = smov 4   ;;  %s7257_s18 = smov [#allocation9]  }
   0x7   :  { %50 = dma.hbm_to_vmem [thread:$0]  %s43_s27, 512, %s45_s29, [#allocation7], %s7255_s16, %s7255_s16, %s7256_s17  }
   0x8   :  { %s68_s19 = sshll.u32 %s7257_s18, 4  ;;  %s7258_s20 = smov 512   ;;  %s69_s19 = int_to_ptr.vmem [resolvable:$true] %s68_s19 }
   0x9   :  { %s7259_s21 = smov 32   ;;  %s96_s23 = sshll.u32 %s8006_s9, 4  ;;  %s97_s23 = int_to_ptr.hbm [resolvable:$true] %s96_s23 }
   0xa   :  { %74 = dma.hbm_to_vmem [thread:$0]  %s67_s15, 8192, %s69_s19, [#allocation10], %s7258_s20, %s7258_s20, %s7259_s21  }
   0xb   :  { %s7260_s24 = smov [#allocation12]   ;;  %s30_s28 = sshll.u32 %s7998_s1, 4  ;;  %s31_s28 = int_to_ptr.hbm [resolvable:$true] %s30_s28 }
   0xc   :  { %s98_s25 = sshll.u32 %s7260_s24, 4  ;;  %s7261_s27 = smov 128   ;;  %s99_s25 = int_to_ptr.vmem [resolvable:$true] %s98_s25 }
   0xd   :  { %s7262_s29 = smov 8   ;;  %s7263_s30 = smov [#allocation3]  }
   0xe   :  { %104 = dma.hbm_to_vmem [thread:$0]  %s97_s23, 8192, %s99_s25, [#allocation13], %s7261_s27, %s7261_s27, %s7262_s29  }
   0xf   :  { %s32_s14 = sshll.u32 %s7263_s30, 4  ;;  %s56_s17 = sshll.u32 %s8001_s4, 4  ;;  %s33_s14 = int_to_ptr.vmem [resolvable:$true] %s32_s14  ;;  %s57_s17 = int_to_ptr.hbm [resolvable:$true] %s56_s17 }
  0x10   :  { %35 = dma.hbm_to_vmem [thread:$0]  %s31_s28, 32, %s33_s14, [#allocation4]  }
  0x11   :  { %s81_s19 = sshll.u32 %s8004_s7, 4  ;;  %s7264_s20 = smov [#allocation8]   ;;  %s82_s19 = int_to_ptr.hbm [resolvable:$true] %s81_s19 }
  0x12   :  { %s58_s21 = sshll.u32 %s7264_s20, 4  ;;  %s7265_s1 = smov [#allocation11]   ;;  %s59_s21 = int_to_ptr.vmem [resolvable:$true] %s58_s21 }
  0x13   :  { %61 = dma.hbm_to_vmem [thread:$0]  %s57_s17, 16, %s59_s21, [#allocation7]  }
  0x14   :  { %s83_s3 = sshll.u32 %s7265_s1, 4  ;;  %s7266_s22 = smov 256   ;;  %s84_s3 = int_to_ptr.vmem [resolvable:$true] %s83_s3 }
  0x15   :  { %s7267_s23 = smov 16   ;;  %s110_s25 = sshll.u32 %s8007_s10, 4  ;;  %s111_s25 = int_to_ptr.hbm [resolvable:$true] %s110_s25 }
  0x16   :  { %89 = dma.hbm_to_vmem [thread:$0]  %s82_s19, 32768, %s84_s3, [#allocation10], %s7266_s22, %s7266_s22, %s7267_s23  }
  0x17   :  { %s7268_s26 = smov [#allocation14]  }
  0x18   :  { %s112_s5 = sshll.u32 %s7268_s26, 4  ;;  %s113_s5 = int_to_ptr.vmem [resolvable:$true] %s112_s5 }
  0x19   :  { %115 = dma.hbm_to_vmem [thread:$0]  %s111_s25, 32, %s113_s5, [#allocation13]  }
  0x1a   :  { %7244 = dma.done.wait [#allocation4], 32  }
  0x1b   :  { %7245 = vsyncadd [#allocation4], 4294967264 }
  0x1c   :  { %7246 = dma.done.wait [#allocation7], 528  }
  0x1d   :  { %7247 = vsyncadd [#allocation7], 4294966768 }
  0x1e   :  { %7248 = dma.done.wait [#allocation10], 40960  }
  0x1f   :  { %7249 = vsyncadd [#allocation10], 4294926336 }
  0x20   :  { %7250 = dma.done.wait [#allocation13], 8224  }
  0x21   :  { %7251 = vsyncadd [#allocation13], 4294959072  ;;  %vm321_vm0 = vcmask 1040384   ;;  %vm322_vm1 = vcmask 1041408   ;;  %v7269_v0 = vmov 65535   ;;  %v6610_v5 = vld [vmem:[%s7997_s0] sm:$0xff] }
  0x22   :  { %v323_v1 = vsel %vm321_vm0, 4294967295, %v7269_v0  ;;  %v187_v3 = vld [vmem:[#allocation3] sm:$0x3]  ;;  %vm272_vm2 = vcmask 23552   ;;  %v6612_v7 = vld [vmem:[%s7997_s0 + $0x10] sm:$0xff]  ;;  %v6613_v8 = vld [vmem:[%s7997_s0 + $0x18] sm:$0xff] }
  0x23   :  { %v324_v2 = vsel %vm322_vm1, %v323_v1, 0  ;;  %v6611_v6 = vld [vmem:[%s7997_s0 + $0x8] sm:$0xff]  ;;  %v6614_v9 = vld [vmem:[%s7997_s0 + $0x20] sm:$0xff]  ;;  %v6616_v12 = vld [vmem:[%s7997_s0 + $0x30] sm:$0xff]  ;;  %vm501_vm3 = vcmask 523264   ;;  %vm2150_vm4 = vcmask 1045508  }
  0x24   :  { %v326_v4 = vand.u32 %v324_v2, %v187_v3  ;;  %v6615_v10 = vld [vmem:[%s7997_s0 + $0x28] sm:$0xff]  ;;  %v6628_v13 = vld [vmem:[#allocation6 + $0x10] sm:$0xff]  ;;  %v6627_v14 = vld [vmem:[#allocation6 + $0x8] sm:$0xff]  ;;  %vm2152_vm5 = vcmask 1043456   ;;  %vm2168_vm6 = vcmask 1041409   ;;  %vm2170_vm7 = vcmask 1043459  }
  0x25   :  { %v6629_v11 = vld [vmem:[#allocation6 + $0x18] sm:$0xff]  ;;  %v6626_v15 = vld [vmem:[#allocation6] sm:$0xff]  ;;  %v6617_v16 = vld [vmem:[%s7997_s0 + $0x38] sm:$0xff]  ;;  %vm2172_vm8 = vcmask 1045509   ;;  %vm2174_vm9 = vcmask 1047559   ;;  %s4885_s26 = sshll.u32 %s8010_s13, 4  ;;  %s4886_s26 = int_to_ptr.hbm [resolvable:$true] %s4885_s26 }
  0x26   :  { %335 = vmatpush.bf16.msra.mxu0 %v326_v4  ;;  %554 = vmatpush.bf16.msra.mxu1 %v6629_v11  ;;  %v6618_v17 = vld [vmem:[%s7997_s0 + $0x40] sm:$0xff]  ;;  %v6619_v26 = vld [vmem:[%s7997_s0 + $0x48] sm:$0xff]  ;;  %v6620_v34 = vld [vmem:[%s7997_s0 + $0x50] sm:$0xff] }
  0x27   :  { %v7401_v19 = vld [vmem:[%s7999_s2] ss:$0 sm:$0xff]  ;;  %v6621_v42 = vld [vmem:[%s7997_s0 + $0x58] sm:$0xff]  ;;  %v5244_v57 = vld [vmem:[#allocation9 + $0x1c8] sm:$0xf] }
  0x28   :  { %v6622_v50 = vld [vmem:[%s7997_s0 + $0x60] sm:$0xff]  ;;  %v6691_v58 = vld [vmem:[#allocation9 + $0x1e4] sm:$0xf0]  ;;  %v6687_v60 = vld [vmem:[#allocation9 + $0x1cc] sm:$0xf] }
  0x29   :  { %4962 = vmatmul.msk.bf16.vlgmr.msra.gmra.mxu0 %vm272_vm2, %v6610_v5  ;;  %v5245_v59 = vor.u32 %v6691_v58, %v5244_v57  ;;  %v5246_v61 = vld [vmem:[#allocation9 + $0x1e8] sm:$0xf0]  ;;  %v6623_v0 = vld [vmem:[%s7997_s0 + $0x68] sm:$0xff] }
  0x2a   :  { %555 = vmatpush.bf16.msra.mxu1 %v6628_v13  ;;  %v5249_v63 = vor.u32 %v6687_v60, %v5246_v61  ;;  %v5236_v5 = vld [vmem:[#allocation9 + $0x1c0] sm:$0xf]  ;;  %v5214_v57 = vld [vmem:[#allocation9 + $0x1a8] sm:$0xf0] }
  0x2b   :  { %1249 = vmatpush.bf16.msrb.mxu0 %v5245_v59 }
  0x2e   :  { %556 = vmatpush.bf16.msra.mxu1 %v6627_v14  ;;  %v5204_v14 = vld [vmem:[#allocation9 + $0x180] sm:$0xf] }
  0x32   :  { %557 = vmatpush.bf16.msra.mxu1 %v6626_v15  ;;  %v6682_v15 = vld [vmem:[#allocation9 + $0x19c] sm:$0xf0] }
  0x36   :  { %1338 = vmatpush.bf16.msrb.mxu1 %v5249_v63  ;;  %v6650_v63 = vld [vmem:[#allocation9 + $0x9c] sm:$0xf0] }
  0x39   :  { %4963 = vmatmul.msk.bf16.gmra.mxu0 %vm272_vm2, %v6611_v6  ;;  %v6690_v6 = vld [vmem:[#allocation9 + $0x1dc] sm:$0xf0] }
  0x49   :  { %4964 = vmatmul.msk.bf16.gmra.mxu0 %vm272_vm2, %v6612_v7  ;;  %v6686_v7 = vld [vmem:[#allocation9 + $0x1c4] sm:$0xf] }
  0x59   :  { %4965 = vmatmul.msk.bf16.gmra.mxu0 %vm272_vm2, %v6613_v8  ;;  %v5237_v8 = vor.u32 %v6690_v6, %v5236_v5  ;;  %v6625_v5 = vld [vmem:[%s7997_s0 + $0x78] sm:$0xff] }
  0x5b   :  { %1071 = vmatpush.bf16.msra.mxu2 %v5237_v8 }
  0x69   :  { %4966 = vmatmul.msk.bf16.gmra.mxu0 %vm272_vm2, %v6614_v9  ;;  %v5238_v9 = vld [vmem:[#allocation9 + $0x1e0] sm:$0xf0] }
  0x79   :  { %4967 = vmatmul.msk.bf16.gmra.mxu0 %vm272_vm2, %v6615_v10 }
  0x89   :  { %4968 = vmatmul.msk.bf16.gmra.mxu0 %vm272_vm2, %v6616_v12  ;;  %v5241_v12 = vor.u32 %v6686_v7, %v5238_v9  ;;  %v5044_v9 = vld [vmem:[#allocation9 + $0x40] sm:$0xf] }
  0x8b   :  { %1160 = vmatpush.bf16.msra.mxu3 %v5241_v12 }
  0x99   :  { %4969 = vmatmul.msk.bf16.gmra.mxu0 %vm272_vm2, %v6617_v16  ;;  %v6678_v16 = vld [vmem:[#allocation9 + $0x184] sm:$0xf] }
  0xa6   :  { %v337_v18 = vpop.f32.mrf.mxu0 }
  0xa7   :  { %v338_v20 = vadd.f32 %v7401_v19, %v337_v18  ;;  %v5206_v18 = vld [vmem:[#allocation9 + $0x1a0] sm:$0xf0] }
  0xa9   :  { %4970 = vmatmul.msk.bf16.gmra.mxu0 %vm272_vm2, %v6618_v17  ;;  %v417_v23 = vmax.f32 %v338_v20, 0.0  ;;  %v5205_v17 = vor.u32 %v6682_v15, %v5204_v14  ;;  %v5212_v20 = vld [vmem:[#allocation9 + $0x188] sm:$0xf] }
  0xaa   :  { %v5052_v14 = vld [vmem:[#allocation9 + $0x48] sm:$0xf] }
  0xab   :  { %1072 = vmatpush.bf16.msra.mxu2 %v5205_v17  ;;  %v6643_v15 = vld [vmem:[#allocation9 + $0x64] sm:$0xf0] }
  0xac   :  { %v5053_v17 = vor.u32 %v6643_v15, %v5052_v14 }
  0xae   :  { %v339_v21 = vpop.f32.mrf.mxu0 }
  0xaf   :  { %v340_v22 = vadd.f32 %v7401_v19, %v339_v21  ;;  %v6683_v21 = vld [vmem:[#allocation9 + $0x1a4] sm:$0xf0] }
  0xb1   :  { %v418_v24 = vmax.f32 %v340_v22, 0.0  ;;  %v6624_v22 = vld [vmem:[%s7997_s0 + $0x70] sm:$0xff] }
  0xb3   :  { %v449_v25 = vpack.c.bf16 %v418_v24, %v417_v23  ;;  %v5209_v23 = vor.u32 %v6678_v16, %v5206_v18  ;;  %v5213_v24 = vor.u32 %v6683_v21, %v5212_v20  ;;  %v5012_v18 = vld [vmem:[#allocation9] sm:$0xf]  ;;  %v6630_v21 = vld [vmem:[#allocation9 + $0x4] sm:$0xf] }
  0xb4   :  { %v6634_v20 = vld [vmem:[#allocation9 + $0x1c] sm:$0xf0] }
  0xb5   :  { %4994 = vmatmul.msk.bf16.vlgmr.msra.gmra.mxu1 %vm501_vm3, %v449_v25  ;;  %1161 = vmatpush.bf16.msra.mxu3 %v5209_v23  ;;  %v5014_v23 = vld [vmem:[#allocation9 + $0x20] sm:$0xf0] }
  0xb6   :  { %v342_v27 = vpop.f32.mrf.mxu0  ;;  %1250 = vmatpush.bf16.msrb.mxu0 %v5213_v24  ;;  %v5020_v24 = vld [vmem:[#allocation9 + $0x8] sm:$0xf] }
  0xb7   :  { %v343_v28 = vadd.f32 %v7401_v19, %v342_v27  ;;  %v6674_v27 = vld [vmem:[#allocation9 + $0x15c] sm:$0xf0] }
  0xb9   :  { %4971 = vmatmul.msk.bf16.gmra.mxu0 %vm272_vm2, %v6619_v26  ;;  %v419_v31 = vmax.f32 %v343_v28, 0.0  ;;  %v5172_v26 = vld [vmem:[#allocation9 + $0x140] sm:$0xf]  ;;  %v6670_v28 = vld [vmem:[#allocation9 + $0x144] sm:$0xf] }
  0xbe   :  { %v344_v29 = vpop.f32.mrf.mxu0 }
  0xbf   :  { %v345_v30 = vadd.f32 %v7401_v19, %v344_v29  ;;  %v5173_v29 = vor.u32 %v6674_v27, %v5172_v26  ;;  %v5017_v27 = vor.u32 %v6630_v21, %v5014_v23 }
  0xc1   :  { %v420_v32 = vmax.f32 %v345_v30, 0.0  ;;  %v5174_v30 = vld [vmem:[#allocation9 + $0x160] sm:$0xf0]  ;;  %1073 = vmatpush.bf16.msra.mxu2 %v5173_v29 }
  0xc3   :  { %v450_v33 = vpack.c.bf16 %v420_v32, %v419_v31  ;;  %v5180_v31 = vld [vmem:[#allocation9 + $0x148] sm:$0xf] }
  0xc4   :  { %v6675_v32 = vld [vmem:[#allocation9 + $0x164] sm:$0xf0] }
  0xc5   :  { %4995 = vmatmul.msk.bf16.gmra.mxu1 %vm501_vm3, %v450_v33  ;;  %v5177_v33 = vor.u32 %v6670_v28, %v5174_v30 }
  0xc6   :  { %v347_v35 = vpop.f32.mrf.mxu0 }
  0xc7   :  { %v348_v36 = vadd.f32 %v7401_v19, %v347_v35  ;;  %1162 = vmatpush.bf16.msra.mxu3 %v5177_v33  ;;  %v5140_v35 = vld [vmem:[#allocation9 + $0x100] sm:$0xf] }
  0xc9   :  { %4972 = vmatmul.msk.bf16.gmra.mxu0 %vm272_vm2, %v6620_v34  ;;  %v421_v39 = vmax.f32 %v348_v36, 0.0  ;;  %v5181_v34 = vor.u32 %v6675_v32, %v5180_v31  ;;  %v6666_v36 = vld [vmem:[#allocation9 + $0x11c] sm:$0xf0] }
  0xcb   :  { %1251 = vmatpush.bf16.msrb.mxu0 %v5181_v34 }
  0xce   :  { %v349_v37 = vpop.f32.mrf.mxu0 }
  0xcf   :  { %v350_v38 = vadd.f32 %v7401_v19, %v349_v37  ;;  %v6662_v37 = vld [vmem:[#allocation9 + $0x104] sm:$0xf] }
  0xd1   :  { %v422_v40 = vmax.f32 %v350_v38, 0.0  ;;  %v5141_v38 = vor.u32 %v6666_v36, %v5140_v35 }
  0xd3   :  { %v451_v41 = vpack.c.bf16 %v422_v40, %v421_v39  ;;  %v5142_v39 = vld [vmem:[#allocation9 + $0x120] sm:$0xf0]  ;;  %v5148_v40 = vld [vmem:[#allocation9 + $0x108] sm:$0xf]  ;;  %1074 = vmatpush.bf16.msra.mxu2 %v5141_v38 }
  0xd5   :  { %4996 = vmatmul.msk.bf16.gmra.mxu1 %vm501_vm3, %v451_v41  ;;  %v6667_v41 = vld [vmem:[#allocation9 + $0x124] sm:$0xf0] }
  0xd6   :  { %v352_v43 = vpop.f32.mrf.mxu0 }
  0xd7   :  { %v353_v44 = vadd.f32 %v7401_v19, %v352_v43  ;;  %v5145_v43 = vor.u32 %v6662_v37, %v5142_v39 }
  0xd9   :  { %4973 = vmatmul.msk.bf16.gmra.mxu0 %vm272_vm2, %v6621_v42  ;;  %v423_v47 = vmax.f32 %v353_v44, 0.0  ;;  %v5149_v44 = vor.u32 %v6667_v41, %v5148_v40  ;;  %1163 = vmatpush.bf16.msra.mxu3 %v5145_v43  ;;  %v6671_v40 = vld [vmem:[#allocation9 + $0x14c] sm:$0xf] }
  0xda   :  { %v5182_v41 = vld [vmem:[#allocation9 + $0x168] sm:$0xf0] }
  0xdb   :  { %1252 = vmatpush.bf16.msrb.mxu0 %v5149_v44  ;;  %v5185_v43 = vor.u32 %v6671_v40, %v5182_v41 }
  0xde   :  { %v354_v45 = vpop.f32.mrf.mxu0 }
  0xdf   :  { %v355_v46 = vadd.f32 %v7401_v19, %v354_v45 }
  0xe1   :  { %v424_v48 = vmax.f32 %v355_v46, 0.0 }
  0xe3   :  { %v452_v49 = vpack.c.bf16 %v424_v48, %v423_v47  ;;  %v5108_v47 = vld [vmem:[#allocation9 + $0xc0] sm:$0xf] }
  0xe4   :  { %v6658_v48 = vld [vmem:[#allocation9 + $0xdc] sm:$0xf0] }
  0xe5   :  { %4997 = vmatmul.msk.bf16.gmra.mxu1 %vm501_vm3, %v452_v49  ;;  %v6654_v49 = vld [vmem:[#allocation9 + $0xc4] sm:$0xf] }
  0xe6   :  { %v357_v51 = vpop.f32.mrf.mxu0 }
  0xe7   :  { %v358_v52 = vadd.f32 %v7401_v19, %v357_v51  ;;  %v5110_v51 = vld [vmem:[#allocation9 + $0xe0] sm:$0xf0] }
  0xe8   :  { %v5113_v58 = vor.u32 %v6654_v49, %v5110_v51 }
  0xe9   :  { %4974 = vmatmul.msk.bf16.gmra.mxu0 %vm272_vm2, %v6622_v50  ;;  %v425_v55 = vmax.f32 %v358_v52, 0.0  ;;  %v5109_v50 = vor.u32 %v6658_v48, %v5108_v47  ;;  %v5116_v52 = vld [vmem:[#allocation9 + $0xc8] sm:$0xf] }
  0xea   :  { %1164 = vmatpush.bf16.msra.mxu3 %v5113_v58 }
  0xeb   :  { %1075 = vmatpush.bf16.msra.mxu2 %v5109_v50 }
  0xee   :  { %v359_v53 = vpop.f32.mrf.mxu0 }
  0xef   :  { %v360_v54 = vadd.f32 %v7401_v19, %v359_v53  ;;  %v6659_v53 = vld [vmem:[#allocation9 + $0xe4] sm:$0xf0] }
  0xf0   :  { %v5117_v59 = vor.u32 %v6659_v53, %v5116_v52 }
  0xf1   :  { %v426_v56 = vmax.f32 %v360_v54, 0.0 }
  0xf2   :  { %1253 = vmatpush.bf16.msrb.mxu0 %v5117_v59 }
  0xf3   :  { %v453_v62 = vpack.c.bf16 %v426_v56, %v425_v55  ;;  %v6679_v56 = vld [vmem:[#allocation9 + $0x18c] sm:$0xf] }
  0xf4   :  { %v5217_v60 = vor.u32 %v6679_v56, %v5214_v57 }
  0xf5   :  { %4998 = vmatmul.msk.bf16.gmra.mxu1 %vm501_vm3, %v453_v62  ;;  %v5076_v62 = vld [vmem:[#allocation9 + $0x80] sm:$0xf] }
  0xf6   :  { %v362_v1 = vpop.f32.mrf.mxu0  ;;  %1339 = vmatpush.bf16.msrb.mxu1 %v5217_v60 }
  0xf7   :  { %v363_v2 = vadd.f32 %v7401_v19, %v362_v1  ;;  %v5077_v1 = vor.u32 %v6650_v63, %v5076_v62 }
  0xf9   :  { %4975 = vmatmul.msk.bf16.gmra.mxu0 %vm272_vm2, %v6623_v0  ;;  %v427_v10 = vmax.f32 %v363_v2, 0.0  ;;  %v6646_v0 = vld [vmem:[#allocation9 + $0x84] sm:$0xf]  ;;  %1076 = vmatpush.bf16.msra.mxu2 %v5077_v1 }
  0xfa   :  { %v5078_v2 = vld [vmem:[#allocation9 + $0xa0] sm:$0xf0]  ;;  %1340 = vmatpush.bf16.msrb.mxu1 %v5185_v43  ;;  %v5118_v43 = vld [vmem:[#allocation9 + $0xe8] sm:$0xf0] }
  0xfb   :  { %v5081_v6 = vor.u32 %v6646_v0, %v5078_v2 }
  0xfd   :  { %1165 = vmatpush.bf16.msra.mxu3 %v5081_v6 }
  0xfe   :  { %v364_v3 = vpop.f32.mrf.mxu0 }
  0xff   :  { %v365_v4 = vadd.f32 %v7401_v19, %v364_v3  ;;  %v5084_v3 = vld [vmem:[#allocation9 + $0x88] sm:$0xf] }
 0x101   :  { %v428_v11 = vmax.f32 %v365_v4, 0.0  ;;  %v6651_v4 = vld [vmem:[#allocation9 + $0xa4] sm:$0xf0] }
 0x102   :  { %v5085_v7 = vor.u32 %v6651_v4, %v5084_v3 }
 0x103   :  { %v454_v13 = vpack.c.bf16 %v428_v11, %v427_v10  ;;  %v6642_v10 = vld [vmem:[#allocation9 + $0x5c] sm:$0xf0]  ;;  %v6638_v11 = vld [vmem:[#allocation9 + $0x44] sm:$0xf] }
 0x104   :  { %1254 = vmatpush.bf16.msrb.mxu0 %v5085_v7  ;;  %v5045_v12 = vor.u32 %v6642_v10, %v5044_v9  ;;  %v6663_v10 = vld [vmem:[#allocation9 + $0x10c] sm:$0xf] }
 0x105   :  { %4999 = vmatmul.msk.bf16.gmra.mxu1 %vm501_vm3, %v454_v13  ;;  %v5046_v13 = vld [vmem:[#allocation9 + $0x60] sm:$0xf0] }
 0x106   :  { %v367_v25 = vpop.f32.mrf.mxu0  ;;  %v5049_v16 = vor.u32 %v6638_v11, %v5046_v13  ;;  %1077 = vmatpush.bf16.msra.mxu2 %v5045_v12  ;;  %v5150_v11 = vld [vmem:[#allocation9 + $0x128] sm:$0xf0] }
 0x107   :  { %v368_v42 = vadd.f32 %v7401_v19, %v367_v25  ;;  %v6635_v25 = vld [vmem:[#allocation9 + $0x24] sm:$0xf0]  ;;  %v5153_v12 = vor.u32 %v6663_v10, %v5150_v11 }
 0x108   :  { %1166 = vmatpush.bf16.msra.mxu3 %v5049_v16  ;;  %1255 = vmatpush.bf16.msrb.mxu0 %v5053_v17  ;;  %v5021_v28 = vor.u32 %v6635_v25, %v5020_v24 }
 0x109   :  { %4976 = vmatmul.msk.bf16.gmra.mxu0 %vm272_vm2, %v6624_v22  ;;  %v429_v54 = vmax.f32 %v368_v42, 0.0  ;;  %v5013_v22 = vor.u32 %v6634_v20, %v5012_v18  ;;  %1341 = vmatpush.bf16.msrb.mxu1 %v5153_v12 }
 0x10b   :  { %1078 = vmatpush.bf16.msra.mxu2 %v5013_v22 }
 0x10c   :  { %1167 = vmatpush.bf16.msra.mxu3 %v5017_v27  ;;  %1256 = vmatpush.bf16.msrb.mxu0 %v5021_v28 }
 0x10e   :  { %v369_v45 = vpop.f32.mrf.mxu0 }
 0x10f   :  { %v370_v46 = vadd.f32 %v7401_v19, %v369_v45  ;;  %v7458_v45 = vld [vmem:[#allocation8] ss:$0 sm:$0xff] }
 0x111   :  { %v430_v55 = vmax.f32 %v370_v46, 0.0 }
 0x113   :  { %v455_v61 = vpack.c.bf16 %v430_v55, %v429_v54 }
 0x115   :  { %5000 = vmatmul.msk.bf16.gmra.mxu1 %vm501_vm3, %v455_v61 }
 0x116   :  { %v372_v8 = vpop.f32.mrf.mxu0 }
 0x117   :  { %v373_v26 = vadd.f32 %v7401_v19, %v372_v8 }
 0x119   :  { %4977 = vmatmul.msk.bf16.gmra.mxu0 %vm272_vm2, %v6625_v5  ;;  %v431_v31 = vmax.f32 %v373_v26, 0.0 }
 0x11e   :  { %v374_v29 = vpop.f32.mrf.mxu0 }
 0x11f   :  { %v375_v30 = vadd.f32 %v7401_v19, %v374_v29 }
 0x121   :  { %v432_v32 = vmax.f32 %v375_v30, 0.0 }
 0x123   :  { %v456_v33 = vpack.c.bf16 %v432_v32, %v431_v31 }
 0x125   :  { %5001 = vmatmul.msk.bf16.gmra.mxu1 %vm501_vm3, %v456_v33 }
 0x126   :  { %v377_v34 = vpop.f32.mrf.mxu0 }
 0x127   :  { %v378_v35 = vadd.f32 %v7401_v19, %v377_v34 }
 0x129   :  { %v433_v38 = vmax.f32 %v378_v35, 0.0 }
 0x12e   :  { %v379_v36 = vpop.f32.mrf.mxu0 }
 0x12f   :  { %v380_v37 = vadd.f32 %v7401_v19, %v379_v36 }
 0x131   :  { %v434_v39 = vmax.f32 %v380_v37, 0.0 }
 0x132   :  { %v559_v42 = vpop.f32.mrf.mxu1 }
 0x133   :  { %v457_v44 = vpack.c.bf16 %v434_v39, %v433_v38  ;;  %v560_v47 = vadd.f32 %v7458_v45, %v559_v42  ;;  %v6655_v42 = vld [vmem:[#allocation9 + $0xcc] sm:$0xf] }
 0x135   :  { %5002 = vmatmul.msk.bf16.gmra.mxu1 %vm501_vm3, %v457_v44  ;;  %v639_v50 = vmax.f32 %v560_v47, 0.0  ;;  %v5121_v44 = vor.u32 %v6655_v42, %v5118_v43 }
 0x136   :  { %v382_v46 = vpop.f32.mrf.mxu0 }
 0x137   :  { %v383_v51 = vadd.f32 %v7401_v19, %v382_v46  ;;  %1342 = vmatpush.bf16.msrb.mxu1 %v5121_v44 }
 0x139   :  { %v435_v56 = vmax.f32 %v383_v51, 0.0 }
 0x13a   :  { %v561_v48 = vpop.f32.mrf.mxu1 }
 0x13b   :  { %v562_v49 = vadd.f32 %v7458_v45, %v561_v48 }
 0x13d   :  { %v640_v52 = vmax.f32 %v562_v49, 0.0 }
 0x13e   :  { %v384_v53 = vpop.f32.mrf.mxu0 }
 0x13f   :  { %v7464_v54 = vpack.c.bf16 %v640_v52, %v639_v50  ;;  %v385_v55 = vadd.f32 %v7401_v19, %v384_v53 }
 0x141   :  { %v436_v57 = vmax.f32 %v385_v55, 0.0  ;;  %1079 = vmatmul.bf16.vlgmr.msra.gmra.mxu2 %v7464_v54  ;;  %1168 = vmatmul.bf16.vlgmr.msra.gmra.mxu3 %v7464_v54 }
 0x142   :  { %1257 = vmatmul.bf16.vlgmr.msrb.gmra.mxu0 %v7464_v54  ;;  %v564_v58 = vpop.f32.mrf.mxu1 }
 0x143   :  { %v458_v59 = vpack.c.bf16 %v436_v57, %v435_v56  ;;  %v565_v61 = vadd.f32 %v7458_v45, %v564_v58 }
 0x145   :  { %5003 = vmatmul.msk.bf16.gmra.mxu1 %vm501_vm3, %v458_v59  ;;  %v641_v0 = vmax.f32 %v565_v61, 0.0 }
 0x146   :  { %v387_v60 = vpop.f32.mrf.mxu0 }
 0x147   :  { %v388_v1 = vadd.f32 %v7401_v19, %v387_v60 }
 0x149   :  { %v437_v6 = vmax.f32 %v388_v1, 0.0 }
 0x14a   :  { %v566_v62 = vpop.f32.mrf.mxu1 }
 0x14b   :  { %v567_v63 = vadd.f32 %v7458_v45, %v566_v62  ;;  %v6647_v62 = vld [vmem:[#allocation9 + $0x8c] sm:$0xf] }
 0x14d   :  { %v642_v2 = vmax.f32 %v567_v63, 0.0  ;;  %v5086_v63 = vld [vmem:[#allocation9 + $0xa8] sm:$0xf0] }
 0x14e   :  { %v389_v3 = vpop.f32.mrf.mxu0  ;;  %v5089_v1 = vor.u32 %v6647_v62, %v5086_v63 }
 0x14f   :  { %v7474_v4 = vpack.c.bf16 %v642_v2, %v641_v0  ;;  %v390_v5 = vadd.f32 %v7401_v19, %v389_v3 }
 0x150   :  { %1343 = vmatpush.bf16.msrb.mxu1 %v5089_v1 }
 0x151   :  { %v438_v7 = vmax.f32 %v390_v5, 0.0  ;;  %1084 = vmatmul.bf16.gmra.mxu2 %v7474_v4  ;;  %1173 = vmatmul.bf16.gmra.mxu3 %v7474_v4  ;;  %v6639_v5 = vld [vmem:[#allocation9 + $0x4c] sm:$0xf] }
 0x152   :  { %1262 = vmatmul.bf16.gmra.mxu0 %v7474_v4  ;;  %v569_v8 = vpop.f32.mrf.mxu1 }
 0x153   :  { %v459_v9 = vpack.c.bf16 %v438_v7, %v437_v6  ;;  %v570_v14 = vadd.f32 %v7458_v45, %v569_v8  ;;  %v5054_v6 = vld [vmem:[#allocation9 + $0x68] sm:$0xf0] }
 0x154   :  { %v5057_v10 = vor.u32 %v6639_v5, %v5054_v6 }
 0x155   :  { %5004 = vmatmul.msk.bf16.gmra.mxu1 %vm501_vm3, %v459_v9  ;;  %v643_v17 = vmax.f32 %v570_v14, 0.0  ;;  %v6631_v14 = vld [vmem:[#allocation9 + $0xc] sm:$0xf] }
 0x156   :  { %v392_v13 = vpop.f32.mrf.mxu0  ;;  %1344 = vmatpush.bf16.msrb.mxu1 %v5057_v10 }
 0x157   :  { %v393_v18 = vadd.f32 %v7401_v19, %v392_v13 }
 0x159   :  { %v439_v24 = vmax.f32 %v393_v18, 0.0 }
 0x15a   :  { %v571_v15 = vpop.f32.mrf.mxu1 }
 0x15b   :  { %v572_v16 = vadd.f32 %v7458_v45, %v571_v15  ;;  %v5022_v15 = vld [vmem:[#allocation9 + $0x28] sm:$0xf0] }
 0x15c   :  { %v5025_v18 = vor.u32 %v6631_v14, %v5022_v15 }
 0x15d   :  { %v644_v20 = vmax.f32 %v572_v16, 0.0 }
 0x15e   :  { %v394_v21 = vpop.f32.mrf.mxu0  ;;  %1345 = vmatpush.bf16.msrb.mxu1 %v5025_v18 }
 0x15f   :  { %v7484_v22 = vpack.c.bf16 %v644_v20, %v643_v17  ;;  %v395_v23 = vadd.f32 %v7401_v19, %v394_v21 }
 0x161   :  { %v440_v25 = vmax.f32 %v395_v23, 0.0  ;;  %1089 = vmatmul.bf16.gmra.mxu2 %v7484_v22  ;;  %1178 = vmatmul.bf16.gmra.mxu3 %v7484_v22 }
 0x162   :  { %1267 = vmatmul.bf16.gmra.mxu0 %v7484_v22  ;;  %v574_v26 = vpop.f32.mrf.mxu1 }
 0x163   :  { %v460_v27 = vpack.c.bf16 %v440_v25, %v439_v24  ;;  %v575_v29 = vadd.f32 %v7458_v45, %v574_v26 }
 0x165   :  { %5005 = vmatmul.msk.bf16.gmra.mxu1 %vm501_vm3, %v460_v27  ;;  %v645_v32 = vmax.f32 %v575_v29, 0.0 }
 0x166   :  { %v397_v28 = vpop.f32.mrf.mxu0 }
 0x167   :  { %v398_v33 = vadd.f32 %v7401_v19, %v397_v28 }
 0x169   :  { %v441_v38 = vmax.f32 %v398_v33, 0.0 }
 0x16a   :  { %v576_v30 = vpop.f32.mrf.mxu1 }
 0x16b   :  { %v577_v31 = vadd.f32 %v7458_v45, %v576_v30 }
 0x16d   :  { %v646_v34 = vmax.f32 %v577_v31, 0.0 }
 0x16e   :  { %v399_v35 = vpop.f32.mrf.mxu0 }
 0x16f   :  { %v7494_v36 = vpack.c.bf16 %v646_v34, %v645_v32  ;;  %v400_v37 = vadd.f32 %v7401_v19, %v399_v35 }
 0x171   :  { %v442_v39 = vmax.f32 %v400_v37, 0.0  ;;  %1094 = vmatmul.bf16.gmra.mxu2 %v7494_v36  ;;  %1183 = vmatmul.bf16.gmra.mxu3 %v7494_v36 }
 0x172   :  { %1272 = vmatmul.bf16.gmra.mxu0 %v7494_v36  ;;  %v579_v40 = vpop.f32.mrf.mxu1 }
 0x173   :  { %v461_v41 = vpack.c.bf16 %v442_v39, %v441_v38  ;;  %v580_v47 = vadd.f32 %v7458_v45, %v579_v40 }
 0x175   :  { %5006 = vmatmul.msk.bf16.gmra.mxu1 %vm501_vm3, %v461_v41  ;;  %v647_v50 = vmax.f32 %v580_v47, 0.0 }
 0x176   :  { %v402_v46 = vpop.f32.mrf.mxu0 }
 0x177   :  { %v403_v51 = vadd.f32 %v7401_v19, %v402_v46 }
 0x179   :  { %v443_v57 = vmax.f32 %v403_v51, 0.0 }
 0x17a   :  { %v581_v48 = vpop.f32.mrf.mxu1 }
 0x17b   :  { %v582_v49 = vadd.f32 %v7458_v45, %v581_v48 }
 0x17d   :  { %v648_v52 = vmax.f32 %v582_v49, 0.0 }
 0x17e   :  { %v404_v53 = vpop.f32.mrf.mxu0 }
 0x17f   :  { %v7504_v55 = vpack.c.bf16 %v648_v52, %v647_v50  ;;  %v405_v56 = vadd.f32 %v7401_v19, %v404_v53 }
 0x181   :  { %v444_v58 = vmax.f32 %v405_v56, 0.0  ;;  %1099 = vmatmul.bf16.gmra.mxu2 %v7504_v55  ;;  %1188 = vmatmul.bf16.gmra.mxu3 %v7504_v55 }
 0x182   :  { %1277 = vmatmul.bf16.gmra.mxu0 %v7504_v55  ;;  %v584_v59 = vpop.f32.mrf.mxu1 }
 0x183   :  { %v462_v60 = vpack.c.bf16 %v444_v58, %v443_v57  ;;  %v585_v0 = vadd.f32 %v7458_v45, %v584_v59 }
 0x185   :  { %5007 = vmatmul.msk.bf16.gmra.mxu1 %vm501_vm3, %v462_v60  ;;  %v649_v7 = vmax.f32 %v585_v0, 0.0 }
 0x186   :  { %v407_v61 = vpop.f32.mrf.mxu0 }
 0x187   :  { %v408_v8 = vadd.f32 %v7401_v19, %v407_v61 }
 0x189   :  { %v445_v16 = vmax.f32 %v408_v8, 0.0 }
 0x18a   :  { %v586_v2 = vpop.f32.mrf.mxu1 }
 0x18b   :  { %v587_v3 = vadd.f32 %v7458_v45, %v586_v2 }
 0x18d   :  { %v650_v9 = vmax.f32 %v587_v3, 0.0 }
 0x18e   :  { %v409_v11 = vpop.f32.mrf.mxu0 }
 0x18f   :  { %v7514_v12 = vpack.c.bf16 %v650_v9, %v649_v7  ;;  %v410_v13 = vadd.f32 %v7401_v19, %v409_v11 }
 0x191   :  { %v446_v17 = vmax.f32 %v410_v13, 0.0  ;;  %1104 = vmatmul.bf16.gmra.mxu2 %v7514_v12  ;;  %1193 = vmatmul.bf16.gmra.mxu3 %v7514_v12 }
 0x192   :  { %1282 = vmatmul.bf16.gmra.mxu0 %v7514_v12  ;;  %v589_v20 = vpop.f32.mrf.mxu1 }
 0x193   :  { %v463_v21 = vpack.c.bf16 %v446_v17, %v445_v16  ;;  %v590_v24 = vadd.f32 %v7458_v45, %v589_v20 }
 0x195   :  { %5008 = vmatmul.msk.bf16.gmra.mxu1 %vm501_vm3, %v463_v21  ;;  %v651_v27 = vmax.f32 %v590_v24, 0.0 }
 0x196   :  { %v412_v23 = vpop.f32.mrf.mxu0 }
 0x197   :  { %v413_v28 = vadd.f32 %v7401_v19, %v412_v23 }
 0x199   :  { %v447_v33 = vmax.f32 %v413_v28, 0.0 }
 0x19a   :  { %v591_v25 = vpop.f32.mrf.mxu1 }
 0x19b   :  { %v592_v26 = vadd.f32 %v7458_v45, %v591_v25 }
 0x19d   :  { %v652_v29 = vmax.f32 %v592_v26, 0.0 }
 0x19e   :  { %v414_v30 = vpop.f32.mrf.mxu0 }
 0x19f   :  { %v7524_v31 = vpack.c.bf16 %v652_v29, %v651_v27  ;;  %v415_v32 = vadd.f32 %v7401_v19, %v414_v30 }
 0x1a1   :  { %v448_v34 = vmax.f32 %v415_v32, 0.0  ;;  %1109 = vmatmul.bf16.gmra.mxu2 %v7524_v31  ;;  %1198 = vmatmul.bf16.gmra.mxu3 %v7524_v31 }
 0x1a2   :  { %1287 = vmatmul.bf16.gmra.mxu0 %v7524_v31  ;;  %v594_v35 = vpop.f32.mrf.mxu1 }
 0x1a3   :  { %v464_v37 = vpack.c.bf16 %v448_v34, %v447_v33  ;;  %v595_v38 = vadd.f32 %v7458_v45, %v594_v35 }
 0x1a5   :  { %5009 = vmatmul.msk.bf16.gmra.mxu1 %vm501_vm3, %v464_v37  ;;  %v653_v41 = vmax.f32 %v595_v38, 0.0 }
 0x1aa   :  { %v596_v39 = vpop.f32.mrf.mxu1 }
 0x1ab   :  { %v597_v40 = vadd.f32 %v7458_v45, %v596_v39  ;;  %v6688_v39 = vld [vmem:[#allocation9 + $0x1d4] sm:$0xf] }
 0x1ad   :  { %v654_v42 = vmax.f32 %v597_v40, 0.0  ;;  %v5254_v40 = vld [vmem:[#allocation9 + $0x1f0] sm:$0xf0] }
 0x1af   :  { %v7533_v19 = vpack.c.bf16 %v654_v42, %v653_v41  ;;  %v5257_v42 = vor.u32 %v6688_v39, %v5254_v40  ;;  %v5222_v39 = vld [vmem:[#allocation9 + $0x1b0] sm:$0xf0]  ;;  %v5228_v40 = vld [vmem:[#allocation9 + $0x198] sm:$0xf] }
 0x1b1   :  { %1114 = vmatmul.bf16.gmra.mxu2 %v7533_v19  ;;  %1203 = vmatmul.bf16.gmra.mxu3 %v7533_v19 }
 0x1b2   :  { %1292 = vmatmul.bf16.gmra.mxu0 %v7533_v19  ;;  %v599_v43 = vpop.f32.mrf.mxu1  ;;  %1516 = vmatpush.bf16.msrb.mxu3 %v5257_v42  ;;  %v6685_v42 = vld [vmem:[#allocation9 + $0x1b4] sm:$0xf0] }
 0x1b3   :  { %v600_v44 = vadd.f32 %v7458_v45, %v599_v43 }
 0x1b5   :  { %1346 = vmatmul.bf16.vlgmr.msrb.gmra.mxu1 %v7464_v54  ;;  %v655_v48 = vmax.f32 %v600_v44, 0.0 }
 0x1ba   :  { %v601_v46 = vpop.f32.mrf.mxu1 }
 0x1bb   :  { %v602_v47 = vadd.f32 %v7458_v45, %v601_v46 }
 0x1bd   :  { %v656_v49 = vmax.f32 %v602_v47, 0.0 }
 0x1bf   :  { %v7541_v50 = vpack.c.bf16 %v656_v49, %v655_v48  ;;  %v1258_v51 = vpop.f32.mrf.mxu0 }
 0x1c1   :  { %1119 = vmatmul.bf16.gmra.mxu2 %v7541_v50  ;;  %1208 = vmatmul.bf16.gmra.mxu3 %v7541_v50 }
 0x1c2   :  { %1297 = vmatmul.bf16.gmra.mxu0 %v7541_v50  ;;  %v604_v52 = vpop.f32.mrf.mxu1 }
 0x1c3   :  { %v605_v59 = vadd.f32 %v7458_v45, %v604_v52 }
 0x1c4   :  { %v1080_v53 = vpop.f32.mrf.mxu2  ;;  %v1169_v56 = vpop.f32.mrf.mxu3 }
 0x1c5   :  { %1351 = vmatmul.bf16.gmra.mxu1 %v7474_v4  ;;  %v657_v0 = vmax.f32 %v605_v59, 0.0 }
 0x1c7   :  { %v1260_v57 = vpop.f32.mrf.mxu0 }
 0x1c8   :  { %v1827_v58 = vmax.f32 %v1258_v51, %v1260_v57  ;;  %v5252_v57 = vld [vmem:[#allocation9 + $0x1d0] sm:$0xf] }
 0x1ca   :  { %v606_v60 = vpop.f32.mrf.mxu1 }
 0x1cb   :  { %v607_v61 = vadd.f32 %v7458_v45, %v606_v60 }
 0x1cc   :  { %v1082_v62 = vpop.f32.mrf.mxu2  ;;  %v1171_v63 = vpop.f32.mrf.mxu3 }
 0x1cd   :  { %v658_v1 = vmax.f32 %v607_v61, 0.0  ;;  %v1785_v2 = vmax.f32 %v1080_v53, %v1082_v62  ;;  %v1806_v3 = vmax.f32 %v1169_v56, %v1171_v63  ;;  %v5260_v61 = vld [vmem:[#allocation9 + $0x1d8] sm:$0xf]  ;;  %v6689_v63 = vld [vmem:[#allocation9 + $0x1dc] sm:$0xf] }
 0x1ce   :  { %v6693_v62 = vld [vmem:[#allocation9 + $0x1f4] sm:$0xf0] }
 0x1cf   :  { %v7549_v5 = vpack.c.bf16 %v658_v1, %v657_v0  ;;  %v1263_v6 = vpop.f32.mrf.mxu0  ;;  %v5261_v0 = vor.u32 %v6693_v62, %v5260_v61  ;;  %v5262_v1 = vld [vmem:[#allocation9 + $0x1f8] sm:$0xf0] }
 0x1d0   :  { %v1828_v7 = vmax.f32 %v1827_v58, %v1263_v6  ;;  %v6692_v58 = vld [vmem:[#allocation9 + $0x1ec] sm:$0xf0] }
 0x1d1   :  { %1124 = vmatmul.bf16.gmra.mxu2 %v7549_v5  ;;  %1213 = vmatmul.bf16.gmra.mxu3 %v7549_v5  ;;  %v5253_v60 = vor.u32 %v6692_v58, %v5252_v57  ;;  %v5196_v57 = vld [vmem:[#allocation9 + $0x158] sm:$0xf] }
 0x1d2   :  { %1302 = vmatmul.bf16.gmra.mxu0 %v7549_v5  ;;  %v609_v8 = vpop.f32.mrf.mxu1  ;;  %v6677_v58 = vld [vmem:[#allocation9 + $0x174] sm:$0xf0] }
 0x1d3   :  { %v610_v16 = vadd.f32 %v7458_v45, %v609_v8  ;;  %1427 = vmatpush.bf16.msrb.mxu2 %v5253_v60  ;;  %1605 = vmatpush.bf16.msra.mxu0 %v5261_v0  ;;  %v5197_v61 = vor.u32 %v6677_v58, %v5196_v57 }
 0x1d4   :  { %v1085_v9 = vpop.f32.mrf.mxu2  ;;  %v1174_v10 = vpop.f32.mrf.mxu3 }
 0x1d5   :  { %v1786_v11 = vmax.f32 %v1785_v2, %v1085_v9  ;;  %v1807_v13 = vmax.f32 %v1806_v3, %v1174_v10  ;;  %1356 = vmatmul.bf16.gmra.mxu1 %v7484_v22  ;;  %v659_v23 = vmax.f32 %v610_v16, 0.0  ;;  %v5265_v3 = vor.u32 %v6689_v63, %v5262_v1 }
 0x1d7   :  { %v1265_v14 = vpop.f32.mrf.mxu0  ;;  %1694 = vmatpush.bf16.msra.mxu1 %v5265_v3  ;;  %v6668_v3 = vld [vmem:[#allocation9 + $0x12c] sm:$0xf0] }
 0x1d8   :  { %v1829_v15 = vmax.f32 %v1828_v7, %v1265_v14 }
 0x1da   :  { %v611_v17 = vpop.f32.mrf.mxu1 }
 0x1db   :  { %v612_v18 = vadd.f32 %v7458_v45, %v611_v17 }
 0x1dc   :  { %v1087_v20 = vpop.f32.mrf.mxu2  ;;  %v1176_v21 = vpop.f32.mrf.mxu3 }
 0x1dd   :  { %v660_v24 = vmax.f32 %v612_v18, 0.0  ;;  %v1787_v25 = vmax.f32 %v1786_v11, %v1087_v20  ;;  %v1808_v26 = vmax.f32 %v1807_v13, %v1176_v21 }
 0x1df   :  { %v7557_v27 = vpack.c.bf16 %v660_v24, %v659_v23  ;;  %v1268_v28 = vpop.f32.mrf.mxu0 }
 0x1e0   :  { %v1830_v29 = vmax.f32 %v1829_v15, %v1268_v28 }
 0x1e1   :  { %1129 = vmatmul.bf16.gmra.mxu2 %v7557_v27  ;;  %1218 = vmatmul.bf16.gmra.mxu3 %v7557_v27 }
 0x1e2   :  { %1307 = vmatmul.bf16.gmra.mxu0 %v7557_v27  ;;  %v614_v30 = vpop.f32.mrf.mxu1 }
 0x1e3   :  { %v615_v41 = vadd.f32 %v7458_v45, %v614_v30 }
 0x1e4   :  { %v1090_v32 = vpop.f32.mrf.mxu2  ;;  %v1179_v33 = vpop.f32.mrf.mxu3 }
 0x1e5   :  { %v1788_v34 = vmax.f32 %v1787_v25, %v1090_v32  ;;  %v1809_v35 = vmax.f32 %v1808_v26, %v1179_v33  ;;  %1361 = vmatmul.bf16.gmra.mxu1 %v7494_v36  ;;  %v661_v48 = vmax.f32 %v615_v41, 0.0  ;;  %v5220_v32 = vld [vmem:[#allocation9 + $0x190] sm:$0xf] }
 0x1e6   :  { %v6684_v33 = vld [vmem:[#allocation9 + $0x1ac] sm:$0xf0] }
 0x1e7   :  { %v1270_v37 = vpop.f32.mrf.mxu0 }
 0x1e8   :  { %v1831_v38 = vmax.f32 %v1830_v29, %v1270_v37 }
 0x1ea   :  { %v616_v43 = vpop.f32.mrf.mxu1 }
 0x1eb   :  { %v617_v44 = vadd.f32 %v7458_v45, %v616_v43 }
 0x1ec   :  { %v1092_v46 = vpop.f32.mrf.mxu2  ;;  %v1181_v47 = vpop.f32.mrf.mxu3 }
 0x1ed   :  { %v662_v49 = vmax.f32 %v617_v44, 0.0  ;;  %v1789_v51 = vmax.f32 %v1788_v34, %v1092_v46  ;;  %v1810_v52 = vmax.f32 %v1809_v35, %v1181_v47  ;;  %v6680_v34 = vld [vmem:[#allocation9 + $0x194] sm:$0xf]  ;;  %v5229_v46 = vor.u32 %v6685_v42, %v5228_v40  ;;  %v6652_v42 = vld [vmem:[#allocation9 + $0xac] sm:$0xf0] }
 0x1ee   :  { %v5225_v41 = vor.u32 %v6680_v34, %v5222_v39 }
 0x1ef   :  { %v7565_v53 = vpack.c.bf16 %v662_v49, %v661_v48  ;;  %v1273_v56 = vpop.f32.mrf.mxu0  ;;  %v5188_v48 = vld [vmem:[#allocation9 + $0x150] sm:$0xf]  ;;  %1606 = vmatpush.bf16.msra.mxu0 %v5229_v46 }
 0x1f0   :  { %v1832_v59 = vmax.f32 %v1831_v38, %v1273_v56  ;;  %v5221_v38 = vor.u32 %v6684_v33, %v5220_v32  ;;  %1517 = vmatpush.bf16.msrb.mxu3 %v5225_v41  ;;  %v6676_v49 = vld [vmem:[#allocation9 + $0x16c] sm:$0xf0]  ;;  %v5190_v56 = vld [vmem:[#allocation9 + $0x170] sm:$0xf0] }
 0x1f1   :  { %1134 = vmatmul.bf16.gmra.mxu2 %v7565_v53  ;;  %1223 = vmatmul.bf16.gmra.mxu3 %v7565_v53  ;;  %v5092_v41 = vld [vmem:[#allocation9 + $0x90] sm:$0xf] }
 0x1f2   :  { %1312 = vmatmul.bf16.gmra.mxu0 %v7565_v53  ;;  %v619_v2 = vpop.f32.mrf.mxu1  ;;  %1428 = vmatpush.bf16.msrb.mxu2 %v5221_v38 }
 0x1f3   :  { %v620_v13 = vadd.f32 %v7458_v45, %v619_v2  ;;  %v5156_v2 = vld [vmem:[#allocation9 + $0x110] sm:$0xf]  ;;  %1607 = vmatpush.bf16.msra.mxu0 %v5197_v61 }
 0x1f4   :  { %v1095_v6 = vpop.f32.mrf.mxu2  ;;  %v1184_v7 = vpop.f32.mrf.mxu3  ;;  %v6644_v61 = vld [vmem:[#allocation9 + $0x6c] sm:$0xf0] }
 0x1f5   :  { %v1790_v8 = vmax.f32 %v1789_v51, %v1095_v6  ;;  %v1811_v9 = vmax.f32 %v1810_v52, %v1184_v7  ;;  %1366 = vmatmul.bf16.gmra.mxu1 %v7504_v55  ;;  %v663_v18 = vmax.f32 %v620_v13, 0.0  ;;  %v6672_v51 = vld [vmem:[#allocation9 + $0x154] sm:$0xf]  ;;  %v5189_v52 = vor.u32 %v6676_v49, %v5188_v48  ;;  %v5164_v13 = vld [vmem:[#allocation9 + $0x118] sm:$0xf] }
 0x1f6   :  { %v5193_v60 = vor.u32 %v6672_v51, %v5190_v56  ;;  %v6664_v6 = vld [vmem:[#allocation9 + $0x114] sm:$0xf]  ;;  %v5100_v49 = vld [vmem:[#allocation9 + $0x98] sm:$0xf] }
 0x1f7   :  { %v1275_v10 = vpop.f32.mrf.mxu0  ;;  %1429 = vmatpush.bf16.msrb.mxu2 %v5189_v52  ;;  %v5094_v48 = vld [vmem:[#allocation9 + $0xb0] sm:$0xf0]  ;;  %v6653_v52 = vld [vmem:[#allocation9 + $0xb4] sm:$0xf0] }
 0x1f8   :  { %v1833_v11 = vmax.f32 %v1832_v59, %v1275_v10  ;;  %1518 = vmatpush.bf16.msrb.mxu3 %v5193_v60  ;;  %v5157_v10 = vor.u32 %v6668_v3, %v5156_v2  ;;  %v5101_v58 = vor.u32 %v6653_v52, %v5100_v49  ;;  %v5060_v60 = vld [vmem:[#allocation9 + $0x50] sm:$0xf]  ;;  %v6645_v2 = vld [vmem:[#allocation9 + $0x74] sm:$0xf0] }
 0x1fa   :  { %v621_v14 = vpop.f32.mrf.mxu1 }
 0x1fb   :  { %v622_v15 = vadd.f32 %v7458_v45, %v621_v14  ;;  %1430 = vmatpush.bf16.msrb.mxu2 %v5157_v10 }
 0x1fc   :  { %v1097_v16 = vpop.f32.mrf.mxu2  ;;  %v1186_v17 = vpop.f32.mrf.mxu3 }
 0x1fd   :  { %v664_v20 = vmax.f32 %v622_v15, 0.0  ;;  %v1791_v21 = vmax.f32 %v1790_v8, %v1097_v16  ;;  %v1812_v23 = vmax.f32 %v1811_v9, %v1186_v17  ;;  %v6669_v15 = vld [vmem:[#allocation9 + $0x134] sm:$0xf0] }
 0x1ff   :  { %v7573_v24 = vpack.c.bf16 %v664_v20, %v663_v18  ;;  %v1278_v25 = vpop.f32.mrf.mxu0  ;;  %v5165_v18 = vor.u32 %v6669_v15, %v5164_v13  ;;  %v5028_v13 = vld [vmem:[#allocation9 + $0x10] sm:$0xf]  ;;  %v6632_v15 = vld [vmem:[#allocation9 + $0x14] sm:$0xf] }
 0x200   :  { %v1834_v26 = vmax.f32 %v1833_v11, %v1278_v25  ;;  %v5158_v11 = vld [vmem:[#allocation9 + $0x130] sm:$0xf0]  ;;  %v5124_v25 = vld [vmem:[#allocation9 + $0xd0] sm:$0xf] }
 0x201   :  { %1139 = vmatmul.bf16.gmra.mxu2 %v7573_v24  ;;  %1228 = vmatmul.bf16.gmra.mxu3 %v7573_v24  ;;  %v5161_v14 = vor.u32 %v6664_v6, %v5158_v11 }
 0x202   :  { %1317 = vmatmul.bf16.gmra.mxu0 %v7573_v24  ;;  %v624_v28 = vpop.f32.mrf.mxu1 }
 0x203   :  { %v625_v43 = vadd.f32 %v7458_v45, %v624_v28  ;;  %1519 = vmatpush.bf16.msrb.mxu3 %v5161_v14  ;;  %v6660_v28 = vld [vmem:[#allocation9 + $0xec] sm:$0xf0]  ;;  %1608 = vmatpush.bf16.msra.mxu0 %v5165_v18 }
 0x204   :  { %v1100_v29 = vpop.f32.mrf.mxu2  ;;  %v1189_v30 = vpop.f32.mrf.mxu3  ;;  %v5125_v33 = vor.u32 %v6660_v28, %v5124_v25  ;;  %v6636_v14 = vld [vmem:[#allocation9 + $0x2c] sm:$0xf0]  ;;  %v5036_v25 = vld [vmem:[#allocation9 + $0x18] sm:$0xf] }
 0x205   :  { %v7578_v35 = vmax.f32 %v1791_v21, %v1100_v29  ;;  %v7580_v37 = vmax.f32 %v1812_v23, %v1189_v30  ;;  %1371 = vmatmul.bf16.gmra.mxu1 %v7514_v12  ;;  %v665_v62 = vmax.f32 %v625_v43, 0.0  ;;  %v6681_v21 = vld [vmem:[#allocation9 + $0x19c] sm:$0xf]  ;;  %v6656_v29 = vld [vmem:[#allocation9 + $0xd4] sm:$0xf] }
 0x206   :  { %v5230_v23 = vld [vmem:[#allocation9 + $0x1b8] sm:$0xf0]  ;;  %v5126_v30 = vld [vmem:[#allocation9 + $0xf0] sm:$0xf0]  ;;  %1431 = vmatpush.bf16.msrb.mxu2 %v5125_v33  ;;  %v6637_v28 = vld [vmem:[#allocation9 + $0x34] sm:$0xf0] }
 0x207   :  { %v1280_v44 = vpop.f32.mrf.mxu0  ;;  %v5129_v34 = vor.u32 %v6656_v29, %v5126_v30  ;;  %v6648_v43 = vld [vmem:[#allocation9 + $0x94] sm:$0xf] }
 0x208   :  { %v1835_v47 = vmax.f32 %v1834_v26, %v1280_v44  ;;  %v5233_v26 = vor.u32 %v6681_v21, %v5230_v23  ;;  %v5097_v51 = vor.u32 %v6648_v43, %v5094_v48  ;;  %v5029_v21 = vor.u32 %v6636_v14, %v5028_v13  ;;  %v5030_v23 = vld [vmem:[#allocation9 + $0x30] sm:$0xf0] }
 0x209   :  { %1520 = vmatpush.bf16.msrb.mxu3 %v5129_v34 }
 0x20a   :  { %v626_v59 = vpop.f32.mrf.mxu1  ;;  %1695 = vmatpush.bf16.msra.mxu1 %v5233_v26  ;;  %v5033_v26 = vor.u32 %v6632_v15, %v5030_v23 }
 0x20b   :  { %v627_v63 = vadd.f32 %v7458_v45, %v626_v59 }
 0x20c   :  { %v1102_v0 = vpop.f32.mrf.mxu2  ;;  %v1191_v1 = vpop.f32.mrf.mxu3 }
 0x20d   :  { %v666_v7 = vmax.f32 %v627_v63, 0.0  ;;  %v1793_v8 = vmax.f32 %v7578_v35, %v1102_v0  ;;  %v1814_v9 = vmax.f32 %v7580_v37, %v1191_v1  ;;  %v5132_v35 = vld [vmem:[#allocation9 + $0xd8] sm:$0xf]  ;;  %1521 = vmatpush.bf16.msrb.mxu3 %v5097_v51  ;;  %v5061_v63 = vor.u32 %v6644_v61, %v5060_v60  ;;  %v5062_v0 = vld [vmem:[#allocation9 + $0x70] sm:$0xf0] }
 0x20e   :  { %v6661_v37 = vld [vmem:[#allocation9 + $0xf4] sm:$0xf0]  ;;  %v5198_v60 = vld [vmem:[#allocation9 + $0x178] sm:$0xf0] }
 0x20f   :  { %v7587_v16 = vpack.c.bf16 %v666_v7, %v665_v62  ;;  %v1283_v17 = vpop.f32.mrf.mxu0  ;;  %v5133_v38 = vor.u32 %v6661_v37, %v5132_v35  ;;  %v6640_v62 = vld [vmem:[#allocation9 + $0x54] sm:$0xf]  ;;  %v5068_v1 = vld [vmem:[#allocation9 + $0x58] sm:$0xf] }
 0x210   :  { %v7589_v20 = vmax.f32 %v1835_v47, %v1283_v17  ;;  %v5093_v47 = vor.u32 %v6652_v42, %v5092_v41  ;;  %v5065_v6 = vor.u32 %v6640_v62, %v5062_v0 }
 0x211   :  { %1144 = vmatmul.bf16.gmra.mxu2 %v7587_v16  ;;  %1233 = vmatmul.bf16.gmra.mxu3 %v7587_v16 }
 0x212   :  { %1322 = vmatmul.bf16.gmra.mxu0 %v7587_v16  ;;  %v629_v32 = vpop.f32.mrf.mxu1  ;;  %1432 = vmatpush.bf16.msrb.mxu2 %v5093_v47 }
 0x213   :  { %v630_v56 = vadd.f32 %v7458_v45, %v629_v32  ;;  %1609 = vmatpush.bf16.msra.mxu0 %v5133_v38  ;;  %1522 = vmatpush.bf16.msrb.mxu3 %v5065_v6  ;;  %v5037_v32 = vor.u32 %v6637_v28, %v5036_v25 }
 0x214   :  { %v1105_v39 = vpop.f32.mrf.mxu2  ;;  %v1194_v40 = vpop.f32.mrf.mxu3 }
 0x215   :  { %v1794_v44 = vmax.f32 %v1793_v8, %v1105_v39  ;;  %v1815_v46 = vmax.f32 %v1814_v9, %v1194_v40  ;;  %1376 = vmatmul.bf16.gmra.mxu1 %v7524_v31  ;;  %v667_v7 = vmax.f32 %v630_v56, 0.0  ;;  %v5069_v9 = vor.u32 %v6645_v2, %v5068_v1 }
 0x216   :  { %1433 = vmatpush.bf16.msrb.mxu2 %v5061_v63 }
 0x217   :  { %v1285_v57 = vpop.f32.mrf.mxu0  ;;  %1610 = vmatpush.bf16.msra.mxu0 %v5101_v58  ;;  %1523 = vmatpush.bf16.msrb.mxu3 %v5033_v26 }
 0x218   :  { %v1837_v59 = vmax.f32 %v7589_v20, %v1285_v57 }
 0x21a   :  { %v631_v3 = vpop.f32.mrf.mxu1  ;;  %1434 = vmatpush.bf16.msrb.mxu2 %v5029_v21 }
 0x21b   :  { %v632_v8 = vadd.f32 %v7458_v45, %v631_v3  ;;  %1611 = vmatpush.bf16.msra.mxu0 %v5069_v9 }
 0x21c   :  { %v1107_v10 = vpop.f32.mrf.mxu2  ;;  %v1196_v11 = vpop.f32.mrf.mxu3 }
 0x21d   :  { %v668_v17 = vmax.f32 %v632_v8, 0.0  ;;  %v1795_v18 = vmax.f32 %v1794_v44, %v1107_v10  ;;  %v1816_v20 = vmax.f32 %v1815_v46, %v1196_v11 }
 0x21f   :  { %v7598_v29 = vpack.c.bf16 %v668_v17, %v667_v7  ;;  %v1288_v30 = vpop.f32.mrf.mxu0  ;;  %1612 = vmatpush.bf16.msra.mxu0 %v5037_v32 }
 0x220   :  { %v1838_v33 = vmax.f32 %v1837_v59, %v1288_v30  ;;  %v6673_v59 = vld [vmem:[#allocation9 + $0x15c] sm:$0xf] }
 0x221   :  { %1149 = vmatmul.bf16.gmra.mxu2 %v7598_v29  ;;  %1238 = vmatmul.bf16.gmra.mxu3 %v7598_v29  ;;  %v5201_v61 = vor.u32 %v6673_v59, %v5198_v60 }
 0x222   :  { %1327 = vmatmul.bf16.gmra.mxu0 %v7598_v29  ;;  %v634_v34 = vpop.f32.mrf.mxu1 }
 0x223   :  { %v635_v42 = vadd.f32 %v7458_v45, %v634_v34  ;;  %1696 = vmatpush.bf16.msra.mxu1 %v5201_v61 }
 0x224   :  { %v1110_v35 = vpop.f32.mrf.mxu2  ;;  %v1199_v37 = vpop.f32.mrf.mxu3 }
 0x225   :  { %v1796_v38 = vmax.f32 %v1795_v18, %v1110_v35  ;;  %v1817_v39 = vmax.f32 %v1816_v20, %v1199_v37  ;;  %1381 = vmatmul.bf16.gmra.mxu1 %v7533_v19  ;;  %v669_v48 = vmax.f32 %v635_v42, 0.0 }
 0x227   :  { %v1290_v40 = vpop.f32.mrf.mxu0 }
 0x228   :  { %v1839_v41 = vmax.f32 %v1838_v33, %v1290_v40 }
 0x22a   :  { %v636_v43 = vpop.f32.mrf.mxu1 }
 0x22b   :  { %v637_v44 = vadd.f32 %v7458_v45, %v636_v43 }
 0x22c   :  { %v1112_v46 = vpop.f32.mrf.mxu2  ;;  %v1201_v47 = vpop.f32.mrf.mxu3 }
 0x22d   :  { %v670_v49 = vmax.f32 %v637_v44, 0.0  ;;  %v1797_v51 = vmax.f32 %v1796_v38, %v1112_v46  ;;  %v1818_v52 = vmax.f32 %v1817_v39, %v1201_v47 }
 0x22f   :  { %v7606_v56 = vpack.c.bf16 %v670_v49, %v669_v48  ;;  %v1293_v57 = vpop.f32.mrf.mxu0 }
 0x230   :  { %v1840_v58 = vmax.f32 %v1839_v41, %v1293_v57  ;;  %v5166_v57 = vld [vmem:[#allocation9 + $0x138] sm:$0xf0] }
 0x231   :  { %1154 = vmatmul.bf16.gmra.mxu2 %v7606_v56  ;;  %1243 = vmatmul.bf16.gmra.mxu3 %v7606_v56 }
 0x232   :  { %1332 = vmatmul.bf16.gmra.mxu0 %v7606_v56  ;;  %v1347_v45 = vpop.f32.mrf.mxu1 }
 0x234   :  { %v1115_v62 = vpop.f32.mrf.mxu2  ;;  %v1204_v63 = vpop.f32.mrf.mxu3 }
 0x235   :  { %v1798_v0 = vmax.f32 %v1797_v51, %v1115_v62  ;;  %v1819_v1 = vmax.f32 %v1818_v52, %v1204_v63  ;;  %1386 = vmatmul.bf16.gmra.mxu1 %v7541_v50  ;;  %v6665_v52 = vld [vmem:[#allocation9 + $0x11c] sm:$0xf] }
 0x237   :  { %v1295_v2 = vpop.f32.mrf.mxu0 }
 0x238   :  { %v7612_v3 = vmax.f32 %v1840_v58, %v1295_v2  ;;  %v5169_v58 = vor.u32 %v6665_v52, %v5166_v57 }
 0x23a   :  { %v1349_v6 = vpop.f32.mrf.mxu1  ;;  %1697 = vmatpush.bf16.msra.mxu1 %v5169_v58 }
 0x23b   :  { %v1848_v7 = vmax.f32 %v1347_v45, %v1349_v6 }
 0x23c   :  { %v1117_v8 = vpop.f32.mrf.mxu2  ;;  %v1206_v9 = vpop.f32.mrf.mxu3 }
 0x23d   :  { %v1799_v10 = vmax.f32 %v1798_v0, %v1117_v8  ;;  %v1820_v11 = vmax.f32 %v1819_v1, %v1206_v9 }
 0x23f   :  { %v1800_v13 = vrot.slane %v1799_v10, 4  ;;  %v1821_v14 = vrot.slane %v1820_v11, 4  ;;  %v1298_v15 = vpop.f32.mrf.mxu0 }
 0x241   :  { %v1801_v17 = vmax.f32 %v1799_v10, %v1800_v13  ;;  %v1822_v18 = vmax.f32 %v1820_v11, %v1821_v14  ;;  %1435 = vmatmul.bf16.vlgmr.msrb.gmra.mxu2 %v7464_v54  ;;  %1524 = vmatmul.bf16.vlgmr.msrb.gmra.mxu3 %v7464_v54 }
 0x242   :  { %1613 = vmatmul.bf16.vlgmr.msra.gmra.mxu0 %v7464_v54  ;;  %v1352_v20 = vpop.f32.mrf.mxu1 }
 0x243   :  { %v1802_v21 = vrot.slane %v1801_v17, 2  ;;  %v1823_v23 = vrot.slane %v1822_v18, 2  ;;  %v1849_v25 = vmax.f32 %v1848_v7, %v1352_v20 }
 0x244   :  { %v1120_v26 = vpop.f32.mrf.mxu2  ;;  %v1209_v28 = vpop.f32.mrf.mxu3 }
 0x245   :  { %v1803_v30 = vmax.f32 %v1801_v17, %v1802_v21  ;;  %v1824_v32 = vmax.f32 %v1822_v18, %v1823_v23  ;;  %1391 = vmatmul.bf16.gmra.mxu1 %v7549_v5 }
 0x247   :  { %v1804_v33 = vrot.slane %v1803_v30, 1  ;;  %v1825_v34 = vrot.slane %v1824_v32, 1  ;;  %v1300_v35 = vpop.f32.mrf.mxu0 }
 0x248   :  { %v1995_v37 = vmax.f32 %v1298_v15, %v1300_v35 }
 0x249   :  { %v1826_v38 = vmax.f32 %v1824_v32, %v1825_v34  ;;  %v1805_v40 = vmax.f32 %v1803_v30, %v1804_v33 }
 0x24a   :  { %v1354_v39 = vpop.f32.mrf.mxu1 }
 0x24b   :  { %v2137_v41 = vrot.slane %v1826_v38, 6  ;;  %v1850_v42 = vmax.f32 %v1849_v25, %v1354_v39  ;;  %v6657_v38 = vld [vmem:[#allocation9 + $0xdc] sm:$0xf] }
 0x24c   :  { %v1122_v43 = vpop.f32.mrf.mxu2  ;;  %v1211_v44 = vpop.f32.mrf.mxu3  ;;  %v5134_v39 = vld [vmem:[#allocation9 + $0xf8] sm:$0xf0] }
 0x24d   :  { %v7619_v46 = vsel %vm322_vm1, %v1805_v40, %v2137_v41  ;;  %v1953_v47 = vmax.f32 %v1120_v26, %v1122_v43  ;;  %v1974_v48 = vmax.f32 %v1209_v28, %v1211_v44  ;;  %v5137_v40 = vor.u32 %v6657_v38, %v5134_v39 }
 0x24f   :  { %v1303_v49 = vpop.f32.mrf.mxu0  ;;  %1698 = vmatpush.bf16.msra.mxu1 %v5137_v40 }
 0x250   :  { %v1996_v51 = vmax.f32 %v1995_v37, %v1303_v49 }
 0x251   :  { %1440 = vmatmul.bf16.gmra.mxu2 %v7474_v4  ;;  %1529 = vmatmul.bf16.gmra.mxu3 %v7474_v4 }
 0x252   :  { %1618 = vmatmul.bf16.gmra.mxu0 %v7474_v4  ;;  %v1357_v59 = vpop.f32.mrf.mxu1 }
 0x253   :  { %v1851_v60 = vmax.f32 %v1850_v42, %v1357_v59 }
 0x254   :  { %v1125_v61 = vpop.f32.mrf.mxu2  ;;  %v1214_v45 = vpop.f32.mrf.mxu3 }
 0x255   :  { %v1954_v62 = vmax.f32 %v1953_v47, %v1125_v61  ;;  %v1975_v63 = vmax.f32 %v1974_v48, %v1214_v45  ;;  %1396 = vmatmul.bf16.gmra.mxu1 %v7557_v27 }
 0x257   :  { %v1305_v0 = vpop.f32.mrf.mxu0 }
 0x258   :  { %v1997_v1 = vmax.f32 %v1996_v51, %v1305_v0 }
 0x25a   :  { %v1359_v2 = vpop.f32.mrf.mxu1 }
 0x25b   :  { %v1852_v6 = vmax.f32 %v1851_v60, %v1359_v2 }
 0x25c   :  { %v1127_v7 = vpop.f32.mrf.mxu2  ;;  %v1216_v8 = vpop.f32.mrf.mxu3 }
 0x25d   :  { %v1955_v9 = vmax.f32 %v1954_v62, %v1127_v7  ;;  %v1976_v10 = vmax.f32 %v1975_v63, %v1216_v8 }
 0x25f   :  { %v1308_v11 = vpop.f32.mrf.mxu0 }
 0x260   :  { %v1998_v13 = vmax.f32 %v1997_v1, %v1308_v11  ;;  %v5102_v11 = vld [vmem:[#allocation9 + $0xb8] sm:$0xf0] }
 0x261   :  { %1445 = vmatmul.bf16.gmra.mxu2 %v7484_v22  ;;  %1534 = vmatmul.bf16.gmra.mxu3 %v7484_v22 }
 0x262   :  { %1623 = vmatmul.bf16.gmra.mxu0 %v7484_v22  ;;  %v1362_v14 = vpop.f32.mrf.mxu1 }
 0x263   :  { %v1853_v15 = vmax.f32 %v1852_v6, %v1362_v14 }
 0x264   :  { %v1130_v17 = vpop.f32.mrf.mxu2  ;;  %v1219_v18 = vpop.f32.mrf.mxu3 }
 0x265   :  { %v1956_v20 = vmax.f32 %v1955_v9, %v1130_v17  ;;  %v1977_v21 = vmax.f32 %v1976_v10, %v1219_v18  ;;  %1401 = vmatmul.bf16.gmra.mxu1 %v7565_v53  ;;  %v6649_v10 = vld [vmem:[#allocation9 + $0x9c] sm:$0xf] }
 0x267   :  { %v1310_v23 = vpop.f32.mrf.mxu0 }
 0x268   :  { %v1999_v25 = vmax.f32 %v1998_v13, %v1310_v23  ;;  %v5105_v13 = vor.u32 %v6649_v10, %v5102_v11 }
 0x26a   :  { %v1364_v26 = vpop.f32.mrf.mxu1  ;;  %1699 = vmatpush.bf16.msra.mxu1 %v5105_v13 }
 0x26b   :  { %v1854_v28 = vmax.f32 %v1853_v15, %v1364_v26 }
 0x26c   :  { %v1132_v30 = vpop.f32.mrf.mxu2  ;;  %v1221_v32 = vpop.f32.mrf.mxu3 }
 0x26d   :  { %v1957_v33 = vmax.f32 %v1956_v20, %v1132_v30  ;;  %v1978_v34 = vmax.f32 %v1977_v21, %v1221_v32  ;;  %v6641_v20 = vld [vmem:[#allocation9 + $0x5c] sm:$0xf] }
 0x26e   :  { %v5070_v21 = vld [vmem:[#allocation9 + $0x78] sm:$0xf0] }
 0x26f   :  { %v1313_v35 = vpop.f32.mrf.mxu0  ;;  %v5073_v26 = vor.u32 %v6641_v20, %v5070_v21  ;;  %v6633_v32 = vld [vmem:[#allocation9 + $0x1c] sm:$0xf] }
 0x270   :  { %v2000_v37 = vmax.f32 %v1999_v25, %v1313_v35 }
 0x271   :  { %1450 = vmatmul.bf16.gmra.mxu2 %v7494_v36  ;;  %1539 = vmatmul.bf16.gmra.mxu3 %v7494_v36 }
 0x272   :  { %1628 = vmatmul.bf16.gmra.mxu0 %v7494_v36  ;;  %v1367_v41 = vpop.f32.mrf.mxu1  ;;  %1700 = vmatpush.bf16.msra.mxu1 %v5073_v26 }
 0x273   :  { %v1855_v42 = vmax.f32 %v1854_v28, %v1367_v41 }
 0x274   :  { %v1135_v43 = vpop.f32.mrf.mxu2  ;;  %v1224_v44 = vpop.f32.mrf.mxu3 }
 0x275   :  { %v1958_v47 = vmax.f32 %v1957_v33, %v1135_v43  ;;  %v1979_v48 = vmax.f32 %v1978_v34, %v1224_v44  ;;  %1406 = vmatmul.bf16.gmra.mxu1 %v7573_v24  ;;  %v5038_v33 = vld [vmem:[#allocation9 + $0x38] sm:$0xf0] }
 0x276   :  { %v5041_v34 = vor.u32 %v6633_v32, %v5038_v33 }
 0x277   :  { %v1315_v49 = vpop.f32.mrf.mxu0 }
 0x278   :  { %v2001_v51 = vmax.f32 %v2000_v37, %v1315_v49  ;;  %1701 = vmatpush.bf16.msra.mxu1 %v5041_v34 }
 0x27a   :  { %v1369_v52 = vpop.f32.mrf.mxu1 }
 0x27b   :  { %v1856_v57 = vmax.f32 %v1855_v42, %v1369_v52 }
 0x27c   :  { %v1137_v58 = vpop.f32.mrf.mxu2  ;;  %v1226_v59 = vpop.f32.mrf.mxu3 }
 0x27d   :  { %v1959_v60 = vmax.f32 %v1958_v47, %v1137_v58  ;;  %v1980_v61 = vmax.f32 %v1979_v48, %v1226_v59  ;;  %v1842_v59 = vrot.slane %v7612_v3, 4 }
 0x27f   :  { %v1318_v45 = vpop.f32.mrf.mxu0 }
 0x280   :  { %v2002_v62 = vmax.f32 %v2001_v51, %v1318_v45 }
 0x281   :  { %1455 = vmatmul.bf16.gmra.mxu2 %v7504_v55  ;;  %1544 = vmatmul.bf16.gmra.mxu3 %v7504_v55 }
 0x282   :  { %1633 = vmatmul.bf16.gmra.mxu0 %v7504_v55  ;;  %v1372_v63 = vpop.f32.mrf.mxu1 }
 0x283   :  { %v1857_v0 = vmax.f32 %v1856_v57, %v1372_v63  ;;  %v1843_v63 = vmax.f32 %v7612_v3, %v1842_v59 }
 0x284   :  { %v1140_v1 = vpop.f32.mrf.mxu2  ;;  %v1229_v2 = vpop.f32.mrf.mxu3 }
 0x285   :  { %v1960_v6 = vmax.f32 %v1959_v60, %v1140_v1  ;;  %v1981_v7 = vmax.f32 %v1980_v61, %v1229_v2  ;;  %1411 = vmatmul.bf16.gmra.mxu1 %v7587_v16 }
 0x287   :  { %v1320_v8 = vpop.f32.mrf.mxu0 }
 0x288   :  { %v2003_v9 = vmax.f32 %v2002_v62, %v1320_v8 }
 0x28a   :  { %v1374_v14 = vpop.f32.mrf.mxu1 }
 0x28b   :  { %v1858_v15 = vmax.f32 %v1857_v0, %v1374_v14 }
 0x28c   :  { %v1142_v17 = vpop.f32.mrf.mxu2  ;;  %v1231_v18 = vpop.f32.mrf.mxu3 }
 0x28d   :  { %v1961_v23 = vmax.f32 %v1960_v6, %v1142_v17  ;;  %v1982_v25 = vmax.f32 %v1981_v7, %v1231_v18  ;;  %v1844_v7 = vrot.slane %v1843_v63, 2 }
 0x28f   :  { %v1323_v28 = vpop.f32.mrf.mxu0  ;;  %v1845_v13 = vmax.f32 %v1843_v63, %v1844_v7 }
 0x290   :  { %v2004_v30 = vmax.f32 %v2003_v9, %v1323_v28 }
 0x291   :  { %1460 = vmatmul.bf16.gmra.mxu2 %v7514_v12  ;;  %1549 = vmatmul.bf16.gmra.mxu3 %v7514_v12 }
 0x292   :  { %1638 = vmatmul.bf16.gmra.mxu0 %v7514_v12  ;;  %v1377_v35 = vpop.f32.mrf.mxu1 }
 0x293   :  { %v1859_v37 = vmax.f32 %v1858_v15, %v1377_v35 }
 0x294   :  { %v1145_v38 = vpop.f32.mrf.mxu2  ;;  %v1234_v39 = vpop.f32.mrf.mxu3 }
 0x295   :  { %v1962_v40 = vmax.f32 %v1961_v23, %v1145_v38  ;;  %v1983_v41 = vmax.f32 %v1982_v25, %v1234_v39  ;;  %1416 = vmatmul.bf16.gmra.mxu1 %v7598_v29  ;;  %v1846_v23 = vrot.slane %v1845_v13, 1 }
 0x297   :  { %v1325_v42 = vpop.f32.mrf.mxu0  ;;  %v1847_v32 = vmax.f32 %v1845_v13, %v1846_v23 }
 0x298   :  { %v2005_v43 = vmax.f32 %v2004_v30, %v1325_v42 }
 0x29a   :  { %v1379_v44 = vpop.f32.mrf.mxu1 }
 0x29b   :  { %v1860_v47 = vmax.f32 %v1859_v37, %v1379_v44 }
 0x29c   :  { %v1147_v48 = vpop.f32.mrf.mxu2  ;;  %v1236_v49 = vpop.f32.mrf.mxu3 }
 0x29d   :  { %v1963_v51 = vmax.f32 %v1962_v40, %v1147_v48  ;;  %v1984_v52 = vmax.f32 %v1983_v41, %v1236_v49  ;;  %v2138_v40 = vrot.slane %v1847_v32, 4 }
 0x29f   :  { %v1328_v57 = vpop.f32.mrf.mxu0 }
 0x2a0   :  { %v2006_v58 = vmax.f32 %v2005_v43, %v1328_v57 }
 0x2a1   :  { %1465 = vmatmul.bf16.gmra.mxu2 %v7524_v31  ;;  %1554 = vmatmul.bf16.gmra.mxu3 %v7524_v31 }
 0x2a2   :  { %1643 = vmatmul.bf16.gmra.mxu0 %v7524_v31  ;;  %v1382_v60 = vpop.f32.mrf.mxu1 }
 0x2a3   :  { %v1861_v61 = vmax.f32 %v1860_v47, %v1382_v60 }
 0x2a4   :  { %v1150_v45 = vpop.f32.mrf.mxu2  ;;  %v1239_v62 = vpop.f32.mrf.mxu3 }
 0x2a5   :  { %v1964_v0 = vmax.f32 %v1963_v51, %v1150_v45  ;;  %v1985_v1 = vmax.f32 %v1984_v52, %v1239_v62  ;;  %1421 = vmatmul.bf16.gmra.mxu1 %v7606_v56 }
 0x2a7   :  { %v1330_v2 = vpop.f32.mrf.mxu0 }
 0x2a8   :  { %v2007_v6 = vmax.f32 %v2006_v58, %v1330_v2 }
 0x2aa   :  { %v1384_v8 = vpop.f32.mrf.mxu1 }
 0x2ab   :  { %v1862_v9 = vmax.f32 %v1861_v61, %v1384_v8 }
 0x2ac   :  { %v1152_v10 = vpop.f32.mrf.mxu2  ;;  %v1241_v11 = vpop.f32.mrf.mxu3 }
 0x2ad   :  { %v1863_v14 = vrot.slane %v1862_v9, 4  ;;  %v1965_v15 = vmax.f32 %v1964_v0, %v1152_v10  ;;  %v1986_v17 = vmax.f32 %v1985_v1, %v1241_v11 }
 0x2af   :  { %v1864_v18 = vmax.f32 %v1862_v9, %v1863_v14  ;;  %v1333_v20 = vpop.f32.mrf.mxu0 }
 0x2b0   :  { %v2008_v21 = vmax.f32 %v2007_v6, %v1333_v20 }
 0x2b1   :  { %v1865_v3 = vrot.slane %v1864_v18, 2  ;;  %1470 = vmatmul.bf16.gmra.mxu2 %v7533_v19  ;;  %1559 = vmatmul.bf16.gmra.mxu3 %v7533_v19 }
 0x2b2   :  { %1648 = vmatmul.bf16.gmra.mxu0 %v7533_v19  ;;  %v1387_v25 = vpop.f32.mrf.mxu1 }
 0x2b3   :  { %v1866_v26 = vmax.f32 %v1864_v18, %v1865_v3 }
 0x2b4   :  { %v1155_v28 = vpop.f32.mrf.mxu2  ;;  %v1244_v30 = vpop.f32.mrf.mxu3 }
 0x2b5   :  { %v1867_v33 = vrot.slane %v1866_v26, 1  ;;  %v1966_v34 = vmax.f32 %v1965_v15, %v1155_v28  ;;  %v1987_v35 = vmax.f32 %v1986_v17, %v1244_v30  ;;  %1702 = vmatmul.bf16.vlgmr.msra.gmra.mxu1 %v7464_v54 }
 0x2b7   :  { %v1868_v37 = vmax.f32 %v1866_v26, %v1867_v33  ;;  %v1335_v38 = vpop.f32.mrf.mxu0 }
 0x2b8   :  { %v7651_v39 = vmax.f32 %v2008_v21, %v1335_v38 }
 0x2b9   :  { %v2139_v41 = vrot.slane %v1868_v37, 2 }
 0x2ba   :  { %v1389_v42 = vpop.f32.mrf.mxu1 }
 0x2bb   :  { %v2151_v43 = vsel %vm2150_vm4, %v2138_v40, %v2139_v41  ;;  %v2016_v44 = vmax.f32 %v1387_v25, %v1389_v42 }
 0x2bc   :  { %v7656_v47 = vsel %vm2152_vm5, %v7619_v46, %v2151_v43  ;;  %v1157_v48 = vpop.f32.mrf.mxu2  ;;  %v1246_v49 = vpop.f32.mrf.mxu3 }
 0x2bd   :  { %v1967_v51 = vmax.f32 %v1966_v34, %v1157_v48  ;;  %v1988_v54 = vmax.f32 %v1987_v35, %v1246_v49 }
 0x2bf   :  { %v1968_v52 = vrot.slane %v1967_v51, 4  ;;  %v1989_v57 = vrot.slane %v1988_v54, 4  ;;  %v1614_v58 = vpop.f32.mrf.mxu0 }
 0x2c1   :  { %v1969_v59 = vmax.f32 %v1967_v51, %v1968_v52  ;;  %v1990_v60 = vmax.f32 %v1988_v54, %v1989_v57  ;;  %1475 = vmatmul.bf16.gmra.mxu2 %v7541_v50  ;;  %1564 = vmatmul.bf16.gmra.mxu3 %v7541_v50 }
 0x2c2   :  { %1653 = vmatmul.bf16.gmra.mxu0 %v7541_v50  ;;  %v1392_v61 = vpop.f32.mrf.mxu1 }
 0x2c3   :  { %v1970_v45 = vrot.slane %v1969_v59, 2  ;;  %v1991_v62 = vrot.slane %v1990_v60, 2  ;;  %v2017_v46 = vmax.f32 %v2016_v44, %v1392_v61 }
 0x2c4   :  { %v1436_v63 = vpop.f32.mrf.mxu2  ;;  %v1525_v0 = vpop.f32.mrf.mxu3 }
 0x2c5   :  { %v1971_v1 = vmax.f32 %v1969_v59, %v1970_v45  ;;  %v1992_v2 = vmax.f32 %v1990_v60, %v1991_v62  ;;  %1707 = vmatmul.bf16.gmra.mxu1 %v7474_v4 }
 0x2c7   :  { %v1972_v6 = vrot.slane %v1971_v1, 1  ;;  %v1993_v7 = vrot.slane %v1992_v2, 1  ;;  %v1616_v8 = vpop.f32.mrf.mxu0 }
 0x2c8   :  { %v1911_v9 = vmax.f32 %v1614_v58, %v1616_v8 }
 0x2c9   :  { %v1994_v10 = vmax.f32 %v1992_v2, %v1993_v7  ;;  %v1973_v13 = vmax.f32 %v1971_v1, %v1972_v6 }
 0x2ca   :  { %v1394_v11 = vpop.f32.mrf.mxu1 }
 0x2cb   :  { %v2143_v14 = vrot.slane %v1994_v10, 6  ;;  %v2018_v15 = vmax.f32 %v2017_v46, %v1394_v11 }
 0x2cc   :  { %v1438_v17 = vpop.f32.mrf.mxu2  ;;  %v1527_v18 = vpop.f32.mrf.mxu3 }
 0x2cd   :  { %v7663_v20 = vsel %vm322_vm1, %v1973_v13, %v2143_v14  ;;  %v1869_v21 = vmax.f32 %v1436_v63, %v1438_v17  ;;  %v1890_v23 = vmax.f32 %v1525_v0, %v1527_v18  ;;  %v5380_v18 = vld [vmem:[#allocation11 + $0xe0] sm:$0xf] }
 0x2cf   :  { %v1619_v3 = vpop.f32.mrf.mxu0 }
 0x2d0   :  { %v1912_v25 = vmax.f32 %v1911_v9, %v1619_v3 }
 0x2d1   :  { %1480 = vmatmul.bf16.gmra.mxu2 %v7549_v5  ;;  %1569 = vmatmul.bf16.gmra.mxu3 %v7549_v5 }
 0x2d2   :  { %1658 = vmatmul.bf16.gmra.mxu0 %v7549_v5  ;;  %v1397_v4 = vpop.f32.mrf.mxu1 }
 0x2d3   :  { %v7668_v26 = vmax.f32 %v2018_v15, %v1397_v4  ;;  %v6756_v4 = vld [vmem:[#allocation11 + $0x1ec] sm:$0xf0] }
 0x2d4   :  { %v1441_v28 = vpop.f32.mrf.mxu2  ;;  %v1530_v30 = vpop.f32.mrf.mxu3 }
 0x2d5   :  { %v1870_v32 = vmax.f32 %v1869_v21, %v1441_v28  ;;  %v1891_v33 = vmax.f32 %v1890_v23, %v1530_v30  ;;  %1712 = vmatmul.bf16.gmra.mxu1 %v7484_v22  ;;  %v5508_v21 = vld [vmem:[#allocation11 + $0x1e0] sm:$0xf] }
 0x2d7   :  { %v1621_v34 = vpop.f32.mrf.mxu0 }
 0x2d8   :  { %v1913_v35 = vmax.f32 %v1912_v25, %v1621_v34  ;;  %v5364_v34 = vld [vmem:[#allocation11 + $0xc0] sm:$0xf] }
 0x2da   :  { %v7671_v37 = vpop.f32.mrf.mxu1 }
 0x2dc   :  { %v1443_v38 = vpop.f32.mrf.mxu2  ;;  %v1532_v40 = vpop.f32.mrf.mxu3 }
 0x2dd   :  { %v1871_v41 = vmax.f32 %v1870_v32, %v1443_v38  ;;  %v1892_v42 = vmax.f32 %v1891_v33, %v1532_v40  ;;  %v5509_v32 = vor.u32 %v6756_v4, %v5508_v21  ;;  %v5492_v38 = vld [vmem:[#allocation11 + $0x1c0] sm:$0xf] }
 0x2df   :  { %v1624_v43 = vpop.f32.mrf.mxu0  ;;  %3810 = vmatpush.bf16.msra.mxu3 %v5509_v32 }
 0x2e0   :  { %v1914_v44 = vmax.f32 %v1913_v35, %v1624_v43  ;;  %v6720_v35 = vld [vmem:[#allocation11 + $0xcc] sm:$0xf0] }
 0x2e1   :  { %1485 = vmatmul.bf16.gmra.mxu2 %v7557_v27  ;;  %1574 = vmatmul.bf16.gmra.mxu3 %v7557_v27  ;;  %v5365_v40 = vor.u32 %v6720_v35, %v5364_v34  ;;  %v5300_v35 = vld [vmem:[#allocation11 + $0x40] sm:$0xf] }
 0x2e2   :  { %1663 = vmatmul.bf16.gmra.mxu0 %v7557_v27  ;;  %v7676_v48 = vpop.f32.mrf.mxu1 }
 0x2e4   :  { %v1446_v49 = vpop.f32.mrf.mxu2  ;;  %v1535_v22 = vpop.f32.mrf.mxu3 }
 0x2e5   :  { %v1872_v51 = vmax.f32 %v1871_v41, %v1446_v49  ;;  %v1893_v54 = vmax.f32 %v1892_v42, %v1535_v22  ;;  %1717 = vmatmul.bf16.gmra.mxu1 %v7494_v36  ;;  %v6752_v41 = vld [vmem:[#allocation11 + $0x1cc] sm:$0xf0]  ;;  %v5476_v22 = vld [vmem:[#allocation11 + $0x1a0] sm:$0xf] }
 0x2e6   :  { %v5493_v42 = vor.u32 %v6752_v41, %v5492_v38  ;;  %v6716_v49 = vld [vmem:[#allocation11 + $0xac] sm:$0xf0] }
 0x2e7   :  { %v1626_v52 = vpop.f32.mrf.mxu0  ;;  %v6704_v38 = vld [vmem:[#allocation11 + $0x4c] sm:$0xf0] }
 0x2e8   :  { %v1915_v57 = vmax.f32 %v1914_v44, %v1626_v52  ;;  %3811 = vmatpush.bf16.msra.mxu3 %v5493_v42  ;;  %v5348_v44 = vld [vmem:[#allocation11 + $0xa0] sm:$0xf]  ;;  %v6748_v52 = vld [vmem:[#allocation11 + $0x1ac] sm:$0xf0]  ;;  %v5301_v42 = vor.u32 %v6704_v38, %v5300_v35  ;;  %v6709_v35 = vld [vmem:[#allocation11 + $0x74] sm:$0xf0] }
 0x2ea   :  { %v7679_v58 = vpop.f32.mrf.mxu1 }
 0x2ec   :  { %v1448_v59 = vpop.f32.mrf.mxu2  ;;  %v1537_v60 = vpop.f32.mrf.mxu3 }
 0x2ed   :  { %v1873_v61 = vmax.f32 %v1872_v51, %v1448_v59  ;;  %v1894_v45 = vmax.f32 %v1893_v54, %v1537_v60 }
 0x2ef   :  { %v1629_v62 = vpop.f32.mrf.mxu0 }
 0x2f0   :  { %v1916_v46 = vmax.f32 %v1915_v57, %v1629_v62  ;;  %v5477_v57 = vor.u32 %v6748_v52, %v5476_v22  ;;  %v5460_v62 = vld [vmem:[#allocation11 + $0x180] sm:$0xf]  ;;  %v6717_v22 = vld [vmem:[#allocation11 + $0xb4] sm:$0xf0] }
 0x2f1   :  { %1490 = vmatmul.bf16.gmra.mxu2 %v7565_v53  ;;  %1579 = vmatmul.bf16.gmra.mxu3 %v7565_v53  ;;  %v5412_v52 = vld [vmem:[#allocation11 + $0x120] sm:$0xf] }
 0x2f2   :  { %1668 = vmatmul.bf16.gmra.mxu0 %v7565_v53  ;;  %v7684_v63 = vpop.f32.mrf.mxu1  ;;  %3812 = vmatpush.bf16.msra.mxu3 %v5477_v57 }
 0x2f4   :  { %v1451_v0 = vpop.f32.mrf.mxu2  ;;  %v1540_v36 = vpop.f32.mrf.mxu3 }
 0x2f5   :  { %v1874_v1 = vmax.f32 %v1873_v61, %v1451_v0  ;;  %v1895_v2 = vmax.f32 %v1894_v45, %v1540_v36  ;;  %1722 = vmatmul.bf16.gmra.mxu1 %v7504_v55  ;;  %v6724_v55 = vld [vmem:[#allocation11 + $0xec] sm:$0xf0]  ;;  %v5332_v61 = vld [vmem:[#allocation11 + $0x80] sm:$0xf] }
 0x2f6   :  { %v5381_v25 = vor.u32 %v6724_v55, %v5380_v18  ;;  %v6712_v45 = vld [vmem:[#allocation11 + $0x8c] sm:$0xf0] }
 0x2f7   :  { %v1631_v6 = vpop.f32.mrf.mxu0  ;;  %v5333_v0 = vor.u32 %v6712_v45, %v5332_v61  ;;  %v6744_v36 = vld [vmem:[#allocation11 + $0x18c] sm:$0xf0]  ;;  %v5340_v45 = vld [vmem:[#allocation11 + $0x88] sm:$0xf] }
 0x2f8   :  { %v1917_v7 = vmax.f32 %v1916_v46, %v1631_v6  ;;  %3797 = vmatpush.bf16.msra.mxu2 %v5381_v25  ;;  %v5461_v6 = vor.u32 %v6744_v36, %v5460_v62  ;;  %v6721_v25 = vld [vmem:[#allocation11 + $0xd4] sm:$0xf0]  ;;  %v6732_v61 = vld [vmem:[#allocation11 + $0x12c] sm:$0xf0]  ;;  %v2010_v36 = vrot.slane %v7651_v39, 4 }
 0x2f9   :  { %v6713_v62 = vld [vmem:[#allocation11 + $0x94] sm:$0xf0] }
 0x2fa   :  { %v7687_v8 = vpop.f32.mrf.mxu1  ;;  %3813 = vmatpush.bf16.msra.mxu3 %v5461_v6 }
 0x2fc   :  { %v1453_v9 = vpop.f32.mrf.mxu2  ;;  %v1542_v10 = vpop.f32.mrf.mxu3  ;;  %3798 = vmatpush.bf16.msra.mxu2 %v5365_v40  ;;  %v5428_v40 = vld [vmem:[#allocation11 + $0x140] sm:$0xf] }
 0x2fd   :  { %v1875_v11 = vmax.f32 %v1874_v1, %v1453_v9  ;;  %v1896_v13 = vmax.f32 %v1895_v2, %v1542_v10  ;;  %v5388_v1 = vld [vmem:[#allocation11 + $0xe8] sm:$0xf]  ;;  %v6725_v2 = vld [vmem:[#allocation11 + $0xf4] sm:$0xf0] }
 0x2ff   :  { %v1634_v14 = vpop.f32.mrf.mxu0 }
 0x300   :  { %v1918_v15 = vmax.f32 %v1917_v7, %v1634_v14  ;;  %v5389_v7 = vor.u32 %v6725_v2, %v5388_v1  ;;  %v6708_v14 = vld [vmem:[#allocation11 + $0x6c] sm:$0xf0]  ;;  %v5341_v2 = vor.u32 %v6713_v62, %v5340_v45  ;;  %v5292_v45 = vld [vmem:[#allocation11 + $0x28] sm:$0xf]  ;;  %v6701_v62 = vld [vmem:[#allocation11 + $0x34] sm:$0xf0] }
 0x301   :  { %1495 = vmatmul.bf16.gmra.mxu2 %v7573_v24  ;;  %1584 = vmatmul.bf16.gmra.mxu3 %v7573_v24 }
 0x302   :  { %1673 = vmatmul.bf16.gmra.mxu0 %v7573_v24  ;;  %v7692_v17 = vpop.f32.mrf.mxu1 }
 0x303   :  { %4005 = vmatpush.bf16.msrb.mxu0 %v5389_v7  ;;  %v5268_v7 = vld [vmem:[#allocation11] sm:$0xf] }
 0x304   :  { %v1456_v23 = vpop.f32.mrf.mxu2  ;;  %v1545_v3 = vpop.f32.mrf.mxu3 }
 0x305   :  { %v1876_v28 = vmax.f32 %v1875_v11, %v1456_v23  ;;  %v1897_v30 = vmax.f32 %v1896_v13, %v1545_v3  ;;  %1727 = vmatmul.bf16.gmra.mxu1 %v7514_v12  ;;  %v5349_v12 = vor.u32 %v6716_v49, %v5348_v44  ;;  %v5316_v13 = vld [vmem:[#allocation11 + $0x60] sm:$0xf]  ;;  %v6740_v23 = vld [vmem:[#allocation11 + $0x16c] sm:$0xf0]  ;;  %v5372_v3 = vld [vmem:[#allocation11 + $0xc8] sm:$0xf] }
 0x306   :  { %v5317_v21 = vor.u32 %v6708_v14, %v5316_v13  ;;  %v6736_v44 = vld [vmem:[#allocation11 + $0x14c] sm:$0xf0]  ;;  %v5356_v49 = vld [vmem:[#allocation11 + $0xa8] sm:$0xf]  ;;  %v5396_v13 = vld [vmem:[#allocation11 + $0x100] sm:$0xf] }
 0x307   :  { %v1636_v33 = vpop.f32.mrf.mxu0  ;;  %3799 = vmatpush.bf16.msra.mxu2 %v5349_v12 }
 0x308   :  { %v1919_v59 = vmax.f32 %v1918_v15, %v1636_v33  ;;  %v5444_v15 = vld [vmem:[#allocation11 + $0x160] sm:$0xf] }
 0x309   :  { %v5445_v33 = vor.u32 %v6740_v23, %v5444_v15  ;;  %v5636_v15 = vld [vmem:[#allocation11 + $0x2e0] sm:$0xf] }
 0x30a   :  { %v7695_v43 = vpop.f32.mrf.mxu1  ;;  %v5764_v23 = vld [vmem:[#allocation11 + $0x3e0] sm:$0xf] }
 0x30b   :  { %3800 = vmatpush.bf16.msra.mxu2 %v5333_v0  ;;  %3814 = vmatpush.bf16.msra.mxu3 %v5445_v33  ;;  %v5413_v0 = vor.u32 %v6732_v61, %v5412_v52 }
 0x30c   :  { %v1458_v51 = vpop.f32.mrf.mxu2  ;;  %v1547_v54 = vpop.f32.mrf.mxu3 }
 0x30d   :  { %v1877_v10 = vmax.f32 %v1876_v28, %v1458_v51  ;;  %v1898_v11 = vmax.f32 %v1897_v30, %v1547_v54  ;;  %v5373_v28 = vor.u32 %v6721_v25, %v5372_v3  ;;  %v2020_v30 = vmax.f32 %v7668_v26, %v7671_v37  ;;  %v5284_v26 = vld [vmem:[#allocation11 + $0x20] sm:$0xf]  ;;  %v6700_v37 = vld [vmem:[#allocation11 + $0x2c] sm:$0xf0] }
 0x30e   :  { %v5429_v51 = vor.u32 %v6736_v44, %v5428_v40  ;;  %v6820_v3 = vld [vmem:[#allocation11 + $0x3ec] sm:$0xf0]  ;;  %v5748_v44 = vld [vmem:[#allocation11 + $0x3c0] sm:$0xf] }
 0x30f   :  { %v1639_v60 = vpop.f32.mrf.mxu0  ;;  %3801 = vmatpush.bf16.msra.mxu2 %v5317_v21  ;;  %4006 = vmatpush.bf16.msrb.mxu0 %v5373_v28  ;;  %v2021_v41 = vmax.f32 %v2020_v30, %v7676_v48  ;;  %v5765_v30 = vor.u32 %v6820_v3, %v5764_v23 }
 0x310   :  { %v7697_v46 = vmax.f32 %v1919_v59, %v1639_v60  ;;  %3815 = vmatpush.bf16.msra.mxu3 %v5429_v51  ;;  %v5285_v60 = vor.u32 %v6700_v37, %v5284_v26  ;;  %v5308_v51 = vld [vmem:[#allocation11 + $0x48] sm:$0xf] }
 0x311   :  { %1500 = vmatmul.bf16.gmra.mxu2 %v7587_v16  ;;  %1589 = vmatmul.bf16.gmra.mxu3 %v7587_v16  ;;  %v2022_v54 = vmax.f32 %v2021_v41, %v7679_v58  ;;  %v5620_v41 = vld [vmem:[#allocation11 + $0x2c0] sm:$0xf] }
 0x312   :  { %1678 = vmatmul.bf16.gmra.mxu0 %v7587_v16  ;;  %v7702_v9 = vpop.f32.mrf.mxu1 }
 0x313   :  { %3802 = vmatpush.bf16.msra.mxu2 %v5301_v42  ;;  %v2023_v57 = vmax.f32 %v2022_v54, %v7684_v63  ;;  %v6784_v42 = vld [vmem:[#allocation11 + $0x2cc] sm:$0xf0] }
 0x314   :  { %v1461_v18 = vpop.f32.mrf.mxu2  ;;  %v1550_v55 = vpop.f32.mrf.mxu3  ;;  %3816 = vmatpush.bf16.msra.mxu3 %v5413_v0 }
 0x315   :  { %v7704_v4 = vmax.f32 %v1877_v10, %v1461_v18  ;;  %v7706_v32 = vmax.f32 %v1898_v11, %v1550_v55  ;;  %1732 = vmatmul.bf16.gmra.mxu1 %v7524_v31  ;;  %v5357_v31 = vor.u32 %v6717_v22, %v5356_v49  ;;  %v2024_v58 = vmax.f32 %v2023_v57, %v7687_v8  ;;  %v6696_v10 = vld [vmem:[#allocation11 + $0xc] sm:$0xf0]  ;;  %v5604_v57 = vld [vmem:[#allocation11 + $0x2a0] sm:$0xf] }
 0x316   :  { %v5269_v14 = vor.u32 %v6696_v10, %v5268_v7  ;;  %v6728_v8 = vld [vmem:[#allocation11 + $0x10c] sm:$0xf0] }
 0x317   :  { %v1641_v34 = vpop.f32.mrf.mxu0  ;;  %4007 = vmatpush.bf16.msrb.mxu0 %v5357_v31  ;;  %3803 = vmatpush.bf16.msra.mxu2 %v5285_v60  ;;  %v2025_v63 = vmax.f32 %v2024_v58, %v7692_v17  ;;  %v5397_v21 = vor.u32 %v6728_v8, %v5396_v13  ;;  %v6788_v17 = vld [vmem:[#allocation11 + $0x2ec] sm:$0xf0]  ;;  %v6705_v31 = vld [vmem:[#allocation11 + $0x54] sm:$0xf0]  ;;  %v5293_v58 = vor.u32 %v6701_v62, %v5292_v45  ;;  %v5276_v8 = vld [vmem:[#allocation11 + $0x8] sm:$0xf] }
 0x318   :  { %v1921_v1 = vmax.f32 %v7697_v46, %v1641_v34  ;;  %v2011_v46 = vmax.f32 %v7651_v39, %v2010_v36  ;;  %v5637_v28 = vor.u32 %v6788_v17, %v5636_v15  ;;  %v5324_v34 = vld [vmem:[#allocation11 + $0x68] sm:$0xf]  ;;  %v5309_v54 = vor.u32 %v6705_v31, %v5308_v51  ;;  %v6776_v10 = vld [vmem:[#allocation11 + $0x28c] sm:$0xf0]  ;;  %v5540_v62 = vld [vmem:[#allocation11 + $0x220] sm:$0xf] }
 0x319   :  { %v2026_v18 = vmax.f32 %v2025_v63, %v7695_v43  ;;  %3817 = vmatpush.bf16.msra.mxu3 %v5397_v21  ;;  %v5325_v40 = vor.u32 %v6709_v35, %v5324_v34  ;;  %v5716_v63 = vld [vmem:[#allocation11 + $0x380] sm:$0xf]  ;;  %v6804_v35 = vld [vmem:[#allocation11 + $0x36c] sm:$0xf0] }
 0x31a   :  { %v7713_v12 = vpop.f32.mrf.mxu1  ;;  %v2012_v26 = vrot.slane %v2011_v46, 2  ;;  %v5700_v34 = vld [vmem:[#allocation11 + $0x360] sm:$0xf] }
 0x31b   :  { %4008 = vmatpush.bf16.msrb.mxu0 %v5341_v2  ;;  %3804 = vmatpush.bf16.msra.mxu2 %v5269_v14  ;;  %v2027_v39 = vmax.f32 %v2026_v18, %v7702_v9  ;;  %v6808_v14 = vld [vmem:[#allocation11 + $0x38c] sm:$0xf0] }
 0x31c   :  { %v1463_v59 = vpop.f32.mrf.mxu2  ;;  %v1552_v48 = vpop.f32.mrf.mxu3  ;;  %v5717_v3 = vor.u32 %v6808_v14, %v5716_v63 }
 0x31d   :  { %v1879_v25 = vmax.f32 %v7704_v4, %v1463_v59  ;;  %v1900_v33 = vmax.f32 %v7706_v32, %v1552_v48  ;;  %v5621_v4 = vor.u32 %v6784_v42, %v5620_v41  ;;  %v6816_v32 = vld [vmem:[#allocation11 + $0x3cc] sm:$0xf0]  ;;  %3836 = vmatpush.bf16.msrb.mxu3 %v5765_v30  ;;  %v2028_v37 = vmax.f32 %v2027_v39, %v7713_v12  ;;  %v5732_v48 = vld [vmem:[#allocation11 + $0x3a0] sm:$0xf] }
 0x31e   :  { %v5749_v9 = vor.u32 %v6816_v32, %v5748_v44  ;;  %v6780_v59 = vld [vmem:[#allocation11 + $0x2ac] sm:$0xf0]  ;;  %v5588_v12 = vld [vmem:[#allocation11 + $0x280] sm:$0xf] }
 0x31f   :  { %v1644_v6 = vpop.f32.mrf.mxu0  ;;  %3823 = vmatpush.bf16.msrb.mxu2 %v5637_v28  ;;  %4009 = vmatpush.bf16.msrb.mxu0 %v5325_v40  ;;  %v5605_v61 = vor.u32 %v6780_v59, %v5604_v57  ;;  %v5589_v18 = vor.u32 %v6776_v10, %v5588_v12  ;;  %v5572_v28 = vld [vmem:[#allocation11 + $0x260] sm:$0xf]  ;;  %v6772_v30 = vld [vmem:[#allocation11 + $0x26c] sm:$0xf0] }
 0x320   :  { %v7720_v11 = vmax.f32 %v1921_v1, %v1644_v6  ;;  %v2013_v1 = vmax.f32 %v2011_v46, %v2012_v26  ;;  %v7740_v46 = vld [vmem:[%s8003_s6] sm:$0xff]  ;;  %v5573_v40 = vor.u32 %v6772_v30, %v5572_v28  ;;  %v6800_v59 = vld [vmem:[#allocation11 + $0x34c] sm:$0xf0] }
 0x321   :  { %1505 = vmatmul.bf16.gmra.mxu2 %v7598_v29  ;;  %1594 = vmatmul.bf16.gmra.mxu3 %v7598_v29  ;;  %v2197_v39 = vperm.slane %v7740_v46, 1  ;;  %v2198_v42 = vperm.slane %v7740_v46, 2  ;;  %v6792_v28 = vld [vmem:[#allocation11 + $0x30c] sm:$0xf0] }
 0x322   :  { %1683 = vmatmul.bf16.gmra.mxu0 %v7598_v29  ;;  %v1422_v55 = vpop.f32.mrf.mxu1  ;;  %3837 = vmatpush.bf16.msrb.mxu3 %v5749_v9  ;;  %v2014_v21 = vrot.slane %v2013_v1, 1  ;;  %v5556_v9 = vld [vmem:[#allocation11 + $0x240] sm:$0xf] }
 0x323   :  { %v2029_v60 = vmax.f32 %v2028_v37, %v1422_v55  ;;  %3824 = vmatpush.bf16.msrb.mxu2 %v5621_v4  ;;  %4010 = vmatpush.bf16.msrb.mxu0 %v5309_v54  ;;  %v6697_v55 = vld [vmem:[#allocation11 + $0x14] sm:$0xf0]  ;;  %v5701_v4 = vor.u32 %v6804_v35, %v5700_v34  ;;  %v6768_v54 = vld [vmem:[#allocation11 + $0x24c] sm:$0xf0]  ;;  %v2199_v37 = vperm.slane %v7740_v46, 3 }
 0x324   :  { %v1466_v38 = vpop.f32.mrf.mxu2  ;;  %v1555_v43 = vpop.f32.mrf.mxu3  ;;  %v2015_v32 = vmax.f32 %v2013_v1, %v2014_v21  ;;  %v5652_v21 = vld [vmem:[#allocation11 + $0x300] sm:$0xf] }
 0x325   :  { %v7730_v49 = vmax.f32 %v1879_v25, %v1466_v38  ;;  %v7732_v22 = vmax.f32 %v1900_v33, %v1555_v43  ;;  %1737 = vmatmul.bf16.gmra.mxu1 %v7533_v19  ;;  %v6812_v19 = vld [vmem:[#allocation11 + $0x3ac] sm:$0xf0]  ;;  %v5277_v25 = vor.u32 %v6697_v55, %v5276_v8  ;;  %v5524_v55 = vld [vmem:[#allocation11 + $0x200] sm:$0xf] }
 0x326   :  { %v5733_v36 = vor.u32 %v6812_v19, %v5732_v48  ;;  %v5557_v48 = vor.u32 %v6768_v54, %v5556_v9 }
 0x327   :  { %v1646_v52 = vpop.f32.mrf.mxu0  ;;  %3825 = vmatpush.bf16.msrb.mxu2 %v5605_v61  ;;  %4011 = vmatpush.bf16.msrb.mxu0 %v5293_v58  ;;  %v2144_v58 = vrot.slane %v2015_v32, 4 }
 0x328   :  { %v1923_v15 = vmax.f32 %v7720_v11, %v1646_v52  ;;  %3838 = vmatpush.bf16.msrb.mxu3 %v5733_v36  ;;  %v5668_v36 = vld [vmem:[#allocation11 + $0x320] sm:$0xf] }
 0x32a   :  { %v1424_v0 = vpop.f32.mrf.mxu1 }
 0x32b   :  { %v2030_v2 = vmax.f32 %v2029_v60, %v1424_v0  ;;  %3826 = vmatpush.bf16.msrb.mxu2 %v5589_v18  ;;  %4012 = vmatpush.bf16.msrb.mxu0 %v5277_v25  ;;  %v2204_v60 = vrot.slane %v2197_v39, 6  ;;  %v6764_v0 = vld [vmem:[#allocation11 + $0x22c] sm:$0xf0]  ;;  %v5653_v39 = vor.u32 %v6792_v28, %v5652_v21 }
 0x32c   :  { %v1468_v6 = vpop.f32.mrf.mxu2  ;;  %v1557_v7 = vpop.f32.mrf.mxu3  ;;  %3839 = vmatpush.bf16.msrb.mxu3 %v5717_v3  ;;  %v5541_v12 = vor.u32 %v6764_v0, %v5540_v62 }
 0x32d   :  { %v2031_v13 = vrot.slane %v2030_v2, 4  ;;  %v1881_v38 = vmax.f32 %v7730_v49, %v1468_v6  ;;  %v1902_v44 = vmax.f32 %v7732_v22, %v1557_v7  ;;  %v5684_v49 = vld [vmem:[#allocation11 + $0x340] sm:$0xf]  ;;  %v2196_v22 = vperm.slane %v7740_v46, 0  ;;  %v6796_v7 = vld [vmem:[#allocation11 + $0x32c] sm:$0xf0] }
 0x32e   :  { %v5685_v45 = vor.u32 %v6800_v59, %v5684_v49  ;;  %v2206_v6 = vrot.slane %v2199_v37, 2  ;;  %v6760_v46 = vld [vmem:[#allocation11 + $0x20c] sm:$0xf0] }
 0x32f   :  { %v2032_v17 = vmax.f32 %v2030_v2, %v2031_v13  ;;  %v1649_v23 = vpop.f32.mrf.mxu0  ;;  %3827 = vmatpush.bf16.msrb.mxu2 %v5573_v40  ;;  %v2205_v2 = vrot.slane %v2198_v42, 4  ;;  %v5669_v13 = vor.u32 %v6796_v7, %v5668_v36  ;;  %v2210_v14 = vsel %vm322_vm1, %v2196_v22, %v2204_v60 }
 0x330   :  { %v7742_v33 = vmax.f32 %v1923_v15, %v1649_v23  ;;  %3840 = vmatpush.bf16.msrb.mxu3 %v5701_v4  ;;  %v5525_v30 = vor.u32 %v6760_v46, %v5524_v55 }
 0x331   :  { %v2033_v11 = vrot.slane %v2032_v17, 2  ;;  %1510 = vmatmul.bf16.gmra.mxu2 %v7606_v56  ;;  %1599 = vmatmul.bf16.gmra.mxu3 %v7606_v56  ;;  %v2211_v23 = vsel %vm2150_vm4, %v2205_v2, %v2206_v6 }
 0x332   :  { %1688 = vmatmul.bf16.gmra.mxu0 %v7606_v56  ;;  %v7749_v43 = vpop.f32.mrf.mxu1 }
 0x333   :  { %v2034_v41 = vmax.f32 %v2032_v17, %v2033_v11  ;;  %3828 = vmatpush.bf16.msrb.mxu2 %v5557_v48 }
 0x334   :  { %v1471_v51 = vpop.f32.mrf.mxu2  ;;  %v1560_v31 = vpop.f32.mrf.mxu3  ;;  %3841 = vmatpush.bf16.msrb.mxu3 %v5685_v45 }
 0x335   :  { %v2035_v26 = vrot.slane %v2034_v41, 1  ;;  %v1882_v52 = vmax.f32 %v1881_v38, %v1471_v51  ;;  %v1903_v57 = vmax.f32 %v1902_v44, %v1560_v31  ;;  %1742 = vmatmul.bf16.gmra.mxu1 %v7541_v50 }
 0x337   :  { %v2036_v61 = vmax.f32 %v2034_v41, %v2035_v26  ;;  %v7756_v19 = vpop.f32.mrf.mxu0  ;;  %3829 = vmatpush.bf16.msrb.mxu2 %v5541_v12 }
 0x338   :  { %3842 = vmatpush.bf16.msrb.mxu3 %v5669_v13 }
 0x339   :  { %v2145_v1 = vrot.slane %v2036_v61, 2 }
 0x33a   :  { %v1705_v50 = vpop.f32.mrf.mxu1 }
 0x33b   :  { %v2158_v10 = vsel %vm2150_vm4, %v2144_v58, %v2145_v1  ;;  %v1932_v63 = vmax.f32 %v7749_v43, %v1705_v50  ;;  %v2212_v43 = vsel %vm2152_vm5, %v2210_v14, %v2211_v23  ;;  %3830 = vmatpush.bf16.msrb.mxu2 %v5525_v30 }
 0x33c   :  { %v2159_v8 = vsel %vm2152_vm5, %v7663_v20, %v2158_v10  ;;  %v1473_v15 = vpop.f32.mrf.mxu2  ;;  %v1562_v18 = vpop.f32.mrf.mxu3  ;;  %3843 = vmatpush.bf16.msrb.mxu3 %v5653_v39 }
 0x33d   :  { %v2167_v17 = vrot.slane %v2159_v8, 7  ;;  %v1883_v3 = vmax.f32 %v1882_v52, %v1473_v15  ;;  %v1904_v25 = vmax.f32 %v1903_v57, %v1562_v18 }
 0x33f   :  { %v2169_v34 = vsel %vm2168_vm6, %v2167_v17, %v7656_v47  ;;  %v1884_v11 = vrot.slane %v1883_v3, 4  ;;  %v1905_v20 = vrot.slane %v1904_v25, 4  ;;  %v1654_v35 = vpop.f32.mrf.mxu0 }
 0x340   :  { %v2171_v38 = vsel %vm2170_vm7, %v2167_v17, %v2169_v34 }
 0x341   :  { %v2173_v40 = vsel %vm2172_vm8, %v2167_v17, %v2171_v38  ;;  %v1885_v41 = vmax.f32 %v1883_v3, %v1884_v11  ;;  %v1906_v42 = vmax.f32 %v1904_v25, %v1905_v20 }
 0x342   :  { %v2175_v44 = vsel %vm2174_vm9, %v2167_v17, %v2173_v40  ;;  %v1708_v4 = vpop.f32.mrf.mxu1 }
 0x343   :  { %v2218_v32 = vadd.f32 %v2212_v43, %v2175_v44  ;;  %v1886_v51 = vrot.slane %v1885_v41, 2  ;;  %v1907_v47 = vrot.slane %v1906_v42, 2  ;;  %v1933_v31 = vmax.f32 %v1932_v63, %v1708_v4 }
 0x344   :  { %v1476_v9 = vpop.f32.mrf.mxu2  ;;  %v1565_v54 = vpop.f32.mrf.mxu3 }
 0x345   :  { %v2220_v49 = vmax.f32 %v2218_v32, 0.0  ;;  %v1887_v26 = vmax.f32 %v1885_v41, %v1886_v51  ;;  %v1908_v37 = vmax.f32 %v1906_v42, %v1907_v47  ;;  %1747 = vmatmul.bf16.gmra.mxu1 %v7549_v5 }
 0x347   :  { %2224 = vst [vmem:[#allocation1] ss:$4 sm:$0xff] %v2220_v49  ;;  %v1888_v52 = vrot.slane %v1887_v26, 1  ;;  %v1909_v57 = vrot.slane %v1908_v37, 1  ;;  %v1656_v59 = vpop.f32.mrf.mxu0 }
 0x348   :  { %v2079_v58 = vmax.f32 %v1654_v35, %v1656_v59 }
 0x349   :  { %v1910_v48 = vmax.f32 %v1908_v37, %v1909_v57  ;;  %v1889_v60 = vmax.f32 %v1887_v26, %v1888_v52 }
 0x34a   :  { %v1710_v22 = vpop.f32.mrf.mxu1 }
 0x34b   :  { %v2140_v61 = vrot.slane %v1910_v48, 6  ;;  %v1934_v45 = vmax.f32 %v1933_v31, %v1710_v22  ;;  %v5516_v48 = vld [vmem:[#allocation11 + $0x1e8] sm:$0xf]  ;;  %v6757_v22 = vld [vmem:[#allocation11 + $0x1f4] sm:$0xf0] }
 0x34c   :  { %v1478_v62 = vpop.f32.mrf.mxu2  ;;  %v1567_v0 = vpop.f32.mrf.mxu3 }
 0x34d   :  { %v7772_v36 = vsel %vm322_vm1, %v1889_v60, %v2140_v61  ;;  %v2037_v10 = vmax.f32 %v1476_v9, %v1478_v62  ;;  %v2058_v63 = vmax.f32 %v1565_v54, %v1567_v0  ;;  %v5500_v0 = vld [vmem:[#allocation11 + $0x1c8] sm:$0xf] }
 0x34e   :  { %v2227_v1 = vld.sshfl [vmem:[#allocation1] sm:$0xff pattern:$0x73625140]  ;;  %v2228_v2 = vld.sshfl [vmem:[#allocation1 + $0x8] sm:$0xff pattern:$0x73625140] }
 0x34f   :  { %v1659_v6 = vpop.f32.mrf.mxu0  ;;  %v7774_v7 = vpack.c.bf16 %v2227_v1, %v2227_v1  ;;  %v7776_v5 = vpack.c.bf16 %v2228_v2, %v2228_v2  ;;  %v2229_v3 = vld.sshfl [vmem:[#allocation1 + $0x10] sm:$0xff pattern:$0x73625140]  ;;  %v2230_v25 = vld.sshfl [vmem:[#allocation1 + $0x18] sm:$0xff pattern:$0x73625140] }
 0x350   :  { %v2080_v50 = vmax.f32 %v2079_v58, %v1659_v6  ;;  %v7782_v34 = vpack.c.bf16 %v2229_v3, %v2229_v3  ;;  %v7784_v11 = vpack.c.bf16 %v2230_v25, %v2230_v25  ;;  %v6753_v58 = vld [vmem:[#allocation11 + $0x1d4] sm:$0xf0]  ;;  %v5452_v25 = vld [vmem:[#allocation11 + $0x168] sm:$0xf] }
 0x351   :  { %3805 = vmatmul.bf16.vlgmr.msra.gmra.mxu2 %v7774_v7  ;;  %3818 = vmatmul.bf16.vlgmr.msra.gmra.mxu3 %v7776_v5  ;;  %v5501_v1 = vor.u32 %v6753_v58, %v5500_v0  ;;  %v1925_v58 = vmax.f32 %v7742_v33, %v7756_v19 }
 0x352   :  { %4013 = vmatmul.bf16.vlgmr.msrb.gmra.mxu0 %v7774_v7  ;;  %v1713_v12 = vpop.f32.mrf.mxu1 }
 0x353   :  { %v1935_v13 = vmax.f32 %v1934_v45, %v1713_v12 }
 0x354   :  { %v1481_v14 = vpop.f32.mrf.mxu2  ;;  %v1570_v8 = vpop.f32.mrf.mxu3 }
 0x355   :  { %v2038_v15 = vmax.f32 %v2037_v10, %v1481_v14  ;;  %v2059_v18 = vmax.f32 %v2058_v63, %v1570_v8  ;;  %1752 = vmatmul.bf16.gmra.mxu1 %v7557_v27  ;;  %v5484_v10 = vld [vmem:[#allocation11 + $0x1a8] sm:$0xf]  ;;  %v6749_v63 = vld [vmem:[#allocation11 + $0x1b4] sm:$0xf0] }
 0x357   :  { %v1661_v55 = vpop.f32.mrf.mxu0 }
 0x358   :  { %v2081_v28 = vmax.f32 %v2080_v50, %v1661_v55 }
 0x35a   :  { %v1715_v46 = vpop.f32.mrf.mxu1 }
 0x35b   :  { %v1936_v21 = vmax.f32 %v1935_v13, %v1715_v46  ;;  %v5485_v13 = vor.u32 %v6749_v63, %v5484_v10 }
 0x35c   :  { %v1483_v17 = vpop.f32.mrf.mxu2  ;;  %v1572_v23 = vpop.f32.mrf.mxu3 }
 0x35d   :  { %v2039_v27 = vmax.f32 %v2038_v15, %v1483_v17  ;;  %v2060_v39 = vmax.f32 %v2059_v18, %v1572_v23  ;;  %v5468_v15 = vld [vmem:[#allocation11 + $0x188] sm:$0xf] }
 0x35f   :  { %v1664_v30 = vpop.f32.mrf.mxu0 }
 0x360   :  { %v2082_v20 = vmax.f32 %v2081_v28, %v1664_v30  ;;  %v6741_v28 = vld [vmem:[#allocation11 + $0x174] sm:$0xf0] }
 0x361   :  { %3831 = vmatmul.bf16.vlgmr.msrb.gmra.mxu2 %v7782_v34  ;;  %3844 = vmatmul.bf16.vlgmr.msrb.gmra.mxu3 %v7784_v11 }
 0x362   :  { %v1718_v35 = vpop.f32.mrf.mxu1 }
 0x363   :  { %v1937_v38 = vmax.f32 %v1936_v21, %v1718_v35  ;;  %v5453_v35 = vor.u32 %v6741_v28, %v5452_v25 }
 0x364   :  { %v1486_v43 = vpop.f32.mrf.mxu2  ;;  %v1575_v40 = vpop.f32.mrf.mxu3 }
 0x365   :  { %v2040_v41 = vmax.f32 %v2039_v27, %v1486_v43  ;;  %v2061_v42 = vmax.f32 %v2060_v39, %v1575_v40  ;;  %1757 = vmatmul.bf16.gmra.mxu1 %v7565_v53  ;;  %v5517_v53 = vor.u32 %v6757_v22, %v5516_v48  ;;  %v6737_v43 = vld [vmem:[#allocation11 + $0x154] sm:$0xf0] }
 0x367   :  { %v1666_v44 = vpop.f32.mrf.mxu0  ;;  %4018 = vmatpush.bf16.msrb.mxu1 %v5517_v53 }
 0x368   :  { %v2083_v31 = vmax.f32 %v2082_v20, %v1666_v44 }
 0x36a   :  { %v1720_v4 = vpop.f32.mrf.mxu1 }
 0x36b   :  { %v1938_v32 = vmax.f32 %v1937_v38, %v1720_v4  ;;  %4019 = vmatpush.bf16.msrb.mxu1 %v5501_v1  ;;  %v5436_v38 = vld [vmem:[#allocation11 + $0x148] sm:$0xf] }
 0x36c   :  { %v1488_v51 = vpop.f32.mrf.mxu2  ;;  %v1577_v47 = vpop.f32.mrf.mxu3  ;;  %v5437_v40 = vor.u32 %v6737_v43, %v5436_v38  ;;  %v5420_v4 = vld [vmem:[#allocation11 + $0x128] sm:$0xf] }
 0x36d   :  { %v2041_v26 = vmax.f32 %v2040_v41, %v1488_v51  ;;  %v2062_v37 = vmax.f32 %v2061_v42, %v1577_v47 }
 0x36f   :  { %v1669_v9 = vpop.f32.mrf.mxu0  ;;  %4020 = vmatpush.bf16.msrb.mxu1 %v5485_v13 }
 0x370   :  { %v2084_v54 = vmax.f32 %v2083_v31, %v1669_v9  ;;  %v5404_v9 = vld [vmem:[#allocation11 + $0x108] sm:$0xf] }
 0x372   :  { %v1723_v49 = vpop.f32.mrf.mxu1 }
 0x373   :  { %v1939_v52 = vmax.f32 %v1938_v32, %v1723_v49  ;;  %v6733_v32 = vld [vmem:[#allocation11 + $0x134] sm:$0xf0] }
 0x374   :  { %v1491_v57 = vpop.f32.mrf.mxu2  ;;  %v1580_v59 = vpop.f32.mrf.mxu3  ;;  %v5421_v51 = vor.u32 %v6733_v32, %v5420_v4 }
 0x375   :  { %v2042_v60 = vmax.f32 %v2041_v26, %v1491_v57  ;;  %v2063_v61 = vmax.f32 %v2062_v37, %v1580_v59  ;;  %1762 = vmatmul.bf16.gmra.mxu1 %v7573_v24  ;;  %v6745_v24 = vld [vmem:[#allocation11 + $0x194] sm:$0xf0] }
 0x376   :  { %v5469_v18 = vor.u32 %v6745_v24, %v5468_v15 }
 0x377   :  { %v1671_v45 = vpop.f32.mrf.mxu0 }
 0x378   :  { %v2085_v62 = vmax.f32 %v2084_v54, %v1671_v45  ;;  %4021 = vmatpush.bf16.msrb.mxu1 %v5469_v18  ;;  %v6729_v54 = vld [vmem:[#allocation11 + $0x114] sm:$0xf0] }
 0x379   :  { %v5405_v49 = vor.u32 %v6729_v54, %v5404_v9 }
 0x37a   :  { %v1725_v2 = vpop.f32.mrf.mxu1 }
 0x37b   :  { %v1940_v6 = vmax.f32 %v1939_v52, %v1725_v2 }
 0x37c   :  { %v1493_v50 = vpop.f32.mrf.mxu2  ;;  %v1582_v12 = vpop.f32.mrf.mxu3  ;;  %4022 = vmatpush.bf16.msrb.mxu1 %v5453_v35 }
 0x37d   :  { %v2043_v46 = vmax.f32 %v2042_v60, %v1493_v50  ;;  %v2064_v21 = vmax.f32 %v2063_v61, %v1582_v12 }
 0x37f   :  { %v1674_v14 = vpop.f32.mrf.mxu0 }
 0x380   :  { %v2086_v8 = vmax.f32 %v2085_v62, %v1674_v14  ;;  %4023 = vmatpush.bf16.msrb.mxu1 %v5437_v40 }
 0x382   :  { %v1728_v55 = vpop.f32.mrf.mxu1 }
 0x383   :  { %v1941_v17 = vmax.f32 %v1940_v6, %v1728_v55  ;;  %v1926_v6 = vrot.slane %v1925_v58, 4 }
 0x384   :  { %v1496_v23 = vpop.f32.mrf.mxu2  ;;  %v1585_v3 = vpop.f32.mrf.mxu3  ;;  %4024 = vmatpush.bf16.msrb.mxu1 %v5421_v51 }
 0x385   :  { %v2044_v30 = vmax.f32 %v2043_v46, %v1496_v23  ;;  %v2065_v20 = vmax.f32 %v2064_v21, %v1585_v3  ;;  %1767 = vmatmul.bf16.gmra.mxu1 %v7587_v16  ;;  %v1927_v15 = vmax.f32 %v1925_v58, %v1926_v6 }
 0x387   :  { %v1676_v27 = vpop.f32.mrf.mxu0  ;;  %v1928_v46 = vrot.slane %v1927_v15, 2 }
 0x388   :  { %v2087_v39 = vmax.f32 %v2086_v8, %v1676_v27  ;;  %4025 = vmatpush.bf16.msrb.mxu1 %v5405_v49 }
 0x389   :  { %v1929_v23 = vmax.f32 %v1927_v15, %v1928_v46 }
 0x38a   :  { %v1730_v41 = vpop.f32.mrf.mxu1 }
 0x38b   :  { %v1942_v16 = vmax.f32 %v1941_v17, %v1730_v41 }
 0x38c   :  { %v1498_v42 = vpop.f32.mrf.mxu2  ;;  %v1587_v44 = vpop.f32.mrf.mxu3 }
 0x38d   :  { %v2045_v37 = vmax.f32 %v2044_v30, %v1498_v42  ;;  %v2066_v52 = vmax.f32 %v2065_v20, %v1587_v44  ;;  %v1930_v20 = vrot.slane %v1929_v23, 1 }
 0x38f   :  { %v1679_v47 = vpop.f32.mrf.mxu0  ;;  %v1931_v41 = vmax.f32 %v1929_v23, %v1930_v20 }
 0x390   :  { %v2088_v31 = vmax.f32 %v2087_v39, %v1679_v47 }
 0x392   :  { %v1733_v26 = vpop.f32.mrf.mxu1 }
 0x393   :  { %v1943_v57 = vmax.f32 %v1942_v16, %v1733_v26 }
 0x394   :  { %v1501_v59 = vpop.f32.mrf.mxu2  ;;  %v1590_v48 = vpop.f32.mrf.mxu3 }
 0x395   :  { %v2046_v22 = vmax.f32 %v2045_v37, %v1501_v59  ;;  %v2067_v60 = vmax.f32 %v2066_v52, %v1590_v48  ;;  %1772 = vmatmul.bf16.gmra.mxu1 %v7598_v29 }
 0x397   :  { %v1681_v61 = vpop.f32.mrf.mxu0 }
 0x398   :  { %v2089_v53 = vmax.f32 %v2088_v31, %v1681_v61  ;;  %v2141_v31 = vrot.slane %v1931_v41, 4 }
 0x39a   :  { %v1735_v45 = vpop.f32.mrf.mxu1 }
 0x39b   :  { %v1944_v50 = vmax.f32 %v1943_v57, %v1735_v45 }
 0x39c   :  { %v1503_v62 = vpop.f32.mrf.mxu2  ;;  %v1592_v0 = vpop.f32.mrf.mxu3 }
 0x39d   :  { %v2047_v10 = vmax.f32 %v2046_v22, %v1503_v62  ;;  %v2068_v63 = vmax.f32 %v2067_v60, %v1592_v0 }
 0x39f   :  { %v1684_v1 = vpop.f32.mrf.mxu0 }
 0x3a0   :  { %v2090_v2 = vmax.f32 %v2089_v53, %v1684_v1 }
 0x3a2   :  { %v1738_v12 = vpop.f32.mrf.mxu1 }
 0x3a3   :  { %v1945_v13 = vmax.f32 %v1944_v50, %v1738_v12 }
 0x3a4   :  { %v1506_v14 = vpop.f32.mrf.mxu2  ;;  %v1595_v8 = vpop.f32.mrf.mxu3 }
 0x3a5   :  { %v2048_v29 = vmax.f32 %v2047_v10, %v1506_v14  ;;  %v2069_v24 = vmax.f32 %v2068_v63, %v1595_v8  ;;  %1777 = vmatmul.bf16.gmra.mxu1 %v7606_v56  ;;  %v7811_v14 = vld [vmem:[%s8005_s8] sm:$0xf] }
 0x3a6   :  { %v2509_v15 = vperm.slane %v7811_v14, 0 }
 0x3a7   :  { %v1686_v18 = vpop.f32.mrf.mxu0 }
 0x3a8   :  { %v2091_v55 = vmax.f32 %v2090_v2, %v1686_v18 }
 0x3aa   :  { %v1740_v21 = vpop.f32.mrf.mxu1 }
 0x3ab   :  { %v1946_v33 = vmax.f32 %v1945_v13, %v1740_v21 }
 0x3ac   :  { %v1508_v19 = vpop.f32.mrf.mxu2  ;;  %v1597_v17 = vpop.f32.mrf.mxu3 }
 0x3ad   :  { %v1947_v3 = vrot.slane %v1946_v33, 4  ;;  %v2049_v38 = vmax.f32 %v2048_v29, %v1508_v19  ;;  %v2070_v43 = vmax.f32 %v2069_v24, %v1597_v17 }
 0x3af   :  { %v1948_v25 = vmax.f32 %v1946_v33, %v1947_v3  ;;  %v1689_v28 = vpop.f32.mrf.mxu0 }
 0x3b0   :  { %v2092_v30 = vmax.f32 %v2091_v55, %v1689_v28 }
 0x3b1   :  { %v1949_v35 = vrot.slane %v1948_v25, 2 }
 0x3b2   :  { %v1743_v27 = vpop.f32.mrf.mxu1 }
 0x3b3   :  { %v1950_v39 = vmax.f32 %v1948_v25, %v1949_v35 }
 0x3b4   :  { %v1511_v40 = vpop.f32.mrf.mxu2  ;;  %v1600_v56 = vpop.f32.mrf.mxu3 }
 0x3b5   :  { %v1951_v42 = vrot.slane %v1950_v39, 1  ;;  %v2050_v44 = vmax.f32 %v2049_v38, %v1511_v40  ;;  %v2071_v4 = vmax.f32 %v2070_v43, %v1600_v56  ;;  %4026 = vmatmul.bf16.vlgmr.msrb.gmra.mxu1 %v7776_v5  ;;  %v5892_v43 = vld [vmem:[#allocation11 + $0x4e0] sm:$0xf]  ;;  %v6852_v40 = vld [vmem:[#allocation11 + $0x4ec] sm:$0xf0] }
 0x3b6   :  { %v6020_v56 = vld [vmem:[#allocation11 + $0x5e0] sm:$0xf]  ;;  %v5893_v41 = vor.u32 %v6852_v40, %v5892_v43 }
 0x3b7   :  { %v1952_v32 = vmax.f32 %v1950_v39, %v1951_v42  ;;  %v1691_v51 = vpop.f32.mrf.mxu0  ;;  %v6884_v42 = vld [vmem:[#allocation11 + $0x5ec] sm:$0xf0]  ;;  %v5828_v43 = vld [vmem:[#allocation11 + $0x460] sm:$0xf] }
 0x3b8   :  { %v7796_v47 = vmax.f32 %v2092_v30, %v1691_v51  ;;  %3849 = vmatpush.bf16.msra.mxu2 %v5893_v41  ;;  %v5956_v41 = vld [vmem:[#allocation11 + $0x560] sm:$0xf] }
 0x3b9   :  { %v2142_v9 = vrot.slane %v1952_v32, 2  ;;  %v6021_v32 = vor.u32 %v6884_v42, %v6020_v56  ;;  %v6836_v56 = vld [vmem:[#allocation11 + $0x46c] sm:$0xf0] }
 0x3ba   :  { %v1745_v54 = vpop.f32.mrf.mxu1  ;;  %v6868_v42 = vld [vmem:[#allocation11 + $0x56c] sm:$0xf0] }
 0x3bb   :  { %v2155_v16 = vsel %vm2150_vm4, %v2141_v31, %v2142_v9  ;;  %v2100_v22 = vmax.f32 %v1743_v27, %v1745_v54  ;;  %v6028_v31 = vld [vmem:[#allocation11 + $0x5e8] sm:$0xf]  ;;  %v6885_v9 = vld [vmem:[#allocation11 + $0x5f4] sm:$0xf0]  ;;  %3862 = vmatpush.bf16.msra.mxu3 %v6021_v32 }
 0x3bc   :  { %v7801_v49 = vsel %vm2152_vm5, %v7772_v36, %v2155_v16  ;;  %v1513_v26 = vpop.f32.mrf.mxu2  ;;  %v1602_v37 = vpop.f32.mrf.mxu3  ;;  %v6029_v54 = vor.u32 %v6885_v9, %v6028_v31  ;;  %v5876_v16 = vld [vmem:[#allocation11 + $0x4c0] sm:$0xf]  ;;  %v5836_v32 = vld [vmem:[#allocation11 + $0x468] sm:$0xf] }
 0x3bd   :  { %v2051_v52 = vmax.f32 %v2050_v44, %v1513_v26  ;;  %v2072_v57 = vmax.f32 %v2071_v4, %v1602_v37  ;;  %v5900_v44 = vld [vmem:[#allocation11 + $0x4e8] sm:$0xf]  ;;  %v6853_v4 = vld [vmem:[#allocation11 + $0x4f4] sm:$0xf0]  ;;  %v6848_v26 = vld [vmem:[#allocation11 + $0x4cc] sm:$0xf0] }
 0x3be   :  { %v5901_v51 = vor.u32 %v6853_v4, %v5900_v44  ;;  %4070 = vmatpush.bf16.msra.mxu1 %v6029_v54  ;;  %v6004_v37 = vld [vmem:[#allocation11 + $0x5c0] sm:$0xf]  ;;  %v5829_v44 = vor.u32 %v6836_v56, %v5828_v43  ;;  %v5957_v4 = vor.u32 %v6868_v42, %v5956_v41  ;;  %v5964_v31 = vld [vmem:[#allocation11 + $0x568] sm:$0xf]  ;;  %v6869_v54 = vld [vmem:[#allocation11 + $0x574] sm:$0xf0] }
 0x3bf   :  { %v2052_v59 = vrot.slane %v2051_v52, 4  ;;  %v2073_v48 = vrot.slane %v2072_v57, 4  ;;  %v6948_v56 = vld [vmem:[#allocation11 + $0x7ec] sm:$0xf0]  ;;  %v5788_v41 = vld [vmem:[#allocation11 + $0x408] sm:$0xf] }
 0x3c0   :  { %4057 = vmatpush.bf16.msra.mxu0 %v5901_v51  ;;  %v6837_v51 = vld [vmem:[#allocation11 + $0x474] sm:$0xf0] }
 0x3c1   :  { %v2053_v60 = vmax.f32 %v2051_v52, %v2052_v59  ;;  %v2074_v61 = vmax.f32 %v2072_v57, %v2073_v48  ;;  %v5877_v57 = vor.u32 %v6848_v26, %v5876_v16  ;;  %v6880_v59 = vld [vmem:[#allocation11 + $0x5cc] sm:$0xf0]  ;;  %v5884_v48 = vld [vmem:[#allocation11 + $0x4c8] sm:$0xf]  ;;  %v5837_v9 = vor.u32 %v6837_v51, %v5836_v32  ;;  %v5812_v26 = vld [vmem:[#allocation11 + $0x440] sm:$0xf] }
 0x3c2   :  { %v1748_v53 = vpop.f32.mrf.mxu1  ;;  %v5965_v16 = vor.u32 %v6869_v54, %v5964_v31  ;;  %v6857_v32 = vld [vmem:[#allocation11 + $0x514] sm:$0xf0]  ;;  %v5390_v54 = vld [vmem:[#allocation11 + $0xf8] sm:$0xf0] }
 0x3c3   :  { %v2054_v45 = vrot.slane %v2053_v60, 2  ;;  %v2075_v62 = vrot.slane %v2074_v61, 2  ;;  %v2101_v0 = vmax.f32 %v2100_v22, %v1748_v53  ;;  %v6849_v22 = vld [vmem:[#allocation11 + $0x4d4] sm:$0xf0]  ;;  %v6012_v53 = vld [vmem:[#allocation11 + $0x5c8] sm:$0xf]  ;;  %3850 = vmatpush.bf16.msra.mxu2 %v5877_v57 }
 0x3c4   :  { %v5940_v57 = vld [vmem:[#allocation11 + $0x540] sm:$0xf] }
 0x3c5   :  { %v2055_v58 = vmax.f32 %v2053_v60, %v2054_v45  ;;  %v2076_v1 = vmax.f32 %v2074_v61, %v2075_v62  ;;  %v6005_v60 = vor.u32 %v6880_v59, %v6004_v37  ;;  %v5885_v61 = vor.u32 %v6849_v22, %v5884_v48  ;;  %v6881_v45 = vld [vmem:[#allocation11 + $0x5d4] sm:$0xf0]  ;;  %v5860_v62 = vld [vmem:[#allocation11 + $0x4a0] sm:$0xf]  ;;  %v6832_v37 = vld [vmem:[#allocation11 + $0x44c] sm:$0xf0] }
 0x3c6   :  { %v5813_v48 = vor.u32 %v6832_v37, %v5812_v26  ;;  %v6864_v22 = vld [vmem:[#allocation11 + $0x54c] sm:$0xf0]  ;;  %v5518_v37 = vld [vmem:[#allocation11 + $0x1f8] sm:$0xf0] }
 0x3c7   :  { %v2056_v2 = vrot.slane %v2055_v58, 1  ;;  %v2077_v6 = vrot.slane %v2076_v1, 1  ;;  %3863 = vmatpush.bf16.msra.mxu3 %v6005_v60  ;;  %4058 = vmatpush.bf16.msra.mxu0 %v5885_v61  ;;  %v5820_v60 = vld [vmem:[#allocation11 + $0x448] sm:$0xf]  ;;  %v6833_v61 = vld [vmem:[#allocation11 + $0x454] sm:$0xf0] }
 0x3c9   :  { %v2078_v50 = vmax.f32 %v2076_v1, %v2077_v6  ;;  %v2057_v12 = vmax.f32 %v2055_v58, %v2056_v2  ;;  %v6844_v58 = vld [vmem:[#allocation11 + $0x4ac] sm:$0xf0]  ;;  %v5988_v1 = vld [vmem:[#allocation11 + $0x5a0] sm:$0xf] }
 0x3ca   :  { %v1750_v36 = vpop.f32.mrf.mxu1  ;;  %v6876_v2 = vld [vmem:[#allocation11 + $0x5ac] sm:$0xf0]  ;;  %v5861_v6 = vor.u32 %v6844_v58, %v5860_v62  ;;  %v5948_v62 = vld [vmem:[#allocation11 + $0x548] sm:$0xf] }
 0x3cb   :  { %v2146_v10 = vrot.slane %v2078_v50, 6  ;;  %v2102_v8 = vmax.f32 %v2101_v0, %v1750_v36  ;;  %v6013_v0 = vor.u32 %v6881_v45, %v6012_v53  ;;  %v5989_v50 = vor.u32 %v6876_v2, %v5988_v1  ;;  %v5868_v36 = vld [vmem:[#allocation11 + $0x4a8] sm:$0xf]  ;;  %v5796_v1 = vld [vmem:[#allocation11 + $0x420] sm:$0xf] }
 0x3cc   :  { %3851 = vmatpush.bf16.msra.mxu2 %v5861_v6  ;;  %v5941_v53 = vor.u32 %v6864_v22, %v5940_v57  ;;  %v5821_v45 = vor.u32 %v6833_v61, %v5820_v60  ;;  %v6828_v2 = vld [vmem:[#allocation11 + $0x42c] sm:$0xf0]  ;;  %v5924_v6 = vld [vmem:[#allocation11 + $0x520] sm:$0xf] }
 0x3cd   :  { %v7804_v63 = vsel %vm322_vm1, %v2057_v12, %v2146_v10  ;;  %v6845_v12 = vld [vmem:[#allocation11 + $0x4b4] sm:$0xf0]  ;;  %v5996_v10 = vld [vmem:[#allocation11 + $0x5a8] sm:$0xf]  ;;  %4071 = vmatpush.bf16.msra.mxu1 %v6013_v0  ;;  %3864 = vmatpush.bf16.msra.mxu3 %v5989_v50  ;;  %v5797_v50 = vor.u32 %v6828_v2, %v5796_v1  ;;  %v6132_v57 = vld [vmem:[#allocation11 + $0x6c0] sm:$0xf] }
 0x3ce   :  { %v6865_v0 = vld [vmem:[#allocation11 + $0x554] sm:$0xf0]  ;;  %v6751_v1 = vld [vmem:[#allocation11 + $0x1cc] sm:$0xf]  ;;  %v5502_v2 = vld [vmem:[#allocation11 + $0x1d8] sm:$0xf0] }
 0x3cf   :  { %v7806_v13 = vpop.f32.mrf.mxu0  ;;  %v5949_v58 = vor.u32 %v6865_v0, %v5948_v62  ;;  %v6719_v62 = vld [vmem:[#allocation11 + $0xcc] sm:$0xf] }
 0x3d2   :  { %v1753_v29 = vpop.f32.mrf.mxu1 }
 0x3d3   :  { %v7814_v24 = vmax.f32 %v2102_v8, %v1753_v29  ;;  %v5869_v8 = vor.u32 %v6845_v12, %v5868_v36  ;;  %v6860_v36 = vld [vmem:[#allocation11 + $0x52c] sm:$0xf0]  ;;  %v5804_v12 = vld [vmem:[#allocation11 + $0x428] sm:$0xf] }
 0x3d4   :  { %v3806_v18 = vpop.f32.mrf.mxu2  ;;  %v3819_v55 = vpop.f32.mrf.mxu3 }
 0x3d5   :  { %v3807_v46 = vadd.f32 %v3806_v18, %v2509_v15  ;;  %v6877_v15 = vld [vmem:[#allocation11 + $0x5b4] sm:$0xf0]  ;;  %4059 = vmatpush.bf16.msra.mxu0 %v5869_v8  ;;  %v5844_v18 = vld [vmem:[#allocation11 + $0x480] sm:$0xf]  ;;  %v5925_v8 = vor.u32 %v6860_v36, %v5924_v6  ;;  %v5505_v36 = vor.u32 %v6751_v1, %v5502_v2  ;;  %v6896_v1 = vld [vmem:[#allocation11 + $0x64c] sm:$0xf0] }
 0x3d6   :  { %v5997_v29 = vor.u32 %v6877_v15, %v5996_v10  ;;  %v6829_v10 = vld [vmem:[#allocation11 + $0x434] sm:$0xf0] }
 0x3d7   :  { %v3820_v21 = vadd.f32 %v3819_v55, %v3807_v46  ;;  %v4016_v33 = vpop.f32.mrf.mxu0  ;;  %v6840_v55 = vld [vmem:[#allocation11 + $0x48c] sm:$0xf0]  ;;  %v5972_v46 = vld [vmem:[#allocation11 + $0x580] sm:$0xf]  ;;  %v5805_v15 = vor.u32 %v6829_v10, %v5804_v12 }
 0x3d8   :  { %4072 = vmatpush.bf16.msra.mxu1 %v5997_v29  ;;  %v5845_v33 = vor.u32 %v6840_v55, %v5844_v18  ;;  %v5932_v29 = vld [vmem:[#allocation11 + $0x528] sm:$0xf]  ;;  %v6861_v18 = vld [vmem:[#allocation11 + $0x534] sm:$0xf0]  ;;  %v6244_v10 = vld [vmem:[#allocation11 + $0x7a0] sm:$0xf] }
 0x3d9   :  { %v5933_v55 = vor.u32 %v6861_v18, %v5932_v29  ;;  %v6940_v29 = vld [vmem:[#allocation11 + $0x7ac] sm:$0xf0]  ;;  %v6715_v18 = vld [vmem:[#allocation11 + $0xac] sm:$0xf] }
 0x3da   :  { %v7816_v19 = vpop.f32.mrf.mxu1  ;;  %3852 = vmatpush.bf16.msra.mxu2 %v5845_v33  ;;  %v6824_v33 = vld [vmem:[#allocation11 + $0x40c] sm:$0xf0] }
 0x3db   :  { %v2104_v22 = vmax.f32 %v7814_v24, %v7816_v19  ;;  %v6116_v24 = vld [vmem:[#allocation11 + $0x6a0] sm:$0xf]  ;;  %v6908_v19 = vld [vmem:[#allocation11 + $0x6ac] sm:$0xf0] }
 0x3dc   :  { %v3808_v17 = vpop.f32.mrf.mxu2  ;;  %v3821_v23 = vpop.f32.mrf.mxu3 }
 0x3dd   :  { %v6872_v17 = vld [vmem:[#allocation11 + $0x58c] sm:$0xf0]  ;;  %v5852_v23 = vld [vmem:[#allocation11 + $0x488] sm:$0xf] }
 0x3de   :  { %3853 = vmatpush.bf16.msra.mxu2 %v5829_v44  ;;  %v6825_v44 = vld [vmem:[#allocation11 + $0x414] sm:$0xf0] }
 0x3df   :  { %v5789_v51 = vor.u32 %v6825_v44, %v5788_v41  ;;  %v6711_v41 = vld [vmem:[#allocation11 + $0x8c] sm:$0xf]  ;;  %v5342_v44 = vld [vmem:[#allocation11 + $0x98] sm:$0xf0] }
 0x3e2   :  { %v7818_v3 = vpop.f32.mrf.mxu1  ;;  %3854 = vmatpush.bf16.msra.mxu2 %v5813_v48  ;;  %v6912_v48 = vld [vmem:[#allocation11 + $0x6cc] sm:$0xf0] }
 0x3e3   :  { %v6133_v61 = vor.u32 %v6912_v48, %v6132_v57  ;;  %v2105_v6 = vmax.f32 %v2104_v22, %v7818_v3  ;;  %v6747_v3 = vld [vmem:[#allocation11 + $0x1ac] sm:$0xf]  ;;  %v6932_v48 = vld [vmem:[#allocation11 + $0x76c] sm:$0xf0] }
 0x3e4   :  { %v3832_v25 = vpop.f32.mrf.mxu2  ;;  %v3845_v28 = vpop.f32.mrf.mxu3  ;;  %v6707_v22 = vld [vmem:[#allocation11 + $0x6c] sm:$0xf] }
 0x3e5   :  { %v3833_v30 = vadd.f32 %v3832_v25, %v3820_v21  ;;  %v6841_v25 = vld [vmem:[#allocation11 + $0x494] sm:$0xf0] }
 0x3e6   :  { %3855 = vmatpush.bf16.msra.mxu2 %v5797_v50 }
 0x3e7   :  { %v7820_v20 = vadd.f32 %v3845_v28, %v3833_v30  ;;  %v5973_v28 = vor.u32 %v6872_v17, %v5972_v46  ;;  %v5853_v30 = vor.u32 %v6841_v25, %v5852_v23  ;;  %v5780_v46 = vld [vmem:[#allocation11 + $0x400] sm:$0xf] }
 0x3e8   :  { %v5908_v17 = vld [vmem:[#allocation11 + $0x500] sm:$0xf]  ;;  %v5781_v25 = vor.u32 %v6824_v33, %v5780_v46  ;;  %v6245_v46 = vor.u32 %v6940_v29, %v6244_v10 }
 0x3e9   :  { %3865 = vmatpush.bf16.msra.mxu3 %v5973_v28  ;;  %4060 = vmatpush.bf16.msra.mxu0 %v5853_v30  ;;  %v6856_v28 = vld [vmem:[#allocation11 + $0x50c] sm:$0xf0]  ;;  %v6148_v30 = vld [vmem:[#allocation11 + $0x6e0] sm:$0xf] }
 0x3ea   :  { %v7822_v35 = vpop.f32.mrf.mxu1  ;;  %3856 = vmatpush.bf16.msra.mxu2 %v5781_v25  ;;  %v2094_v25 = vrot.slane %v7796_v47, 4  ;;  %v6052_v29 = vld [vmem:[#allocation11 + $0x620] sm:$0xf] }
 0x3ec   :  { %v3834_v27 = vpop.f32.mrf.mxu2  ;;  %v3847_v39 = vpop.f32.mrf.mxu3 }
 0x3ed   :  { %v5980_v27 = vld [vmem:[#allocation11 + $0x588] sm:$0xf]  ;;  %v6873_v39 = vld [vmem:[#allocation11 + $0x594] sm:$0xf0]  ;;  %3866 = vmatpush.bf16.msra.mxu3 %v5957_v4  ;;  %4061 = vmatpush.bf16.msra.mxu0 %v5837_v9  ;;  %v6723_v9 = vld [vmem:[#allocation11 + $0xec] sm:$0xf] }
 0x3ee   :  { %v5981_v40 = vor.u32 %v6873_v39, %v5980_v27  ;;  %v6916_v27 = vld [vmem:[#allocation11 + $0x6ec] sm:$0xf0]  ;;  %v5909_v39 = vor.u32 %v6856_v28, %v5908_v17  ;;  %v5916_v4 = vld [vmem:[#allocation11 + $0x508] sm:$0xf]  ;;  %v5393_v26 = vor.u32 %v6723_v9, %v5390_v54  ;;  %v5486_v17 = vld [vmem:[#allocation11 + $0x1b8] sm:$0xf0] }
 0x3ef   :  { %v6149_v43 = vor.u32 %v6916_v27, %v6148_v30  ;;  %v5917_v31 = vor.u32 %v6857_v32, %v5916_v4  ;;  %v5489_v30 = vor.u32 %v6747_v3, %v5486_v17  ;;  %v6100_v27 = vld [vmem:[#allocation11 + $0x680] sm:$0xf]  ;;  %v6743_v4 = vld [vmem:[#allocation11 + $0x18c] sm:$0xf]  ;;  %v7844_v32 = vmax.f32 %v7796_v47, %v2094_v25 }
 0x3f0   :  { %4073 = vmatpush.bf16.msra.mxu1 %v5981_v40  ;;  %v6276_v40 = vld [vmem:[#allocation11 + $0x7e0] sm:$0xf]  ;;  %v6699_v25 = vld [vmem:[#allocation11 + $0x2c] sm:$0xf] }
 0x3f1   :  { %3867 = vmatpush.bf16.msra.mxu3 %v5941_v53  ;;  %4062 = vmatpush.bf16.msra.mxu0 %v5821_v45  ;;  %v6277_v42 = vor.u32 %v6948_v56, %v6276_v40  ;;  %v6260_v53 = vld [vmem:[#allocation11 + $0x7c0] sm:$0xf]  ;;  %v6944_v45 = vld [vmem:[#allocation11 + $0x7cc] sm:$0xf0] }
 0x3f2   :  { %v7824_v38 = vpop.f32.mrf.mxu1  ;;  %3875 = vmatpush.bf16.msrb.mxu2 %v6149_v43  ;;  %v6261_v0 = vor.u32 %v6944_v45, %v6260_v53  ;;  %v6228_v40 = vld [vmem:[#allocation11 + $0x780] sm:$0xf]  ;;  %v6936_v56 = vld [vmem:[#allocation11 + $0x78c] sm:$0xf0]  ;;  %v5454_v53 = vld [vmem:[#allocation11 + $0x178] sm:$0xf0] }
 0x3f3   :  { %v6084_v54 = vld [vmem:[#allocation11 + $0x660] sm:$0xf]  ;;  %v2096_v45 = vrot.slane %v7844_v32, 2 }
 0x3f4   :  { %4074 = vmatpush.bf16.msra.mxu1 %v5965_v16  ;;  %v6755_v16 = vld [vmem:[#allocation11 + $0x1ec] sm:$0xf] }
 0x3f5   :  { %3868 = vmatpush.bf16.msra.mxu3 %v5925_v8  ;;  %4063 = vmatpush.bf16.msra.mxu0 %v5805_v15  ;;  %v5521_v60 = vor.u32 %v6755_v16, %v5518_v37  ;;  %v2106_v8 = vmax.f32 %v2105_v6, %v7822_v35  ;;  %v6117_v15 = vor.u32 %v6908_v19, %v6116_v24  ;;  %v6900_v16 = vld [vmem:[#allocation11 + $0x66c] sm:$0xf0]  ;;  %v5310_v24 = vld [vmem:[#allocation11 + $0x58] sm:$0xf0] }
 0x3f6   :  { %3876 = vmatpush.bf16.msrb.mxu2 %v6133_v61  ;;  %v6085_v57 = vor.u32 %v6900_v16, %v6084_v54  ;;  %v5278_v54 = vld [vmem:[#allocation11 + $0x18] sm:$0xf0] }
 0x3f7   :  { %v2107_v28 = vmax.f32 %v2106_v8, %v7824_v38  ;;  %v6735_v8 = vld [vmem:[#allocation11 + $0x14c] sm:$0xf] }
 0x3f8   :  { %4075 = vmatpush.bf16.msra.mxu1 %v5949_v58  ;;  %v5374_v58 = vld [vmem:[#allocation11 + $0xd8] sm:$0xf0] }
 0x3f9   :  { %3869 = vmatpush.bf16.msra.mxu3 %v5909_v39  ;;  %4064 = vmatpush.bf16.msra.mxu0 %v5789_v51  ;;  %v5377_v50 = vor.u32 %v6719_v62, %v5374_v58  ;;  %v6904_v39 = vld [vmem:[#allocation11 + $0x68c] sm:$0xf0]  ;;  %v5345_v51 = vor.u32 %v6711_v41, %v5342_v44  ;;  %v6068_v58 = vld [vmem:[#allocation11 + $0x640] sm:$0xf]  ;;  %v2097_v44 = vmax.f32 %v7844_v32, %v2096_v45  ;;  %v5406_v32 = vld [vmem:[#allocation11 + $0x118] sm:$0xf0] }
 0x3fa   :  { %v7826_v52 = vpop.f32.mrf.mxu1  ;;  %3877 = vmatpush.bf16.msrb.mxu2 %v6117_v15  ;;  %v6101_v43 = vor.u32 %v6904_v39, %v6100_v27  ;;  %v6069_v6 = vor.u32 %v6896_v1, %v6068_v58  ;;  %v5438_v15 = vld [vmem:[#allocation11 + $0x158] sm:$0xf0]  ;;  %v6164_v41 = vld [vmem:[#allocation11 + $0x700] sm:$0xf] }
 0x3fb   :  { %v2108_v35 = vmax.f32 %v2107_v28, %v7826_v52  ;;  %v5294_v28 = vld [vmem:[#allocation11 + $0x38] sm:$0xf0]  ;;  %v2098_v16 = vrot.slane %v2097_v44, 1 }
 0x3fc   :  { %4076 = vmatpush.bf16.msra.mxu1 %v5933_v55  ;;  %v5358_v55 = vld [vmem:[#allocation11 + $0xb8] sm:$0xf0] }
 0x3fd   :  { %3888 = vmatpush.bf16.msrb.mxu3 %v6277_v42  ;;  %4109 = vmatpush.bf16.msrb.mxu0 %v5393_v26  ;;  %v5361_v33 = vor.u32 %v6715_v18, %v5358_v55  ;;  %v6229_v42 = vor.u32 %v6936_v56, %v6228_v40  ;;  %v6212_v26 = vld [vmem:[#allocation11 + $0x760] sm:$0xf]  ;;  %v5441_v18 = vor.u32 %v6735_v8, %v5438_v15  ;;  %v6892_v55 = vld [vmem:[#allocation11 + $0x62c] sm:$0xf0]  ;;  %v5422_v39 = vld [vmem:[#allocation11 + $0x138] sm:$0xf0] }
 0x3fe   :  { %3878 = vmatpush.bf16.msrb.mxu2 %v6101_v43  ;;  %v6213_v47 = vor.u32 %v6932_v48, %v6212_v26  ;;  %v6888_v43 = vld [vmem:[#allocation11 + $0x60c] sm:$0xf0]  ;;  %v2511_v40 = vperm.slane %v7811_v14, 2  ;;  %v5297_v56 = vor.u32 %v6699_v25, %v5294_v28  ;;  %v5510_v25 = vld [vmem:[#allocation11 + $0x1f0] sm:$0xf0] }
 0x3ff   :  { %v6851_v28 = vld [vmem:[#allocation11 + $0x4ec] sm:$0xf] }
 0x400   :  { %4077 = vmatpush.bf16.msra.mxu1 %v5917_v31  ;;  %v5470_v31 = vld [vmem:[#allocation11 + $0x198] sm:$0xf0]  ;;  %v4015_v14 = vadd.f32 %v7806_v13, %v2511_v40 }
 0x401   :  { %3889 = vmatpush.bf16.msrb.mxu3 %v6261_v0  ;;  %4110 = vmatpush.bf16.msrb.mxu0 %v5377_v50  ;;  %v5473_v52 = vor.u32 %v6743_v4, %v5470_v31  ;;  %v6928_v50 = vld [vmem:[#allocation11 + $0x74c] sm:$0xf0] }
 0x402   :  { %v7828_v21 = vpop.f32.mrf.mxu1  ;;  %3879 = vmatpush.bf16.msrb.mxu2 %v6085_v57  ;;  %v6727_v57 = vld [vmem:[#allocation11 + $0x10c] sm:$0xf] }
 0x403   :  { %v2109_v38 = vmax.f32 %v2108_v35, %v7828_v21  ;;  %v6739_v21 = vld [vmem:[#allocation11 + $0x16c] sm:$0xf]  ;;  %v6036_v35 = vld [vmem:[#allocation11 + $0x600] sm:$0xf] }
 0x404   :  { %4122 = vmatpush.bf16.msrb.mxu1 %v5521_v60  ;;  %v5326_v60 = vld [vmem:[#allocation11 + $0x78] sm:$0xf0]  ;;  %v5457_v0 = vor.u32 %v6739_v21, %v5454_v53  ;;  %v2099_v53 = vmax.f32 %v2097_v44, %v2098_v16  ;;  %v5366_v44 = vld [vmem:[#allocation11 + $0xd0] sm:$0xf0] }
 0x405   :  { %3890 = vmatpush.bf16.msrb.mxu3 %v6245_v46  ;;  %4111 = vmatpush.bf16.msrb.mxu0 %v5361_v33  ;;  %v5329_v61 = vor.u32 %v6707_v22, %v5326_v60  ;;  %v6180_v46 = vld [vmem:[#allocation11 + $0x720] sm:$0xf]  ;;  %v6924_v33 = vld [vmem:[#allocation11 + $0x72c] sm:$0xf0]  ;;  %v5409_v22 = vor.u32 %v6727_v57, %v5406_v32  ;;  %v6014_v16 = vld [vmem:[#allocation11 + $0x5d8] sm:$0xf0] }
 0x406   :  { %3880 = vmatpush.bf16.msrb.mxu2 %v6069_v6  ;;  %v6181_v17 = vor.u32 %v6924_v33, %v6180_v46  ;;  %v5350_v57 = vld [vmem:[#allocation11 + $0xb0] sm:$0xf0]  ;;  %v6746_v32 = vld [vmem:[#allocation11 + $0x1a4] sm:$0xf] }
 0x408   :  { %4123 = vmatpush.bf16.msrb.mxu1 %v5505_v36  ;;  %v6703_v36 = vld [vmem:[#allocation11 + $0x4c] sm:$0xf] }
 0x409   :  { %3891 = vmatpush.bf16.msrb.mxu3 %v6229_v42  ;;  %4112 = vmatpush.bf16.msrb.mxu0 %v5345_v51  ;;  %v5313_v10 = vor.u32 %v6703_v36, %v5310_v24  ;;  %v6920_v42 = vld [vmem:[#allocation11 + $0x70c] sm:$0xf0]  ;;  %v6037_v51 = vor.u32 %v6888_v43, %v6036_v35 }
 0x40a   :  { %v7830_v59 = vpop.f32.mrf.mxu1  ;;  %v6165_v31 = vor.u32 %v6920_v42, %v6164_v41 }
 0x40b   :  { %v2110_v37 = vmax.f32 %v2109_v38, %v7830_v59  ;;  %v6196_v59 = vld [vmem:[#allocation11 + $0x740] sm:$0xf] }
 0x40c   :  { %4124 = vmatpush.bf16.msrb.mxu1 %v5489_v30  ;;  %v6197_v19 = vor.u32 %v6928_v50, %v6196_v59  ;;  %v6731_v30 = vld [vmem:[#allocation11 + $0x12c] sm:$0xf]  ;;  %v2147_v59 = vrot.slane %v2099_v53, 4 }
 0x40d   :  { %3892 = vmatpush.bf16.msrb.mxu3 %v6213_v47  ;;  %4113 = vmatpush.bf16.msrb.mxu0 %v5329_v61  ;;  %v5425_v38 = vor.u32 %v6731_v30, %v5422_v39  ;;  %v7050_v61 = vld [vmem:[%s8003_s6] sm:$0xff]  ;;  %v5902_v30 = vld [vmem:[#allocation11 + $0x4f8] sm:$0xf0]  ;;  %v6875_v53 = vld [vmem:[#allocation11 + $0x5ac] sm:$0xf] }
 0x40e   :  { %v2201_v21 = vperm.slane %v7050_v61, 5  ;;  %v2202_v45 = vperm.slane %v7050_v61, 6  ;;  %v2200_v58 = vperm.slane %v7050_v61, 4  ;;  %v6030_v39 = vld [vmem:[#allocation11 + $0x5f8] sm:$0xf0] }
 0x410   :  { %4125 = vmatpush.bf16.msrb.mxu1 %v5473_v52  ;;  %v6695_v52 = vld [vmem:[#allocation11 + $0xc] sm:$0xf]  ;;  %v2207_v1 = vrot.slane %v2201_v21, 6  ;;  %v2208_v6 = vrot.slane %v2202_v45, 4  ;;  %v5870_v21 = vld [vmem:[#allocation11 + $0x4b8] sm:$0xf0] }
 0x411   :  { %3893 = vmatpush.bf16.msrb.mxu3 %v6197_v19  ;;  %4114 = vmatpush.bf16.msrb.mxu0 %v5313_v10 }
 0x412   :  { %v7832_v23 = vpop.f32.mrf.mxu1  ;;  %v2213_v10 = vsel %vm322_vm1, %v2200_v58, %v2207_v1  ;;  %v5334_v58 = vld [vmem:[#allocation11 + $0x90] sm:$0xf0]  ;;  %v6742_v1 = vld [vmem:[#allocation11 + $0x184] sm:$0xf] }
 0x413   :  { %v2111_v62 = vmax.f32 %v2110_v37, %v7832_v23  ;;  %v5281_v37 = vor.u32 %v6695_v52, %v5278_v54  ;;  %v5886_v52 = vld [vmem:[#allocation11 + $0x4d8] sm:$0xf0]  ;;  %v6879_v54 = vld [vmem:[#allocation11 + $0x5cc] sm:$0xf] }
 0x414   :  { %4126 = vmatpush.bf16.msrb.mxu1 %v5457_v0 }
 0x415   :  { %3894 = vmatpush.bf16.msrb.mxu3 %v6181_v17  ;;  %4115 = vmatpush.bf16.msrb.mxu0 %v5297_v56  ;;  %v6754_v17 = vld [vmem:[#allocation11 + $0x1e4] sm:$0xf] }
 0x416   :  { %v5513_v56 = vor.u32 %v6754_v17, %v5510_v25  ;;  %v6867_v17 = vld [vmem:[#allocation11 + $0x56c] sm:$0xf]  ;;  %v5966_v25 = vld [vmem:[#allocation11 + $0x578] sm:$0xf0] }
 0x418   :  { %4127 = vmatpush.bf16.msrb.mxu1 %v5441_v18 }
 0x419   :  { %3895 = vmatpush.bf16.msrb.mxu3 %v6165_v31  ;;  %4116 = vmatpush.bf16.msrb.mxu0 %v5281_v37  ;;  %v6714_v37 = vld [vmem:[#allocation11 + $0xa4] sm:$0xf] }
 0x41a   :  { %v7837_v12 = vpop.f32.mrf.mxu1  ;;  %v5353_v45 = vor.u32 %v6714_v37, %v5350_v57 }
 0x41b   :  { %v2112_v2 = vmax.f32 %v2111_v62, %v7837_v12  ;;  %v6053_v12 = vor.u32 %v6892_v55, %v6052_v29  ;;  %v2203_v62 = vperm.slane %v7050_v61, 7  ;;  %v6843_v61 = vld [vmem:[#allocation11 + $0x4ac] sm:$0xf] }
 0x41c   :  { %4128 = vmatpush.bf16.msrb.mxu1 %v5425_v38  ;;  %v5494_v38 = vld [vmem:[#allocation11 + $0x1d0] sm:$0xf0] }
 0x41d   :  { %3881 = vmatpush.bf16.msrb.mxu2 %v6053_v12  ;;  %v2209_v50 = vrot.slane %v2203_v62, 2  ;;  %v5382_v12 = vld [vmem:[#allocation11 + $0xf0] sm:$0xf0] }
 0x41f   :  { %v2214_v15 = vsel %vm2150_vm4, %v2208_v6, %v2209_v50  ;;  %v6839_v50 = vld [vmem:[#allocation11 + $0x48c] sm:$0xf] }
 0x420   :  { %4129 = vmatpush.bf16.msrb.mxu1 %v5409_v22  ;;  %v2215_v18 = vsel %vm2152_vm5, %v2213_v10, %v2214_v15  ;;  %v6706_v15 = vld [vmem:[#allocation11 + $0x64] sm:$0xf] }
 0x421   :  { %3882 = vmatpush.bf16.msrb.mxu2 %v6037_v51  ;;  %v5905_v51 = vor.u32 %v6851_v28, %v5902_v30 }
 0x422   :  { %v1778_v9 = vpop.f32.mrf.mxu1 }
 0x423   :  { %v2113_v23 = vmax.f32 %v2112_v2, %v1778_v9 }
 0x42a   :  { %v1780_v3 = vpop.f32.mrf.mxu1 }
 0x42b   :  { %v2114_v27 = vmax.f32 %v2113_v23, %v1780_v3 }
 0x42d   :  { %v2115_v4 = vrot.slane %v2114_v27, 4 }
 0x42f   :  { %v2116_v9 = vmax.f32 %v2114_v27, %v2115_v4  ;;  %v6883_v27 = vld [vmem:[#allocation11 + $0x5ec] sm:$0xf]  ;;  %v6750_v4 = vld [vmem:[#allocation11 + $0x1c4] sm:$0xf] }
 0x430   :  { %v6033_v31 = vor.u32 %v6883_v27, %v6030_v39  ;;  %v6702_v27 = vld [vmem:[#allocation11 + $0x44] sm:$0xf] }
 0x431   :  { %v2117_v26 = vrot.slane %v2116_v9, 2 }
 0x432   :  { %v4027_v48 = vpop.f32.mrf.mxu1 }
 0x433   :  { %v2118_v60 = vmax.f32 %v2116_v9, %v2117_v26  ;;  %v7854_v47 = vadd.f32 %v4027_v48, %v4015_v14  ;;  %v6847_v9 = vld [vmem:[#allocation11 + $0x4cc] sm:$0xf]  ;;  %v5497_v26 = vor.u32 %v6750_v4, %v5494_v38  ;;  %v5478_v48 = vld [vmem:[#allocation11 + $0x1b0] sm:$0xf0]  ;;  %v5822_v38 = vld [vmem:[#allocation11 + $0x458] sm:$0xf0] }
 0x434   :  { %v5889_v22 = vor.u32 %v6847_v9, %v5886_v52  ;;  %v5481_v62 = vor.u32 %v6746_v32, %v5478_v48  ;;  %v6831_v4 = vld [vmem:[#allocation11 + $0x44c] sm:$0xf]  ;;  %v5806_v48 = vld [vmem:[#allocation11 + $0x438] sm:$0xf0] }
 0x435   :  { %v2119_v13 = vrot.slane %v2118_v60, 1  ;;  %v5825_v37 = vor.u32 %v6831_v4, %v5822_v38  ;;  %v6827_v32 = vld [vmem:[#allocation11 + $0x42c] sm:$0xf]  ;;  %v5574_v38 = vld [vmem:[#allocation11 + $0x270] sm:$0xf0] }
 0x437   :  { %v2120_v0 = vmax.f32 %v2118_v60, %v2119_v13  ;;  %v6017_v60 = vor.u32 %v6879_v54, %v6014_v16  ;;  %v5998_v13 = vld [vmem:[#allocation11 + $0x5b8] sm:$0xf0]  ;;  %v6698_v54 = vld [vmem:[#allocation11 + $0x24] sm:$0xf]  ;;  %v5286_v16 = vld [vmem:[#allocation11 + $0x30] sm:$0xf0] }
 0x438   :  { %v6001_v6 = vor.u32 %v6875_v53, %v5998_v13  ;;  %v6694_v53 = vld [vmem:[#allocation11 + $0x4] sm:$0xf]  ;;  %v5270_v13 = vld [vmem:[#allocation11 + $0x10] sm:$0xf0] }
 0x439   :  { %v2148_v2 = vrot.slane %v2120_v0, 2  ;;  %v6710_v0 = vld [vmem:[#allocation11 + $0x84] sm:$0xf] }
 0x43a   :  { %v4029_v36 = vpop.f32.mrf.mxu1  ;;  %v5337_v10 = vor.u32 %v6710_v0, %v5334_v58  ;;  %v6786_v0 = vld [vmem:[#allocation11 + $0x2e4] sm:$0xf]  ;;  %v5638_v58 = vld [vmem:[#allocation11 + $0x2f0] sm:$0xf0] }
 0x43b   :  { %v2161_v24 = vsel %vm2150_vm4, %v2147_v59, %v2148_v2  ;;  %v5462_v59 = vld [vmem:[#allocation11 + $0x190] sm:$0xf0]  ;;  %v5873_v2 = vor.u32 %v6843_v61, %v5870_v21  ;;  %v5854_v36 = vld [vmem:[#allocation11 + $0x498] sm:$0xf0]  ;;  %v5289_v61 = vor.u32 %v6698_v54, %v5286_v16  ;;  %v6766_v54 = vld [vmem:[#allocation11 + $0x244] sm:$0xf] }
 0x43c   :  { %v2162_v19 = vsel %vm2152_vm5, %v7804_v63, %v2161_v24  ;;  %v6722_v63 = vld [vmem:[#allocation11 + $0xe4] sm:$0xf]  ;;  %v6871_v24 = vld [vmem:[#allocation11 + $0x58c] sm:$0xf]  ;;  %v5558_v16 = vld [vmem:[#allocation11 + $0x250] sm:$0xf0] }
 0x43d   :  { %v2178_v8 = vrot.slane %v2162_v19, 7  ;;  %v5385_v40 = vor.u32 %v6722_v63, %v5382_v12  ;;  %v5982_v19 = vld [vmem:[#allocation11 + $0x598] sm:$0xf0] }
 0x43e   :  { %v5838_v12 = vld [vmem:[#allocation11 + $0x478] sm:$0xf0] }
 0x43f   :  { %v2179_v29 = vsel %vm2168_vm6, %v2178_v8, %v7801_v49  ;;  %v6718_v49 = vld [vmem:[#allocation11 + $0xc4] sm:$0xf] }
 0x440   :  { %v2180_v23 = vsel %vm2170_vm7, %v2178_v8, %v2179_v29  ;;  %v5369_v14 = vor.u32 %v6718_v49, %v5366_v44  ;;  %v5318_v29 = vld [vmem:[#allocation11 + $0x70] sm:$0xf0]  ;;  %v5969_v44 = vor.u32 %v6867_v17, %v5966_v25  ;;  %v6778_v17 = vld [vmem:[#allocation11 + $0x2a4] sm:$0xf] }
 0x441   :  { %v2181_v55 = vsel %vm2172_vm8, %v2178_v8, %v2180_v23  ;;  %v6738_v23 = vld [vmem:[#allocation11 + $0x164] sm:$0xf]  ;;  %v5321_v28 = vor.u32 %v6706_v15, %v5318_v29  ;;  %v5641_v15 = vor.u32 %v6786_v0, %v5638_v58  ;;  %v5606_v25 = vld [vmem:[#allocation11 + $0x2b0] sm:$0xf0] }
 0x442   :  { %v2182_v46 = vsel %vm2174_vm9, %v2178_v8, %v2181_v55  ;;  %v5465_v8 = vor.u32 %v6742_v1, %v5462_v59  ;;  %v6835_v55 = vld [vmem:[#allocation11 + $0x46c] sm:$0xf]  ;;  %v5809_v1 = vor.u32 %v6827_v32, %v5806_v48  ;;  %v6762_v32 = vld [vmem:[#allocation11 + $0x224] sm:$0xf]  ;;  %v5542_v48 = vld [vmem:[#allocation11 + $0x230] sm:$0xf0] }
 0x443   :  { %v2219_v33 = vadd.f32 %v2215_v18, %v2182_v46  ;;  %v5446_v18 = vld [vmem:[#allocation11 + $0x170] sm:$0xf0]  ;;  %v5857_v46 = vor.u32 %v6839_v50, %v5854_v36  ;;  %v6823_v50 = vld [vmem:[#allocation11 + $0x40c] sm:$0xf]  ;;  %v5790_v36 = vld [vmem:[#allocation11 + $0x418] sm:$0xf0] }
 0x444   :  { %v5449_v30 = vor.u32 %v6738_v23, %v5446_v18  ;;  %v5793_v23 = vor.u32 %v6823_v50, %v5790_v36  ;;  %v6850_v0 = vld [vmem:[#allocation11 + $0x4e4] sm:$0xf]  ;;  %v5894_v58 = vld [vmem:[#allocation11 + $0x4f0] sm:$0xf0] }
 0x445   :  { %v2221_v3 = vmax.f32 %v2219_v33, 0.0  ;;  %v5985_v33 = vor.u32 %v6871_v24, %v5982_v19  ;;  %v6855_v24 = vld [vmem:[#allocation11 + $0x50c] sm:$0xf]  ;;  %v5918_v19 = vld [vmem:[#allocation11 + $0x518] sm:$0xf0]  ;;  %v5897_v50 = vor.u32 %v6850_v0, %v5894_v58 }
 0x446   :  { %v5921_v18 = vor.u32 %v6855_v24, %v5918_v19  ;;  %v6846_v24 = vld [vmem:[#allocation11 + $0x4c4] sm:$0xf]  ;;  %v5878_v19 = vld [vmem:[#allocation11 + $0x4d0] sm:$0xf0]  ;;  %v6340_v58 = vld [vmem:[#allocation12 + $0x60] sm:$0xf] }
 0x447   :  { %2226 = vst [vmem:[#allocation1 + $0x20] ss:$4 sm:$0xff] %v2221_v3 }
 0x44e   :  { %v2231_v35 = vld.sshfl [vmem:[#allocation1 + $0x20] sm:$0xff pattern:$0x73625140]  ;;  %v2232_v43 = vld.sshfl [vmem:[#allocation1 + $0x28] sm:$0xff pattern:$0x73625140] }
 0x44f   :  { %v7870_v41 = vpack.c.bf16 %v2231_v35, %v2231_v35  ;;  %v7872_v42 = vpack.c.bf16 %v2232_v43, %v2232_v43  ;;  %v2233_v3 = vld.sshfl [vmem:[#allocation1 + $0x30] sm:$0xff pattern:$0x73625140]  ;;  %v2234_v63 = vld.sshfl [vmem:[#allocation1 + $0x38] sm:$0xff pattern:$0x73625140] }
 0x450   :  { %v7878_v39 = vpack.c.bf16 %v2233_v3, %v2233_v3  ;;  %v7880_v49 = vpack.c.bf16 %v2234_v63, %v2234_v63  ;;  %v5302_v35 = vld [vmem:[#allocation11 + $0x50] sm:$0xf0]  ;;  %v6734_v43 = vld [vmem:[#allocation11 + $0x144] sm:$0xf] }
 0x451   :  { %3857 = vmatmul.bf16.vlgmr.msra.gmra.mxu2 %v7870_v41  ;;  %3870 = vmatmul.bf16.vlgmr.msra.gmra.mxu3 %v7872_v42  ;;  %v5305_v9 = vor.u32 %v6702_v27, %v5302_v35  ;;  %v5750_v3 = vld [vmem:[#allocation11 + $0x3d0] sm:$0xf0]  ;;  %v5609_v27 = vor.u32 %v6778_v17, %v5606_v25  ;;  %v6870_v17 = vld [vmem:[#allocation11 + $0x584] sm:$0xf] }
 0x452   :  { %3901 = vmatpush.bf16.msra.mxu2 %v5385_v40  ;;  %3914 = vmatpush.bf16.msra.mxu3 %v5513_v56  ;;  %v5430_v40 = vld [vmem:[#allocation11 + $0x150] sm:$0xf0]  ;;  %v5841_v56 = vor.u32 %v6835_v55, %v5838_v12  ;;  %v6782_v55 = vld [vmem:[#allocation11 + $0x2c4] sm:$0xf] }
 0x453   :  { %4065 = vmatmul.bf16.vlgmr.msra.gmra.mxu0 %v7870_v41  ;;  %4078 = vmatmul.bf16.vlgmr.msra.gmra.mxu1 %v7872_v42  ;;  %v5433_v52 = vor.u32 %v6734_v43, %v5430_v40  ;;  %v6774_v43 = vld [vmem:[#allocation11 + $0x284] sm:$0xf]  ;;  %v5590_v40 = vld [vmem:[#allocation11 + $0x290] sm:$0xf0] }
 0x454   :  { %4161 = vmatpush.bf16.msra.mxu0 %v5905_v51  ;;  %4174 = vmatpush.bf16.msra.mxu1 %v6033_v31  ;;  %v6863_v51 = vld [vmem:[#allocation11 + $0x54c] sm:$0xf]  ;;  %v5950_v31 = vld [vmem:[#allocation11 + $0x558] sm:$0xf0]  ;;  %v5974_v25 = vld [vmem:[#allocation11 + $0x590] sm:$0xf0] }
 0x455   :  { %v5953_v57 = vor.u32 %v6863_v51, %v5950_v31  ;;  %v6802_v51 = vld [vmem:[#allocation11 + $0x364] sm:$0xf]  ;;  %v5702_v31 = vld [vmem:[#allocation11 + $0x370] sm:$0xf0] }
 0x456   :  { %3902 = vmatpush.bf16.msra.mxu2 %v5369_v14  ;;  %3915 = vmatpush.bf16.msra.mxu3 %v5497_v26  ;;  %v6730_v14 = vld [vmem:[#allocation11 + $0x124] sm:$0xf]  ;;  %v5414_v26 = vld [vmem:[#allocation11 + $0x130] sm:$0xf0] }
 0x457   :  { %v5417_v21 = vor.u32 %v6730_v14, %v5414_v26  ;;  %v6798_v14 = vld [vmem:[#allocation11 + $0x344] sm:$0xf]  ;;  %v5686_v26 = vld [vmem:[#allocation11 + $0x350] sm:$0xf0] }
 0x458   :  { %4162 = vmatpush.bf16.msra.mxu0 %v5889_v22  ;;  %4175 = vmatpush.bf16.msra.mxu1 %v6017_v60  ;;  %v6859_v22 = vld [vmem:[#allocation11 + $0x52c] sm:$0xf]  ;;  %v5934_v60 = vld [vmem:[#allocation11 + $0x538] sm:$0xf0] }
 0x459   :  { %v5937_v59 = vor.u32 %v6859_v22, %v5934_v60  ;;  %v6794_v22 = vld [vmem:[#allocation11 + $0x324] sm:$0xf]  ;;  %v5670_v60 = vld [vmem:[#allocation11 + $0x330] sm:$0xf0] }
 0x45a   :  { %3903 = vmatpush.bf16.msra.mxu2 %v5353_v45  ;;  %3916 = vmatpush.bf16.msra.mxu3 %v5481_v62  ;;  %v6726_v45 = vld [vmem:[#allocation11 + $0x104] sm:$0xf]  ;;  %v5398_v62 = vld [vmem:[#allocation11 + $0x110] sm:$0xf0] }
 0x45c   :  { %4163 = vmatpush.bf16.msra.mxu0 %v5873_v2  ;;  %4176 = vmatpush.bf16.msra.mxu1 %v6001_v6  ;;  %v6818_v2 = vld [vmem:[#allocation11 + $0x3e4] sm:$0xf]  ;;  %v5766_v6 = vld [vmem:[#allocation11 + $0x3f0] sm:$0xf0] }
 0x45d   :  { %v5769_v29 = vor.u32 %v6818_v2, %v5766_v6 }
 0x45e   :  { %3904 = vmatpush.bf16.msra.mxu2 %v5337_v10  ;;  %3917 = vmatpush.bf16.msra.mxu3 %v5465_v8  ;;  %v5273_v10 = vor.u32 %v6694_v53, %v5270_v13  ;;  %v5401_v8 = vor.u32 %v6726_v45, %v5398_v62  ;;  %v6758_v53 = vld [vmem:[#allocation11 + $0x204] sm:$0xf]  ;;  %v5526_v13 = vld [vmem:[#allocation11 + $0x210] sm:$0xf0] }
 0x45f   :  { %v6790_v45 = vld [vmem:[#allocation11 + $0x304] sm:$0xf]  ;;  %v5654_v62 = vld [vmem:[#allocation11 + $0x310] sm:$0xf0]  ;;  %v5529_v2 = vor.u32 %v6758_v53, %v5526_v13 }
 0x460   :  { %4164 = vmatpush.bf16.msra.mxu0 %v5857_v46  ;;  %4177 = vmatpush.bf16.msra.mxu1 %v5985_v33  ;;  %v5622_v46 = vld [vmem:[#allocation11 + $0x2d0] sm:$0xf0]  ;;  %v6814_v33 = vld [vmem:[#allocation11 + $0x3c4] sm:$0xf]  ;;  %v5657_v6 = vor.u32 %v6790_v45, %v5654_v62 }
 0x461   :  { %3883 = vmatmul.bf16.vlgmr.msrb.gmra.mxu2 %v7878_v39  ;;  %3896 = vmatmul.bf16.vlgmr.msrb.gmra.mxu3 %v7880_v49  ;;  %v5625_v63 = vor.u32 %v6782_v55, %v5622_v46  ;;  %v5753_v12 = vor.u32 %v6814_v33, %v5750_v3  ;;  %v6874_v55 = vld [vmem:[#allocation11 + $0x5a4] sm:$0xf]  ;;  %v5990_v46 = vld [vmem:[#allocation11 + $0x5b0] sm:$0xf0] }
 0x462   :  { %3905 = vmatpush.bf16.msra.mxu2 %v5321_v28  ;;  %3918 = vmatpush.bf16.msra.mxu3 %v5449_v30  ;;  %v6810_v28 = vld [vmem:[#allocation11 + $0x3a4] sm:$0xf]  ;;  %v5734_v30 = vld [vmem:[#allocation11 + $0x3b0] sm:$0xf0]  ;;  %v5993_v3 = vor.u32 %v6874_v55, %v5990_v46 }
 0x463   :  { %4117 = vmatmul.bf16.vlgmr.msrb.gmra.mxu0 %v7774_v7  ;;  %4130 = vmatmul.bf16.vlgmr.msrb.gmra.mxu1 %v7776_v5  ;;  %v5737_v35 = vor.u32 %v6810_v28, %v5734_v30  ;;  %v5977_v30 = vor.u32 %v6870_v17, %v5974_v25  ;;  %v6150_v53 = vld [vmem:[#allocation11 + $0x6f0] sm:$0xf0]  ;;  %v6946_v13 = vld [vmem:[#allocation11 + $0x7e4] sm:$0xf] }
 0x464   :  { %4165 = vmatpush.bf16.msra.mxu0 %v5841_v56  ;;  %4178 = vmatpush.bf16.msra.mxu1 %v5969_v44  ;;  %v6806_v56 = vld [vmem:[#allocation11 + $0x384] sm:$0xf]  ;;  %v5718_v44 = vld [vmem:[#allocation11 + $0x390] sm:$0xf0] }
 0x465   :  { %v5721_v4 = vor.u32 %v6806_v56, %v5718_v44  ;;  %v6278_v45 = vld [vmem:[#allocation11 + $0x7f0] sm:$0xf0]  ;;  %v6938_v46 = vld [vmem:[#allocation11 + $0x7a4] sm:$0xf] }
 0x466   :  { %3906 = vmatpush.bf16.msra.mxu2 %v5305_v9  ;;  %3919 = vmatpush.bf16.msra.mxu3 %v5433_v52  ;;  %v5705_v52 = vor.u32 %v6802_v51, %v5702_v31  ;;  %v6118_v55 = vld [vmem:[#allocation11 + $0x6b0] sm:$0xf0]  ;;  %v6902_v25 = vld [vmem:[#allocation11 + $0x684] sm:$0xf] }
 0x468   :  { %4166 = vmatpush.bf16.msra.mxu0 %v5825_v37  ;;  %4179 = vmatpush.bf16.msra.mxu1 %v5953_v57  ;;  %v5561_v37 = vor.u32 %v6766_v54, %v5558_v16  ;;  %v5689_v57 = vor.u32 %v6798_v14, %v5686_v26  ;;  %v6858_v54 = vld [vmem:[#allocation11 + $0x524] sm:$0xf]  ;;  %v5926_v16 = vld [vmem:[#allocation11 + $0x530] sm:$0xf0]  ;;  %v6348_v14 = vld [vmem:[#allocation12 + $0x70] sm:$0xf] }
 0x469   :  { %v6965_v26 = vld [vmem:[#allocation12 + $0x74] sm:$0xf0] }
 0x46a   :  { %3907 = vmatpush.bf16.msra.mxu2 %v5289_v61  ;;  %3920 = vmatpush.bf16.msra.mxu3 %v5417_v21  ;;  %v5545_v61 = vor.u32 %v6762_v32, %v5542_v48  ;;  %v5673_v21 = vor.u32 %v6794_v22, %v5670_v60  ;;  %v6822_v32 = vld [vmem:[#allocation11 + $0x404] sm:$0xf]  ;;  %v5782_v48 = vld [vmem:[#allocation11 + $0x410] sm:$0xf0]  ;;  %v6349_v22 = vor.u32 %v6965_v26, %v6348_v14 }
 0x46b   :  { %v6854_v60 = vld [vmem:[#allocation11 + $0x504] sm:$0xf]  ;;  %v5785_v62 = vor.u32 %v6822_v32, %v5782_v48  ;;  %v6198_v26 = vld [vmem:[#allocation11 + $0x750] sm:$0xf0] }
 0x46c   :  { %4167 = vmatpush.bf16.msra.mxu0 %v5809_v1  ;;  %4180 = vmatpush.bf16.msra.mxu1 %v5937_v59  ;;  %v6882_v1 = vld [vmem:[#allocation11 + $0x5e4] sm:$0xf]  ;;  %v6022_v59 = vld [vmem:[#allocation11 + $0x5f0] sm:$0xf0] }
 0x46d   :  { %v6025_v36 = vor.u32 %v6882_v1, %v6022_v59  ;;  %v6963_v1 = vld [vmem:[#allocation12 + $0x64] sm:$0xf0]  ;;  %v6926_v14 = vld [vmem:[#allocation11 + $0x744] sm:$0xf] }
 0x46e   :  { %3908 = vmatpush.bf16.msra.mxu2 %v5273_v10  ;;  %3921 = vmatpush.bf16.msra.mxu3 %v5401_v8  ;;  %v6878_v10 = vld [vmem:[#allocation11 + $0x5c4] sm:$0xf]  ;;  %v6006_v8 = vld [vmem:[#allocation11 + $0x5d0] sm:$0xf0]  ;;  %v6201_v48 = vor.u32 %v6926_v14, %v6198_v26 }
 0x470   :  { %4168 = vmatpush.bf16.msra.mxu0 %v5793_v23  ;;  %4181 = vmatpush.bf16.msra.mxu1 %v5921_v18  ;;  %v6842_v23 = vld [vmem:[#allocation11 + $0x4a4] sm:$0xf]  ;;  %v5862_v18 = vld [vmem:[#allocation11 + $0x4b0] sm:$0xf0] }
 0x471   :  { %3909 = vmatmul.bf16.vlgmr.msra.gmra.mxu2 %v7774_v7  ;;  %3922 = vmatmul.bf16.vlgmr.msra.gmra.mxu3 %v7776_v5  ;;  %v5593_v7 = vor.u32 %v6774_v43, %v5590_v40  ;;  %v6770_v5 = vld [vmem:[#allocation11 + $0x264] sm:$0xf]  ;;  %v5865_v33 = vor.u32 %v6842_v23, %v5862_v18  ;;  %v5958_v40 = vld [vmem:[#allocation11 + $0x570] sm:$0xf0] }
 0x472   :  { %3927 = vmatpush.bf16.msrb.mxu2 %v5641_v15  ;;  %3940 = vmatpush.bf16.msrb.mxu3 %v5769_v29  ;;  %v5577_v9 = vor.u32 %v6770_v5, %v5574_v38  ;;  %v5881_v15 = vor.u32 %v6846_v24, %v5878_v19  ;;  %v6009_v29 = vor.u32 %v6878_v10, %v6006_v8  ;;  %v6866_v43 = vld [vmem:[#allocation11 + $0x564] sm:$0xf]  ;;  %v5942_v38 = vld [vmem:[#allocation11 + $0x550] sm:$0xf0]  ;;  %v6332_v10 = vld [vmem:[#allocation12 + $0x50] sm:$0xf] }
 0x473   :  { %4169 = vmatmul.bf16.vlgmr.msra.gmra.mxu0 %v7870_v41  ;;  %4182 = vmatmul.bf16.vlgmr.msra.gmra.mxu1 %v7872_v42  ;;  %v5961_v44 = vor.u32 %v6866_v43, %v5958_v40  ;;  %v6862_v5 = vld [vmem:[#allocation11 + $0x544] sm:$0xf]  ;;  %v6262_v19 = vld [vmem:[#allocation11 + $0x7d0] sm:$0xf0]  ;;  %v6961_v8 = vld [vmem:[#allocation12 + $0x54] sm:$0xf0] }
 0x474   :  { %v5945_v31 = vor.u32 %v6862_v5, %v5942_v38  ;;  %4611 = vmatpush.bf16.msrb.mxu0 %v6349_v22  ;;  %v6942_v24 = vld [vmem:[#allocation11 + $0x7c4] sm:$0xf]  ;;  %v6333_v18 = vor.u32 %v6961_v8, %v6332_v10  ;;  %v6316_v43 = vld [vmem:[#allocation12 + $0x30] sm:$0xf]  ;;  %v6957_v40 = vld [vmem:[#allocation12 + $0x34] sm:$0xf0] }
 0x475   :  { %v6906_v23 = vld [vmem:[#allocation11 + $0x6a4] sm:$0xf]  ;;  %v6214_v5 = vld [vmem:[#allocation11 + $0x770] sm:$0xf0]  ;;  %v6308_v38 = vld [vmem:[#allocation12 + $0x20] sm:$0xf] }
 0x476   :  { %3928 = vmatpush.bf16.msrb.mxu2 %v5625_v63  ;;  %3941 = vmatpush.bf16.msrb.mxu3 %v5753_v12  ;;  %v6838_v63 = vld [vmem:[#allocation11 + $0x484] sm:$0xf]  ;;  %v5846_v12 = vld [vmem:[#allocation11 + $0x490] sm:$0xf0]  ;;  %v6789_v10 = vld [vmem:[#allocation11 + $0x2f4] sm:$0xf0] }
 0x477   :  { %v5849_v28 = vor.u32 %v6838_v63, %v5846_v12  ;;  %v6959_v63 = vld [vmem:[#allocation12 + $0x44] sm:$0xf0]  ;;  %v6121_v12 = vor.u32 %v6906_v23, %v6118_v55  ;;  %v6890_v22 = vld [vmem:[#allocation11 + $0x624] sm:$0xf] }
 0x478   :  { %v5772_v8 = vld [vmem:[#allocation11 + $0x3e8] sm:$0xf] }
 0x47a   :  { %3929 = vmatpush.bf16.msrb.mxu2 %v5609_v27  ;;  %3942 = vmatpush.bf16.msrb.mxu3 %v5737_v35  ;;  %v6834_v27 = vld [vmem:[#allocation11 + $0x464] sm:$0xf]  ;;  %v5830_v35 = vld [vmem:[#allocation11 + $0x470] sm:$0xf0] }
 0x47b   :  { %v5833_v56 = vor.u32 %v6834_v27, %v5830_v35  ;;  %v6934_v27 = vld [vmem:[#allocation11 + $0x784] sm:$0xf]  ;;  %v6230_v35 = vld [vmem:[#allocation11 + $0x790] sm:$0xf0] }
 0x47e   :  { %3930 = vmatpush.bf16.msrb.mxu2 %v5593_v7  ;;  %3943 = vmatpush.bf16.msrb.mxu3 %v5721_v4  ;;  %v6830_v7 = vld [vmem:[#allocation11 + $0x444] sm:$0xf]  ;;  %v5814_v4 = vld [vmem:[#allocation11 + $0x450] sm:$0xf0] }
 0x47f   :  { %v5817_v51 = vor.u32 %v6830_v7, %v5814_v4  ;;  %v6086_v7 = vld [vmem:[#allocation11 + $0x670] sm:$0xf0]  ;;  %v6930_v4 = vld [vmem:[#allocation11 + $0x764] sm:$0xf] }
 0x482   :  { %3931 = vmatpush.bf16.msrb.mxu2 %v5577_v9  ;;  %3944 = vmatpush.bf16.msrb.mxu3 %v5705_v52  ;;  %v6826_v9 = vld [vmem:[#allocation11 + $0x424] sm:$0xf]  ;;  %v5798_v52 = vld [vmem:[#allocation11 + $0x430] sm:$0xf0] }
 0x486   :  { %3932 = vmatpush.bf16.msrb.mxu2 %v5561_v37  ;;  %3945 = vmatpush.bf16.msrb.mxu3 %v5689_v57  ;;  %v5801_v37 = vor.u32 %v6826_v9, %v5798_v52  ;;  %v5929_v57 = vor.u32 %v6858_v54, %v5926_v16  ;;  %v6217_v9 = vor.u32 %v6930_v4, %v6214_v5  ;;  %v6894_v52 = vld [vmem:[#allocation11 + $0x644] sm:$0xf]  ;;  %v6070_v16 = vld [vmem:[#allocation11 + $0x650] sm:$0xf0] }
 0x487   :  { %v6073_v32 = vor.u32 %v6894_v52, %v6070_v16  ;;  %v6318_v16 = vld [vmem:[#allocation12 + $0x38] sm:$0xf0] }
 0x48a   :  { %3933 = vmatpush.bf16.msrb.mxu2 %v5545_v61  ;;  %3946 = vmatpush.bf16.msrb.mxu3 %v5673_v21  ;;  %v5910_v61 = vld [vmem:[#allocation11 + $0x510] sm:$0xf0]  ;;  %v6914_v21 = vld [vmem:[#allocation11 + $0x6e4] sm:$0xf] }
 0x48b   :  { %v5913_v0 = vor.u32 %v6854_v60, %v5910_v61  ;;  %v6153_v59 = vor.u32 %v6914_v21, %v6150_v53  ;;  %v6054_v61 = vld [vmem:[#allocation11 + $0x630] sm:$0xf0]  ;;  %v6922_v21 = vld [vmem:[#allocation11 + $0x724] sm:$0xf] }
 0x48c   :  { %v6182_v53 = vld [vmem:[#allocation11 + $0x730] sm:$0xf0] }
 0x48e   :  { %3934 = vmatpush.bf16.msrb.mxu2 %v5529_v2  ;;  %3947 = vmatpush.bf16.msrb.mxu3 %v5657_v6  ;;  %v6281_v2 = vor.u32 %v6946_v13, %v6278_v45  ;;  %v6910_v6 = vld [vmem:[#allocation11 + $0x6c4] sm:$0xf]  ;;  %v6292_v45 = vld [vmem:[#allocation12] sm:$0xf] }
 0x48f   :  { %v6886_v13 = vld [vmem:[#allocation11 + $0x604] sm:$0xf] }
 0x491   :  { %3935 = vmatmul.bf16.vlgmr.msrb.gmra.mxu2 %v7782_v34  ;;  %3948 = vmatmul.bf16.vlgmr.msrb.gmra.mxu3 %v7784_v11 }
 0x492   :  { %3953 = vmatpush.bf16.msra.mxu2 %v5897_v50  ;;  %3966 = vmatpush.bf16.msra.mxu3 %v6025_v36  ;;  %v6341_v50 = vor.u32 %v6963_v1, %v6340_v58  ;;  %v6134_v36 = vld [vmem:[#allocation11 + $0x6d0] sm:$0xf0]  ;;  %v6185_v58 = vor.u32 %v6922_v21, %v6182_v53  ;;  %v6954_v21 = vld [vmem:[#allocation12 + $0x24] sm:$0xf]  ;;  %v6310_v53 = vld [vmem:[#allocation12 + $0x28] sm:$0xf0] }
 0x493   :  { %v6038_v1 = vld [vmem:[#allocation11 + $0x610] sm:$0xf0] }
 0x494   :  { %4612 = vmatpush.bf16.msrb.mxu0 %v6341_v50  ;;  %v6918_v50 = vld [vmem:[#allocation11 + $0x704] sm:$0xf] }
 0x496   :  { %3954 = vmatpush.bf16.msra.mxu2 %v5881_v15  ;;  %3967 = vmatpush.bf16.msra.mxu3 %v6009_v29  ;;  %v6137_v15 = vor.u32 %v6910_v6, %v6134_v36  ;;  %v6265_v29 = vor.u32 %v6942_v24, %v6262_v19  ;;  %v6350_v6 = vld [vmem:[#allocation12 + $0x78] sm:$0xf0]  ;;  %v6166_v36 = vld [vmem:[#allocation11 + $0x710] sm:$0xf0]  ;;  %v5644_v24 = vld [vmem:[#allocation11 + $0x2e8] sm:$0xf] }
 0x497   :  { %v6169_v23 = vor.u32 %v6918_v50, %v6166_v36  ;;  %v5645_v55 = vor.u32 %v6789_v10, %v5644_v24  ;;  %v6952_v50 = vld [vmem:[#allocation12 + $0x14] sm:$0xf]  ;;  %v6302_v36 = vld [vmem:[#allocation12 + $0x18] sm:$0xf0]  ;;  %v5548_v10 = vld [vmem:[#allocation11 + $0x228] sm:$0xf] }
 0x498   :  { %4613 = vmatpush.bf16.msrb.mxu0 %v6333_v18  ;;  %v6962_v18 = vld [vmem:[#allocation12 + $0x64] sm:$0xf] }
 0x49a   :  { %3955 = vmatpush.bf16.msra.mxu2 %v5865_v33  ;;  %3968 = vmatpush.bf16.msra.mxu3 %v5993_v3  ;;  %v6246_v33 = vld [vmem:[#allocation11 + $0x7b0] sm:$0xf0]  ;;  %v6324_v3 = vld [vmem:[#allocation12 + $0x40] sm:$0xf] }
 0x49b   :  { %v6249_v17 = vor.u32 %v6938_v46, %v6246_v33  ;;  %v5628_v33 = vld [vmem:[#allocation11 + $0x2c8] sm:$0xf] }
 0x49e   :  { %3956 = vmatpush.bf16.msra.mxu2 %v5849_v28  ;;  %3969 = vmatpush.bf16.msra.mxu3 %v5977_v30  ;;  %v6325_v28 = vor.u32 %v6959_v63, %v6324_v3  ;;  %v6102_v30 = vld [vmem:[#allocation11 + $0x690] sm:$0xf0]  ;;  %v6342_v3 = vld [vmem:[#allocation12 + $0x68] sm:$0xf0]  ;;  %v6785_v63 = vld [vmem:[#allocation11 + $0x2d4] sm:$0xf0] }
 0x4a0   :  { %4614 = vmatpush.bf16.msrb.mxu0 %v6325_v28  ;;  %v6960_v28 = vld [vmem:[#allocation12 + $0x54] sm:$0xf] }
 0x4a2   :  { %3957 = vmatpush.bf16.msra.mxu2 %v5833_v56  ;;  %3970 = vmatpush.bf16.msra.mxu3 %v5961_v44  ;;  %v6233_v56 = vor.u32 %v6934_v27, %v6230_v35  ;;  %v6317_v44 = vor.u32 %v6957_v40, %v6316_v43  ;;  %v5629_v27 = vor.u32 %v6785_v63, %v5628_v33  ;;  %v5612_v43 = vld [vmem:[#allocation11 + $0x2a8] sm:$0xf]  ;;  %v6781_v40 = vld [vmem:[#allocation11 + $0x2b4] sm:$0xf0]  ;;  %v6294_v33 = vld [vmem:[#allocation12 + $0x8] sm:$0xf0] }
 0x4a3   :  { %v5613_v4 = vor.u32 %v6781_v40, %v5612_v43  ;;  %v6793_v43 = vld [vmem:[#allocation11 + $0x314] sm:$0xf0]  ;;  %v6156_v40 = vld [vmem:[#allocation11 + $0x6e8] sm:$0xf] }
 0x4a4   :  { %4615 = vmatpush.bf16.msrb.mxu0 %v6317_v44  ;;  %v6958_v44 = vld [vmem:[#allocation12 + $0x44] sm:$0xf] }
 0x4a6   :  { %3958 = vmatpush.bf16.msra.mxu2 %v5817_v51  ;;  %3971 = vmatpush.bf16.msra.mxu3 %v5945_v31  ;;  %v6955_v51 = vld [vmem:[#allocation12 + $0x24] sm:$0xf0] }
 0x4a7   :  { %v6309_v54 = vor.u32 %v6955_v51, %v6308_v38  ;;  %v5596_v38 = vld [vmem:[#allocation11 + $0x288] sm:$0xf]  ;;  %v6777_v51 = vld [vmem:[#allocation11 + $0x294] sm:$0xf0] }
 0x4a8   :  { %v5597_v14 = vor.u32 %v6777_v51, %v5596_v38 }
 0x4a9   :  { %4616 = vmatpush.bf16.msrb.mxu0 %v6309_v54  ;;  %v6956_v54 = vld [vmem:[#allocation12 + $0x34] sm:$0xf] }
 0x4aa   :  { %3959 = vmatpush.bf16.msra.mxu2 %v5801_v37  ;;  %3972 = vmatpush.bf16.msra.mxu3 %v5929_v57  ;;  %v6300_v37 = vld [vmem:[#allocation12 + $0x10] sm:$0xf]  ;;  %v6953_v57 = vld [vmem:[#allocation12 + $0x14] sm:$0xf0] }
 0x4ab   :  { %v6301_v60 = vor.u32 %v6953_v57, %v6300_v37  ;;  %v5580_v37 = vld [vmem:[#allocation11 + $0x268] sm:$0xf] }
 0x4ad   :  { %4617 = vmatpush.bf16.msrb.mxu0 %v6301_v60  ;;  %v6805_v60 = vld [vmem:[#allocation11 + $0x374] sm:$0xf0] }
 0x4ae   :  { %3960 = vmatpush.bf16.msra.mxu2 %v5785_v62  ;;  %3973 = vmatpush.bf16.msra.mxu3 %v5913_v0  ;;  %v6951_v62 = vld [vmem:[#allocation12 + $0x4] sm:$0xf0]  ;;  %v6057_v0 = vor.u32 %v6890_v22, %v6054_v61  ;;  %v6321_v61 = vor.u32 %v6956_v54, %v6318_v16  ;;  %v6913_v16 = vld [vmem:[#allocation11 + $0x6d4] sm:$0xf0] }
 0x4af   :  { %v5708_v22 = vld [vmem:[#allocation11 + $0x368] sm:$0xf] }
 0x4b1   :  { %3961 = vmatmul.bf16.vlgmr.msra.gmra.mxu2 %v7870_v41  ;;  %3974 = vmatmul.bf16.vlgmr.msra.gmra.mxu3 %v7872_v42  ;;  %v6105_v41 = vor.u32 %v6902_v25, %v6102_v30  ;;  %v6898_v42 = vld [vmem:[#allocation11 + $0x664] sm:$0xf]  ;;  %v6345_v25 = vor.u32 %v6962_v18, %v6342_v3  ;;  %v6334_v30 = vld [vmem:[#allocation12 + $0x58] sm:$0xf0]  ;;  %v6797_v18 = vld [vmem:[#allocation11 + $0x334] sm:$0xf0] }
 0x4b2   :  { %3979 = vmatpush.bf16.msrb.mxu2 %v6153_v59  ;;  %3992 = vmatpush.bf16.msrb.mxu3 %v6281_v2  ;;  %v6089_v31 = vor.u32 %v6898_v42, %v6086_v7  ;;  %v6293_v59 = vor.u32 %v6951_v62, %v6292_v45  ;;  %v6964_v2 = vld [vmem:[#allocation12 + $0x74] sm:$0xf]  ;;  %v6337_v42 = vor.u32 %v6960_v28, %v6334_v30  ;;  %v6326_v7 = vld [vmem:[#allocation12 + $0x48] sm:$0xf0]  ;;  %v5564_v62 = vld [vmem:[#allocation11 + $0x248] sm:$0xf] }
 0x4b3   :  { %v6353_v19 = vor.u32 %v6964_v2, %v6350_v6  ;;  %v6329_v52 = vor.u32 %v6958_v44, %v6326_v7  ;;  %v5709_v45 = vor.u32 %v6805_v60, %v5708_v22  ;;  %v6801_v2 = vld [vmem:[#allocation11 + $0x354] sm:$0xf0]  ;;  %v6313_v6 = vor.u32 %v6954_v21, %v6310_v53  ;;  %v6124_v21 = vld [vmem:[#allocation11 + $0x6a8] sm:$0xf] }
 0x4b4   :  { %4618 = vmatpush.bf16.msrb.mxu0 %v6293_v59  ;;  %v5692_v59 = vld [vmem:[#allocation11 + $0x348] sm:$0xf]  ;;  %v6761_v28 = vld [vmem:[#allocation11 + $0x214] sm:$0xf0] }
 0x4b5   :  { %v6949_v44 = vld [vmem:[#allocation11 + $0x7f4] sm:$0xf0] }
 0x4b6   :  { %3980 = vmatpush.bf16.msrb.mxu2 %v6137_v15  ;;  %3993 = vmatpush.bf16.msrb.mxu3 %v6265_v29  ;;  %v6821_v15 = vld [vmem:[#allocation11 + $0x3f4] sm:$0xf0]  ;;  %v6041_v29 = vor.u32 %v6886_v13, %v6038_v1 }
 0x4b7   :  { %v5773_v46 = vor.u32 %v6821_v15, %v5772_v8  ;;  %v6769_v1 = vld [vmem:[#allocation11 + $0x254] sm:$0xf0] }
 0x4b8   :  { %4663 = vmatpush.bf16.msra.mxu0 %v6353_v19  ;;  %v5565_v24 = vor.u32 %v6769_v1, %v5564_v62  ;;  %v5693_v19 = vor.u32 %v6801_v2, %v5692_v59  ;;  %v6941_v62 = vld [vmem:[#allocation11 + $0x7b4] sm:$0xf0] }
 0x4ba   :  { %3981 = vmatpush.bf16.msrb.mxu2 %v6121_v12  ;;  %3994 = vmatpush.bf16.msrb.mxu3 %v6249_v17  ;;  %v5756_v12 = vld [vmem:[#allocation11 + $0x3c8] sm:$0xf]  ;;  %v6817_v17 = vld [vmem:[#allocation11 + $0x3d4] sm:$0xf0] }
 0x4bb   :  { %v5757_v35 = vor.u32 %v6817_v17, %v5756_v12  ;;  %v7903_v12 = vld [vmem:[%s8005_s8] sm:$0xf] }
 0x4bc   :  { %4664 = vmatpush.bf16.msra.mxu0 %v6345_v25  ;;  %v2512_v17 = vperm.slane %v7903_v12, 3  ;;  %v5532_v25 = vld [vmem:[#allocation11 + $0x208] sm:$0xf] }
 0x4be   :  { %3982 = vmatpush.bf16.msrb.mxu2 %v6105_v41  ;;  %3995 = vmatpush.bf16.msrb.mxu3 %v6233_v56  ;;  %v5740_v41 = vld [vmem:[#allocation11 + $0x3a8] sm:$0xf]  ;;  %v6813_v56 = vld [vmem:[#allocation11 + $0x3b4] sm:$0xf0] }
 0x4bf   :  { %v5741_v5 = vor.u32 %v6813_v56, %v5740_v41  ;;  %v6917_v56 = vld [vmem:[#allocation11 + $0x6f4] sm:$0xf0] }
 0x4c0   :  { %4665 = vmatpush.bf16.msra.mxu0 %v6337_v42  ;;  %v6284_v42 = vld [vmem:[#allocation11 + $0x7e8] sm:$0xf] }
 0x4c2   :  { %3983 = vmatpush.bf16.msrb.mxu2 %v6089_v31  ;;  %3996 = vmatpush.bf16.msrb.mxu3 %v6217_v9  ;;  %v5724_v31 = vld [vmem:[#allocation11 + $0x388] sm:$0xf]  ;;  %v6809_v9 = vld [vmem:[#allocation11 + $0x394] sm:$0xf0] }
 0x4c3   :  { %v5725_v26 = vor.u32 %v6809_v9, %v5724_v31  ;;  %v6157_v31 = vor.u32 %v6917_v56, %v6156_v40  ;;  %v6285_v9 = vor.u32 %v6949_v44, %v6284_v42  ;;  %v6060_v44 = vld [vmem:[#allocation11 + $0x628] sm:$0xf] }
 0x4c4   :  { %4666 = vmatpush.bf16.msra.mxu0 %v6329_v52  ;;  %v6140_v52 = vld [vmem:[#allocation11 + $0x6c8] sm:$0xf] }
 0x4c5   :  { %v6141_v60 = vor.u32 %v6913_v16, %v6140_v52  ;;  %v6889_v16 = vld [vmem:[#allocation11 + $0x614] sm:$0xf0] }
 0x4c6   :  { %3984 = vmatpush.bf16.msrb.mxu2 %v6073_v32  ;;  %3997 = vmatpush.bf16.msrb.mxu3 %v6201_v48  ;;  %v6773_v48 = vld [vmem:[#allocation11 + $0x274] sm:$0xf0] }
 0x4c7   :  { %v5581_v13 = vor.u32 %v6773_v48, %v5580_v37 }
 0x4c8   :  { %4667 = vmatpush.bf16.msra.mxu0 %v6321_v61 }
 0x4ca   :  { %3985 = vmatpush.bf16.msrb.mxu2 %v6057_v0  ;;  %3998 = vmatpush.bf16.msrb.mxu3 %v6185_v58 }
 0x4cc   :  { %4668 = vmatpush.bf16.msra.mxu0 %v6313_v6  ;;  %v6108_v6 = vld [vmem:[#allocation11 + $0x688] sm:$0xf] }
 0x4ce   :  { %3986 = vmatpush.bf16.msrb.mxu2 %v6041_v29  ;;  %3999 = vmatpush.bf16.msrb.mxu3 %v6169_v23  ;;  %v6765_v29 = vld [vmem:[#allocation11 + $0x234] sm:$0xf0]  ;;  %v5676_v23 = vld [vmem:[#allocation11 + $0x328] sm:$0xf] }
 0x4cf   :  { %v5549_v3 = vor.u32 %v6765_v29, %v5548_v10  ;;  %v5677_v63 = vor.u32 %v6797_v18, %v5676_v23  ;;  %v6092_v18 = vld [vmem:[#allocation11 + $0x668] sm:$0xf] }
 0x4d0   :  { %v7896_v57 = vpop.f32.mrf.mxu0  ;;  %v7898_v32 = vpop.f32.mrf.mxu1 }
 0x4d1   :  { %3987 = vmatmul.bf16.vlgmr.msrb.gmra.mxu2 %v7878_v39  ;;  %4000 = vmatmul.bf16.vlgmr.msrb.gmra.mxu3 %v7880_v49 }
 0x4d2   :  { %4031 = vmatpush.bf16.msra.mxu2 %v5645_v55  ;;  %4044 = vmatpush.bf16.msra.mxu3 %v5773_v46  ;;  %v6305_v55 = vor.u32 %v6952_v50, %v6302_v36  ;;  %v6950_v46 = vld [vmem:[#allocation12 + $0x4] sm:$0xf]  ;;  %v6905_v50 = vld [vmem:[#allocation11 + $0x694] sm:$0xf0] }
 0x4d3   :  { %v6297_v41 = vor.u32 %v6950_v46, %v6294_v33  ;;  %v6109_v29 = vor.u32 %v6905_v50, %v6108_v6  ;;  %v6220_v46 = vld [vmem:[#allocation11 + $0x768] sm:$0xf]  ;;  %v6933_v33 = vld [vmem:[#allocation11 + $0x774] sm:$0xf0]  ;;  %v6779_v50 = vld [vmem:[#allocation11 + $0x2ac] sm:$0xf] }
 0x4d4   :  { %v3858_v0 = vpop.f32.mrf.mxu2  ;;  %v3871_v58 = vpop.f32.mrf.mxu3  ;;  %4669 = vmatpush.bf16.msra.mxu0 %v6305_v55  ;;  %v6901_v55 = vld [vmem:[#allocation11 + $0x674] sm:$0xf0] }
 0x4d5   :  { %v3859_v7 = vadd.f32 %v3858_v0, %v7820_v20 }
 0x4d6   :  { %4032 = vmatpush.bf16.msra.mxu2 %v5629_v27  ;;  %4045 = vmatpush.bf16.msra.mxu3 %v5757_v35  ;;  %v5660_v35 = vld [vmem:[#allocation11 + $0x308] sm:$0xf] }
 0x4d7   :  { %v3872_v37 = vadd.f32 %v3871_v58, %v3859_v7 }
 0x4d8   :  { %v4068_v8 = vpop.f32.mrf.mxu0  ;;  %v4081_v15 = vpop.f32.mrf.mxu1  ;;  %4670 = vmatpush.bf16.msra.mxu0 %v6297_v41 }
 0x4da   :  { %4033 = vmatpush.bf16.msra.mxu2 %v5613_v4  ;;  %4046 = vmatpush.bf16.msra.mxu3 %v5741_v5  ;;  %v5533_v4 = vor.u32 %v6761_v28, %v5532_v25  ;;  %v5661_v5 = vor.u32 %v6793_v43, %v5660_v35  ;;  %v6221_v25 = vor.u32 %v6933_v33, %v6220_v46  ;;  %v2510_v28 = vperm.slane %v7903_v12, 1  ;;  %v6204_v35 = vld [vmem:[#allocation11 + $0x748] sm:$0xf]  ;;  %v6929_v43 = vld [vmem:[#allocation11 + $0x754] sm:$0xf0] }
 0x4db   :  { %v6205_v42 = vor.u32 %v6929_v43, %v6204_v35  ;;  %v6981_v46 = vld [vmem:[#allocation12 + $0xf4] sm:$0xf0]  ;;  %v5710_v35 = vld [vmem:[#allocation11 + $0x378] sm:$0xf0]  ;;  %v6404_v43 = vld [vmem:[#allocation12 + $0xe0] sm:$0xf] }
 0x4dc   :  { %v3860_v30 = vpop.f32.mrf.mxu2  ;;  %v3873_v27 = vpop.f32.mrf.mxu3 }
 0x4dd   :  { %v6076_v30 = vld [vmem:[#allocation11 + $0x648] sm:$0xf]  ;;  %v6897_v27 = vld [vmem:[#allocation11 + $0x654] sm:$0xf0] }
 0x4de   :  { %4034 = vmatpush.bf16.msra.mxu2 %v5597_v14  ;;  %4047 = vmatpush.bf16.msra.mxu3 %v5725_v26  ;;  %v6268_v14 = vld [vmem:[#allocation11 + $0x7c8] sm:$0xf]  ;;  %v6945_v26 = vld [vmem:[#allocation11 + $0x7d4] sm:$0xf0]  ;;  %v6077_v56 = vor.u32 %v6897_v27, %v6076_v30  ;;  %v5582_v30 = vld [vmem:[#allocation11 + $0x278] sm:$0xf0] }
 0x4df   :  { %v6269_v61 = vor.u32 %v6945_v26, %v6268_v14  ;;  %v6172_v14 = vld [vmem:[#allocation11 + $0x708] sm:$0xf]  ;;  %v6921_v26 = vld [vmem:[#allocation11 + $0x714] sm:$0xf0]  ;;  %v6803_v27 = vld [vmem:[#allocation11 + $0x36c] sm:$0xf] }
 0x4e0   :  { %v4118_v38 = vpop.f32.mrf.mxu0  ;;  %v4131_v51 = vpop.f32.mrf.mxu1 }
 0x4e1   :  { %v4119_v54 = vadd.f32 %v4118_v38, %v2512_v17  ;;  %v6093_v17 = vor.u32 %v6901_v55, %v6092_v18  ;;  %v6925_v38 = vld [vmem:[#allocation11 + $0x734] sm:$0xf0]  ;;  %v5726_v18 = vld [vmem:[#allocation11 + $0x398] sm:$0xf0]  ;;  %v6412_v55 = vld [vmem:[#allocation12 + $0xf0] sm:$0xf] }
 0x4e2   :  { %4035 = vmatpush.bf16.msra.mxu2 %v5581_v13  ;;  %4048 = vmatpush.bf16.msra.mxu3 %v5709_v45  ;;  %v6909_v13 = vld [vmem:[#allocation11 + $0x6b4] sm:$0xf0]  ;;  %v6252_v45 = vld [vmem:[#allocation11 + $0x7a8] sm:$0xf]  ;;  %v6413_v33 = vor.u32 %v6981_v46, %v6412_v55  ;;  %v6142_v46 = vld [vmem:[#allocation11 + $0x6d8] sm:$0xf0] }
 0x4e3   :  { %v7907_v48 = vadd.f32 %v4131_v51, %v4119_v54  ;;  %v6125_v59 = vor.u32 %v6909_v13, %v6124_v21  ;;  %v6253_v2 = vor.u32 %v6941_v62, %v6252_v45  ;;  %v6044_v54 = vld [vmem:[#allocation11 + $0x608] sm:$0xf]  ;;  %v6173_v13 = vor.u32 %v6921_v26, %v6172_v14  ;;  %v6795_v14 = vld [vmem:[#allocation11 + $0x32c] sm:$0xf] }
 0x4e4   :  { %v3884_v20 = vpop.f32.mrf.mxu2  ;;  %v3897_v22 = vpop.f32.mrf.mxu3  ;;  %4624 = vmatpush.bf16.msrb.mxu1 %v6413_v33  ;;  %v6971_v55 = vld [vmem:[#allocation12 + $0xa4] sm:$0xf0]  ;;  %v6943_v33 = vld [vmem:[#allocation11 + $0x7cc] sm:$0xf] }
 0x4e5   :  { %v3885_v53 = vadd.f32 %v3884_v20, %v3872_v37  ;;  %v6787_v37 = vld [vmem:[#allocation11 + $0x2ec] sm:$0xf]  ;;  %v5646_v20 = vld [vmem:[#allocation11 + $0x2f8] sm:$0xf0] }
 0x4e6   :  { %4036 = vmatpush.bf16.msra.mxu2 %v5565_v24  ;;  %4049 = vmatpush.bf16.msra.mxu3 %v5693_v19  ;;  %v6236_v24 = vld [vmem:[#allocation11 + $0x788] sm:$0xf]  ;;  %v6937_v19 = vld [vmem:[#allocation11 + $0x794] sm:$0xf0]  ;;  %v5649_v45 = vor.u32 %v6787_v37, %v5646_v20  ;;  %v5678_v20 = vld [vmem:[#allocation11 + $0x338] sm:$0xf0] }
 0x4e7   :  { %v3898_v0 = vadd.f32 %v3897_v22, %v3885_v53  ;;  %v6237_v23 = vor.u32 %v6937_v19, %v6236_v24  ;;  %v6819_v22 = vld [vmem:[#allocation11 + $0x3ec] sm:$0xf]  ;;  %v6045_v53 = vor.u32 %v6889_v16, %v6044_v54  ;;  %v5742_v19 = vld [vmem:[#allocation11 + $0x3b8] sm:$0xf0] }
 0x4e8   :  { %v4120_v58 = vpop.f32.mrf.mxu0  ;;  %v4133_v1 = vpop.f32.mrf.mxu1  ;;  %v6811_v24 = vld [vmem:[#allocation11 + $0x3ac] sm:$0xf]  ;;  %v5550_v16 = vld [vmem:[#allocation11 + $0x238] sm:$0xf0] }
 0x4e9   :  { %v4213_v36 = vmax.f32 %v3898_v0, 0.0  ;;  %v6783_v0 = vld [vmem:[#allocation11 + $0x2cc] sm:$0xf]  ;;  %v5630_v58 = vld [vmem:[#allocation11 + $0x2d8] sm:$0xf0] }
 0x4ea   :  { %4037 = vmatpush.bf16.msra.mxu2 %v5549_v3  ;;  %4050 = vmatpush.bf16.msra.mxu3 %v5677_v63  ;;  %v6815_v1 = vld [vmem:[#allocation11 + $0x3cc] sm:$0xf] }
 0x4eb   :  { %v4217_v10 = vpack.c.bf16 %v4213_v36, %v4213_v36  ;;  %v5614_v36 = vld [vmem:[#allocation11 + $0x2b8] sm:$0xf0]  ;;  %v6763_v54 = vld [vmem:[#allocation11 + $0x22c] sm:$0xf] }
 0x4ec   :  { %v3886_v8 = vpop.f32.mrf.mxu2  ;;  %v3899_v15 = vpop.f32.mrf.mxu3 }
 0x4ed   :  { %4619 = vmatmul.bf16.vlgmr.msrb.gmra.mxu0 %v4217_v10  ;;  %v5745_v8 = vor.u32 %v6811_v24, %v5742_v19  ;;  %v6775_v15 = vld [vmem:[#allocation11 + $0x28c] sm:$0xf] }
 0x4ee   :  { %4038 = vmatpush.bf16.msra.mxu2 %v5533_v4  ;;  %4051 = vmatpush.bf16.msra.mxu3 %v5661_v5  ;;  %v6893_v4 = vld [vmem:[#allocation11 + $0x634] sm:$0xf0]  ;;  %v6188_v5 = vld [vmem:[#allocation11 + $0x728] sm:$0xf] }
 0x4ef   :  { %v6189_v52 = vor.u32 %v6925_v38, %v6188_v5  ;;  %v5694_v5 = vld [vmem:[#allocation11 + $0x358] sm:$0xf0]  ;;  %v6396_v38 = vld [vmem:[#allocation12 + $0xd0] sm:$0xf] }
 0x4f0   :  { %v7911_v3 = vpop.f32.mrf.mxu0  ;;  %v7913_v63 = vpop.f32.mrf.mxu1 }
 0x4f1   :  { %4039 = vmatmul.bf16.vlgmr.msra.gmra.mxu2 %v7782_v34  ;;  %4052 = vmatmul.bf16.vlgmr.msra.gmra.mxu3 %v7784_v11 }
 0x4f2   :  { %4083 = vmatpush.bf16.msrb.mxu2 %v6157_v31  ;;  %4096 = vmatpush.bf16.msrb.mxu3 %v6285_v9  ;;  %v6061_v9 = vor.u32 %v6893_v4, %v6060_v44  ;;  %v6767_v44 = vld [vmem:[#allocation11 + $0x24c] sm:$0xf] }
 0x4f3   :  { %v6799_v4 = vld [vmem:[#allocation11 + $0x34c] sm:$0xf] }
 0x4f4   :  { %v3910_v40 = vpop.f32.mrf.mxu2  ;;  %v3923_v41 = vpop.f32.mrf.mxu3 }
 0x4f5   :  { %v3911_v7 = vadd.f32 %v3910_v40, %v2510_v28  ;;  %v6771_v28 = vld [vmem:[#allocation11 + $0x26c] sm:$0xf]  ;;  %v6979_v40 = vld [vmem:[#allocation12 + $0xe4] sm:$0xf0] }
 0x4f6   :  { %4084 = vmatpush.bf16.msrb.mxu2 %v6141_v60  ;;  %4097 = vmatpush.bf16.msrb.mxu3 %v6269_v61  ;;  %v5774_v60 = vld [vmem:[#allocation11 + $0x3f8] sm:$0xf0] }
 0x4f7   :  { %v7916_v51 = vadd.f32 %v3923_v41, %v3911_v7  ;;  %v5777_v62 = vor.u32 %v6819_v22, %v5774_v60  ;;  %v6405_v41 = vor.u32 %v6979_v40, %v6404_v43  ;;  %v5566_v7 = vld [vmem:[#allocation11 + $0x258] sm:$0xf0]  ;;  %v6388_v22 = vld [vmem:[#allocation12 + $0xc0] sm:$0xf]  ;;  %v6975_v60 = vld [vmem:[#allocation12 + $0xc4] sm:$0xf0] }
 0x4f8   :  { %v4172_v12 = vpop.f32.mrf.mxu0  ;;  %v4185_v31 = vpop.f32.mrf.mxu1  ;;  %v6907_v43 = vld [vmem:[#allocation11 + $0x6ac] sm:$0xf]  ;;  %v6126_v40 = vld [vmem:[#allocation11 + $0x6b8] sm:$0xf0] }
 0x4f9   :  { %4625 = vmatpush.bf16.msrb.mxu1 %v6405_v41  ;;  %v6977_v12 = vld [vmem:[#allocation12 + $0xd4] sm:$0xf0]  ;;  %v6939_v41 = vld [vmem:[#allocation11 + $0x7ac] sm:$0xf] }
 0x4fa   :  { %4085 = vmatpush.bf16.msrb.mxu2 %v6125_v59  ;;  %4098 = vmatpush.bf16.msrb.mxu3 %v6253_v2  ;;  %v5758_v59 = vld [vmem:[#allocation11 + $0x3d8] sm:$0xf0]  ;;  %v5633_v2 = vor.u32 %v6783_v0, %v5630_v58  ;;  %v6397_v31 = vor.u32 %v6977_v12, %v6396_v38  ;;  %v6915_v58 = vld [vmem:[#allocation11 + $0x6ec] sm:$0xf]  ;;  %v6129_v38 = vor.u32 %v6907_v43, %v6126_v40 }
 0x4fb   :  { %v5761_v6 = vor.u32 %v6815_v1, %v5758_v59  ;;  %v5662_v0 = vld [vmem:[#allocation11 + $0x318] sm:$0xf0]  ;;  %v6380_v1 = vld [vmem:[#allocation12 + $0xb0] sm:$0xf]  ;;  %v6973_v59 = vld [vmem:[#allocation12 + $0xb4] sm:$0xf0] }
 0x4fc   :  { %v3912_v61 = vpop.f32.mrf.mxu2  ;;  %v3925_v21 = vpop.f32.mrf.mxu3  ;;  %v6382_v43 = vld [vmem:[#allocation12 + $0xb8] sm:$0xf0] }
 0x4fd   :  { %4671 = vmatmul.bf16.vlgmr.msra.gmra.mxu0 %v4217_v10  ;;  %v5617_v10 = vor.u32 %v6779_v50, %v5614_v36  ;;  %4626 = vmatpush.bf16.msrb.mxu1 %v6397_v31  ;;  %v6389_v61 = vor.u32 %v6975_v60, %v6388_v22  ;;  %v6759_v21 = vld [vmem:[#allocation11 + $0x20c] sm:$0xf]  ;;  %v6286_v50 = vld [vmem:[#allocation11 + $0x7f8] sm:$0xf0]  ;;  %v6381_v36 = vor.u32 %v6973_v59, %v6380_v1 }
 0x4fe   :  { %4086 = vmatpush.bf16.msrb.mxu2 %v6109_v29  ;;  %4099 = vmatpush.bf16.msrb.mxu3 %v6237_v23  ;;  %v5598_v29 = vld [vmem:[#allocation11 + $0x298] sm:$0xf0]  ;;  %v6807_v23 = vld [vmem:[#allocation11 + $0x38c] sm:$0xf] }
 0x4ff   :  { %v6903_v31 = vld [vmem:[#allocation11 + $0x68c] sm:$0xf]  ;;  %v6206_v59 = vld [vmem:[#allocation11 + $0x758] sm:$0xf0] }
 0x500   :  { %v6406_v22 = vld [vmem:[#allocation12 + $0xe8] sm:$0xf0] }
 0x501   :  { %4627 = vmatpush.bf16.msrb.mxu1 %v6389_v61  ;;  %v6899_v60 = vld [vmem:[#allocation11 + $0x66c] sm:$0xf]  ;;  %v6094_v61 = vld [vmem:[#allocation11 + $0x678] sm:$0xf0] }
 0x502   :  { %4087 = vmatpush.bf16.msrb.mxu2 %v6093_v17  ;;  %4100 = vmatpush.bf16.msrb.mxu3 %v6221_v25  ;;  %v5601_v17 = vor.u32 %v6775_v15, %v5598_v29  ;;  %v5729_v25 = vor.u32 %v6807_v23, %v5726_v18  ;;  %v6911_v23 = vld [vmem:[#allocation11 + $0x6cc] sm:$0xf]  ;;  %v6372_v18 = vld [vmem:[#allocation12 + $0xa0] sm:$0xf] }
 0x503   :  { %v6927_v1 = vld [vmem:[#allocation11 + $0x74c] sm:$0xf] }
 0x505   :  { %4628 = vmatpush.bf16.msrb.mxu1 %v6381_v36 }
 0x506   :  { %4088 = vmatpush.bf16.msrb.mxu2 %v6077_v56  ;;  %4101 = vmatpush.bf16.msrb.mxu3 %v6205_v42  ;;  %v5585_v56 = vor.u32 %v6771_v28, %v5582_v30  ;;  %v5713_v42 = vor.u32 %v6803_v27, %v5710_v35  ;;  %v6364_v28 = vld [vmem:[#allocation12 + $0x90] sm:$0xf]  ;;  %v6969_v30 = vld [vmem:[#allocation12 + $0x94] sm:$0xf0]  ;;  %v6145_v27 = vor.u32 %v6911_v23, %v6142_v46  ;;  %v6190_v23 = vld [vmem:[#allocation11 + $0x738] sm:$0xf0] }
 0x50a   :  { %4089 = vmatpush.bf16.msrb.mxu2 %v6061_v9  ;;  %4102 = vmatpush.bf16.msrb.mxu3 %v6189_v52  ;;  %v5569_v9 = vor.u32 %v6767_v44, %v5566_v7  ;;  %v5697_v52 = vor.u32 %v6799_v4, %v5694_v5  ;;  %v6356_v44 = vld [vmem:[#allocation12 + $0x80] sm:$0xf]  ;;  %v6967_v7 = vld [vmem:[#allocation12 + $0x84] sm:$0xf0]  ;;  %v6980_v4 = vld [vmem:[#allocation12 + $0xf4] sm:$0xf] }
 0x50b   :  { %v6414_v5 = vld [vmem:[#allocation12 + $0xf8] sm:$0xf0] }
 0x50e   :  { %4090 = vmatpush.bf16.msrb.mxu2 %v6045_v53  ;;  %4103 = vmatpush.bf16.msrb.mxu3 %v6173_v13  ;;  %v5553_v53 = vor.u32 %v6763_v54, %v5550_v16  ;;  %v5681_v13 = vor.u32 %v6795_v14, %v5678_v20  ;;  %v6238_v54 = vld [vmem:[#allocation11 + $0x798] sm:$0xf0]  ;;  %v6357_v16 = vor.u32 %v6967_v7, %v6356_v44  ;;  %v6978_v20 = vld [vmem:[#allocation12 + $0xe4] sm:$0xf] }
 0x50f   :  { %v6417_v14 = vor.u32 %v6980_v4, %v6414_v5  ;;  %v6476_v5 = vld [vmem:[#allocation12 + $0x170] sm:$0xf] }
 0x511   :  { %4091 = vmatmul.bf16.vlgmr.msrb.gmra.mxu2 %v7878_v39  ;;  %4104 = vmatmul.bf16.vlgmr.msrb.gmra.mxu3 %v7880_v49 }
 0x512   :  { %4135 = vmatpush.bf16.msra.mxu2 %v5649_v45  ;;  %4148 = vmatpush.bf16.msra.mxu3 %v5777_v62  ;;  %v5534_v45 = vld [vmem:[#allocation11 + $0x218] sm:$0xf0]  ;;  %v6791_v62 = vld [vmem:[#allocation11 + $0x30c] sm:$0xf] }
 0x513   :  { %v5537_v24 = vor.u32 %v6759_v21, %v5534_v45  ;;  %v5665_v19 = vor.u32 %v6791_v62, %v5662_v0  ;;  %v6931_v21 = vld [vmem:[#allocation11 + $0x76c] sm:$0xf]  ;;  %v6097_v45 = vor.u32 %v6899_v60, %v6094_v61 }
 0x514   :  { %v7920_v26 = vpop.f32.mrf.mxu2  ;;  %v7922_v37 = vpop.f32.mrf.mxu3  ;;  %v6895_v0 = vld [vmem:[#allocation11 + $0x64c] sm:$0xf] }
 0x516   :  { %4136 = vmatpush.bf16.msra.mxu2 %v5633_v2  ;;  %4149 = vmatpush.bf16.msra.mxu3 %v5761_v6  ;;  %v6158_v2 = vld [vmem:[#allocation11 + $0x6f8] sm:$0xf0]  ;;  %v6947_v6 = vld [vmem:[#allocation11 + $0x7ec] sm:$0xf] }
 0x517   :  { %v6161_v15 = vor.u32 %v6915_v58, %v6158_v2  ;;  %v6289_v29 = vor.u32 %v6947_v6, %v6286_v50  ;;  %v6078_v58 = vld [vmem:[#allocation11 + $0x658] sm:$0xf0]  ;;  %v6976_v2 = vld [vmem:[#allocation12 + $0xd4] sm:$0xf] }
 0x518   :  { %v6398_v6 = vld [vmem:[#allocation12 + $0xd8] sm:$0xf0]  ;;  %v6081_v36 = vor.u32 %v6895_v0, %v6078_v58  ;;  %v6452_v0 = vld [vmem:[#allocation12 + $0x140] sm:$0xf]  ;;  %v6991_v58 = vld [vmem:[#allocation12 + $0x144] sm:$0xf0] }
 0x519   :  { %v6401_v50 = vor.u32 %v6976_v2, %v6398_v6  ;;  %v6989_v2 = vld [vmem:[#allocation12 + $0x134] sm:$0xf0] }
 0x51a   :  { %4137 = vmatpush.bf16.msra.mxu2 %v5617_v10  ;;  %4150 = vmatpush.bf16.msra.mxu3 %v5745_v8 }
 0x51c   :  { %v3938_v10 = vpop.f32.mrf.mxu2  ;;  %v3951_v8 = vpop.f32.mrf.mxu3 }
 0x51d   :  { %v6062_v10 = vld [vmem:[#allocation11 + $0x638] sm:$0xf0]  ;;  %v6923_v8 = vld [vmem:[#allocation11 + $0x72c] sm:$0xf] }
 0x51e   :  { %4138 = vmatpush.bf16.msra.mxu2 %v5601_v17  ;;  %4151 = vmatpush.bf16.msra.mxu3 %v5729_v25  ;;  %v6270_v17 = vld [vmem:[#allocation11 + $0x7d8] sm:$0xf0]  ;;  %v6373_v25 = vor.u32 %v6971_v55, %v6372_v18  ;;  %v6974_v18 = vld [vmem:[#allocation12 + $0xc4] sm:$0xf]  ;;  %v6390_v55 = vld [vmem:[#allocation12 + $0xc8] sm:$0xf0] }
 0x51f   :  { %v6273_v35 = vor.u32 %v6943_v33, %v6270_v17  ;;  %v6393_v46 = vor.u32 %v6974_v18, %v6390_v55  ;;  %v6193_v17 = vor.u32 %v6923_v8, %v6190_v23  ;;  %v6420_v18 = vld [vmem:[#allocation12 + $0x100] sm:$0xf]  ;;  %v6983_v55 = vld [vmem:[#allocation12 + $0x104] sm:$0xf0] }
 0x520   :  { %4629 = vmatpush.bf16.msrb.mxu1 %v6373_v25  ;;  %v6887_v25 = vld [vmem:[#allocation11 + $0x60c] sm:$0xf] }
 0x522   :  { %4139 = vmatpush.bf16.msra.mxu2 %v5585_v56  ;;  %4152 = vmatpush.bf16.msra.mxu3 %v5713_v42  ;;  %v6254_v56 = vld [vmem:[#allocation11 + $0x7b8] sm:$0xf0]  ;;  %v6365_v42 = vor.u32 %v6969_v30, %v6364_v28  ;;  %v6919_v30 = vld [vmem:[#allocation11 + $0x70c] sm:$0xf] }
 0x523   :  { %v6257_v12 = vor.u32 %v6939_v41, %v6254_v56  ;;  %v6046_v28 = vld [vmem:[#allocation11 + $0x618] sm:$0xf0]  ;;  %v6970_v41 = vld [vmem:[#allocation12 + $0xa4] sm:$0xf]  ;;  %v6374_v56 = vld [vmem:[#allocation12 + $0xa8] sm:$0xf0] }
 0x524   :  { %4630 = vmatpush.bf16.msrb.mxu1 %v6365_v42  ;;  %v6049_v42 = vor.u32 %v6887_v25, %v6046_v28  ;;  %v6994_v28 = vld [vmem:[#allocation12 + $0x164] sm:$0xf] }
 0x526   :  { %4140 = vmatpush.bf16.msra.mxu2 %v5569_v9  ;;  %4153 = vmatpush.bf16.msra.mxu3 %v5697_v52  ;;  %v6110_v9 = vld [vmem:[#allocation11 + $0x698] sm:$0xf0]  ;;  %v6935_v52 = vld [vmem:[#allocation11 + $0x78c] sm:$0xf] }
 0x528   :  { %4631 = vmatpush.bf16.msrb.mxu1 %v6357_v16  ;;  %v6966_v16 = vld [vmem:[#allocation12 + $0x84] sm:$0xf] }
 0x52a   :  { %4141 = vmatpush.bf16.msra.mxu2 %v5553_v53  ;;  %4154 = vmatpush.bf16.msra.mxu3 %v5681_v13  ;;  %v6222_v53 = vld [vmem:[#allocation11 + $0x778] sm:$0xf0]  ;;  %v6409_v13 = vor.u32 %v6978_v20, %v6406_v22  ;;  %v3937_v22 = vadd.f32 %v7920_v26, %v7916_v51  ;;  %v6444_v26 = vld [vmem:[#allocation12 + $0x130] sm:$0xf] }
 0x52b   :  { %v6225_v62 = vor.u32 %v6931_v21, %v6222_v53  ;;  %v6460_v53 = vld [vmem:[#allocation12 + $0x150] sm:$0xf] }
 0x52c   :  { %4676 = vmatpush.bf16.msra.mxu1 %v6417_v14  ;;  %v6358_v14 = vld [vmem:[#allocation12 + $0x88] sm:$0xf0]  ;;  %v3950_v60 = vadd.f32 %v7922_v37, %v3937_v22  ;;  %v6445_v37 = vor.u32 %v6989_v2, %v6444_v26  ;;  %v6540_v22 = vld [vmem:[#allocation12 + $0x1f0] sm:$0xf]  ;;  %v7009_v26 = vld [vmem:[#allocation12 + $0x1d4] sm:$0xf0] }
 0x52d   :  { %v6361_v20 = vor.u32 %v6966_v16, %v6358_v14 }
 0x52e   :  { %4142 = vmatpush.bf16.msra.mxu2 %v5537_v24  ;;  %4155 = vmatpush.bf16.msra.mxu3 %v5665_v19  ;;  %v6209_v24 = vor.u32 %v6927_v1, %v6206_v59  ;;  %v6891_v19 = vld [vmem:[#allocation11 + $0x62c] sm:$0xf]  ;;  %v6453_v59 = vor.u32 %v6991_v58, %v6452_v0  ;;  %v7011_v0 = vld [vmem:[#allocation12 + $0x1e4] sm:$0xf0] }
 0x52f   :  { %v6065_v33 = vor.u32 %v6891_v19, %v6062_v10 }
 0x530   :  { %4677 = vmatpush.bf16.msra.mxu1 %v6409_v13  ;;  %v6993_v13 = vld [vmem:[#allocation12 + $0x154] sm:$0xf0] }
 0x531   :  { %4143 = vmatmul.bf16.vlgmr.msra.gmra.mxu2 %v7782_v34  ;;  %4156 = vmatmul.bf16.vlgmr.msra.gmra.mxu3 %v7784_v11  ;;  %v6113_v34 = vor.u32 %v6903_v31, %v6110_v9  ;;  %v6241_v11 = vor.u32 %v6935_v52, %v6238_v54  ;;  %v6968_v9 = vld [vmem:[#allocation12 + $0x94] sm:$0xf]  ;;  %v6366_v52 = vld [vmem:[#allocation12 + $0x98] sm:$0xf0] }
 0x532   :  { %4187 = vmatpush.bf16.msrb.mxu2 %v6161_v15  ;;  %4200 = vmatpush.bf16.msrb.mxu3 %v6289_v29  ;;  %v6369_v54 = vor.u32 %v6968_v9, %v6366_v52  ;;  %v6438_v9 = vld [vmem:[#allocation12 + $0x128] sm:$0xf0] }
 0x534   :  { %v3962_v15 = vpop.f32.mrf.mxu2  ;;  %v3975_v29 = vpop.f32.mrf.mxu3  ;;  %4678 = vmatpush.bf16.msra.mxu1 %v6401_v50  ;;  %v6436_v50 = vld [vmem:[#allocation12 + $0x120] sm:$0xf] }
 0x535   :  { %v3963_v21 = vadd.f32 %v3962_v15, %v3950_v60  ;;  %v6428_v15 = vld [vmem:[#allocation12 + $0x110] sm:$0xf] }
 0x536   :  { %4188 = vmatpush.bf16.msrb.mxu2 %v6145_v27  ;;  %4201 = vmatpush.bf16.msrb.mxu3 %v6273_v35  ;;  %v6174_v27 = vld [vmem:[#allocation11 + $0x718] sm:$0xf0]  ;;  %v6972_v35 = vld [vmem:[#allocation12 + $0xb4] sm:$0xf] }
 0x537   :  { %v6385_v40 = vor.u32 %v6972_v35, %v6382_v43  ;;  %v6177_v44 = vor.u32 %v6919_v30, %v6174_v27  ;;  %v6470_v30 = vld [vmem:[#allocation12 + $0x168] sm:$0xf0]  ;;  %v6992_v35 = vld [vmem:[#allocation12 + $0x154] sm:$0xf]  ;;  %v6462_v43 = vld [vmem:[#allocation12 + $0x158] sm:$0xf0] }
 0x538   :  { %4679 = vmatpush.bf16.msra.mxu1 %v6393_v46  ;;  %v6996_v46 = vld [vmem:[#allocation12 + $0x174] sm:$0xf]  ;;  %v6473_v27 = vor.u32 %v6994_v28, %v6470_v30  ;;  %v6484_v30 = vld [vmem:[#allocation12 + $0x180] sm:$0xf] }
 0x53a   :  { %4189 = vmatpush.bf16.msrb.mxu2 %v6129_v38  ;;  %4202 = vmatpush.bf16.msrb.mxu3 %v6257_v12  ;;  %v6997_v38 = vld [vmem:[#allocation12 + $0x174] sm:$0xf0]  ;;  %v6377_v12 = vor.u32 %v6970_v41, %v6374_v56 }
 0x53b   :  { %v6477_v31 = vor.u32 %v6997_v38, %v6476_v5  ;;  %v6988_v5 = vld [vmem:[#allocation12 + $0x134] sm:$0xf]  ;;  %v6446_v38 = vld [vmem:[#allocation12 + $0x138] sm:$0xf0] }
 0x53c   :  { %v3964_v7 = vpop.f32.mrf.mxu2  ;;  %v3977_v4 = vpop.f32.mrf.mxu3  ;;  %4680 = vmatpush.bf16.msra.mxu1 %v6385_v40  ;;  %v6465_v40 = vor.u32 %v6992_v35, %v6462_v43  ;;  %v7012_v35 = vld [vmem:[#allocation12 + $0x1f4] sm:$0xf]  ;;  %v6542_v43 = vld [vmem:[#allocation12 + $0x1f8] sm:$0xf0] }
 0x53e   :  { %4190 = vmatpush.bf16.msrb.mxu2 %v6113_v34  ;;  %4203 = vmatpush.bf16.msrb.mxu3 %v6241_v11  ;;  %v6468_v34 = vld [vmem:[#allocation12 + $0x160] sm:$0xf]  ;;  %v6995_v11 = vld [vmem:[#allocation12 + $0x164] sm:$0xf0] }
 0x53f   :  { %v6469_v61 = vor.u32 %v6995_v11, %v6468_v34  ;;  %v7013_v34 = vld [vmem:[#allocation12 + $0x1f4] sm:$0xf0] }
 0x540   :  { %4681 = vmatpush.bf16.msra.mxu1 %v6377_v12  ;;  %v6449_v12 = vor.u32 %v6988_v5, %v6446_v38  ;;  %v6541_v60 = vor.u32 %v7013_v34, %v6540_v22  ;;  %v6526_v5 = vld [vmem:[#allocation12 + $0x1d8] sm:$0xf0]  ;;  %v7002_v22 = vld [vmem:[#allocation12 + $0x1a4] sm:$0xf]  ;;  %v6502_v34 = vld [vmem:[#allocation12 + $0x1a8] sm:$0xf0] }
 0x542   :  { %4191 = vmatpush.bf16.msrb.mxu2 %v6097_v45  ;;  %4204 = vmatpush.bf16.msrb.mxu3 %v6225_v62  ;;  %v3976_v45 = vadd.f32 %v3975_v29, %v3963_v21  ;;  %v6985_v29 = vld [vmem:[#allocation12 + $0x114] sm:$0xf0]  ;;  %v6982_v21 = vld [vmem:[#allocation12 + $0x104] sm:$0xf] }
 0x543   :  { %v6429_v23 = vor.u32 %v6985_v29, %v6428_v15  ;;  %v7005_v15 = vld [vmem:[#allocation12 + $0x1b4] sm:$0xf0] }
 0x544   :  { %4682 = vmatpush.bf16.msra.mxu1 %v6369_v54  ;;  %v6984_v54 = vld [vmem:[#allocation12 + $0x114] sm:$0xf] }
 0x546   :  { %4192 = vmatpush.bf16.msrb.mxu2 %v6081_v36  ;;  %4205 = vmatpush.bf16.msrb.mxu3 %v6209_v24  ;;  %v6987_v36 = vld [vmem:[#allocation12 + $0x124] sm:$0xf0] }
 0x547   :  { %v6437_v19 = vor.u32 %v6987_v36, %v6436_v50  ;;  %v7007_v36 = vld [vmem:[#allocation12 + $0x1c4] sm:$0xf0] }
 0x548   :  { %4683 = vmatpush.bf16.msra.mxu1 %v6361_v20  ;;  %v6430_v20 = vld [vmem:[#allocation12 + $0x118] sm:$0xf0] }
 0x54a   :  { %4193 = vmatpush.bf16.msrb.mxu2 %v6065_v33  ;;  %4206 = vmatpush.bf16.msrb.mxu3 %v6193_v17  ;;  %v6421_v33 = vor.u32 %v6983_v55, %v6420_v18  ;;  %v6478_v17 = vld [vmem:[#allocation12 + $0x178] sm:$0xf0]  ;;  %v7003_v18 = vld [vmem:[#allocation12 + $0x1a4] sm:$0xf0] }
 0x54b   :  { %v6481_v25 = vor.u32 %v6996_v46, %v6478_v17  ;;  %v6492_v17 = vld [vmem:[#allocation12 + $0x190] sm:$0xf] }
 0x54e   :  { %4194 = vmatpush.bf16.msrb.mxu2 %v6049_v42  ;;  %4207 = vmatpush.bf16.msrb.mxu3 %v6177_v44  ;;  %v6990_v42 = vld [vmem:[#allocation12 + $0x144] sm:$0xf]  ;;  %v6454_v44 = vld [vmem:[#allocation12 + $0x148] sm:$0xf0] }
 0x54f   :  { %v6457_v4 = vor.u32 %v6990_v42, %v6454_v44  ;;  %v6534_v42 = vld [vmem:[#allocation12 + $0x1e8] sm:$0xf0] }
 0x551   :  { %4195 = vmatmul.bf16.vlgmr.msrb.gmra.mxu2 %v7878_v39  ;;  %4208 = vmatmul.bf16.vlgmr.msrb.gmra.mxu3 %v7880_v49  ;;  %v6461_v39 = vor.u32 %v6993_v13, %v6460_v53  ;;  %v6422_v53 = vld [vmem:[#allocation12 + $0x108] sm:$0xf0] }
 0x552   :  { %4637 = vmatpush.bf16.msra.mxu2 %v6477_v31  ;;  %v6986_v31 = vld [vmem:[#allocation12 + $0x124] sm:$0xf]  ;;  %4650 = vmatpush.bf16.msra.mxu3 %v6541_v60  ;;  %v6425_v13 = vor.u32 %v6982_v21, %v6422_v53  ;;  %v7000_v21 = vld [vmem:[#allocation12 + $0x194] sm:$0xf]  ;;  %v6494_v53 = vld [vmem:[#allocation12 + $0x198] sm:$0xf0] }
 0x553   :  { %v6441_v52 = vor.u32 %v6986_v31, %v6438_v9  ;;  %v7006_v9 = vld [vmem:[#allocation12 + $0x1c4] sm:$0xf] }
 0x554   :  { %v3988_v49 = vpop.f32.mrf.mxu2  ;;  %v4001_v62 = vpop.f32.mrf.mxu3 }
 0x555   :  { %v3989_v1 = vadd.f32 %v3988_v49, %v3976_v45 }
 0x556   :  { %4638 = vmatpush.bf16.msra.mxu2 %v6469_v61  ;;  %v6433_v61 = vor.u32 %v6984_v54, %v6430_v20 }
 0x557   :  { %v4002_v51 = vadd.f32 %v4001_v62, %v3989_v1  ;;  %v6532_v62 = vld [vmem:[#allocation12 + $0x1e0] sm:$0xf] }
 0x558   :  { %v6533_v58 = vor.u32 %v7011_v0, %v6532_v62  ;;  %v6486_v62 = vld [vmem:[#allocation12 + $0x188] sm:$0xf0] }
 0x559   :  { %v4214_v6 = vmax.f32 %v4002_v51, 0.0  ;;  %v6524_v51 = vld [vmem:[#allocation12 + $0x1d0] sm:$0xf] }
 0x55a   :  { %4639 = vmatpush.bf16.msra.mxu2 %v6461_v39  ;;  %4651 = vmatpush.bf16.msra.mxu3 %v6533_v58  ;;  %v6525_v2 = vor.u32 %v7009_v26, %v6524_v51 }
 0x55b   :  { %v4218_v24 = vpack.c.bf16 %v4214_v6, %v4214_v6 }
 0x55c   :  { %v3990_v10 = vpop.f32.mrf.mxu2  ;;  %v4003_v8 = vpop.f32.mrf.mxu3 }
 0x55d   :  { %4632 = vmatmul.bf16.vlgmr.msrb.gmra.mxu1 %v4218_v24  ;;  %v6508_v8 = vld [vmem:[#allocation12 + $0x1b0] sm:$0xf] }
 0x55e   :  { %4640 = vmatpush.bf16.msra.mxu2 %v6453_v59  ;;  %4652 = vmatpush.bf16.msra.mxu3 %v6525_v2 }
 0x562   :  { %4641 = vmatpush.bf16.msra.mxu2 %v6445_v37 }
 0x566   :  { %4642 = vmatpush.bf16.msra.mxu2 %v6437_v19 }
 0x56a   :  { %4643 = vmatpush.bf16.msra.mxu2 %v6429_v23  ;;  %v7931_v7 = vpop.f32.mrf.mxu0  ;;  %v6500_v23 = vld [vmem:[#allocation12 + $0x1a0] sm:$0xf] }
 0x56b   :  { %v6501_v46 = vor.u32 %v7003_v18, %v6500_v23  ;;  %v7021_v18 = vld [vmem:[%s8008_s11 + $0x38] sm:$0xff] }
 0x56c   :  { %4851 = vmatpush.bf16.msrb.mxu0 %v7021_v18 }
 0x56d   :  { %4684 = vmatmul.bf16.vlgmr.msra.gmra.mxu1 %v4218_v24 }
 0x56e   :  { %4644 = vmatpush.bf16.msra.mxu2 %v6421_v33 }
 0x572   :  { %4689 = vmatpush.bf16.msrb.mxu2 %v6481_v25  ;;  %v4622_v11 = vpop.f32.mrf.mxu0  ;;  %v7001_v25 = vld [vmem:[#allocation12 + $0x194] sm:$0xf0] }
 0x573   :  { %v6493_v28 = vor.u32 %v7001_v25, %v6492_v17  ;;  %v6505_v11 = vor.u32 %v7002_v22, %v6502_v34  ;;  %v7017_v17 = vld [vmem:[%s8008_s11 + $0x18] sm:$0xff] }
 0x574   :  { %v4040_v41 = vpop.f32.mrf.mxu2  ;;  %v4053_v56 = vpop.f32.mrf.mxu3 }
 0x575   :  { %v4041_v39 = vadd.f32 %v4040_v41, %v7854_v47  ;;  %v6516_v47 = vld [vmem:[#allocation12 + $0x1c0] sm:$0xf]  ;;  %v6545_v41 = vor.u32 %v7012_v35, %v6542_v43 }
 0x576   :  { %4690 = vmatpush.bf16.msrb.mxu2 %v6473_v27  ;;  %v6517_v19 = vor.u32 %v7007_v36, %v6516_v47  ;;  %v6999_v27 = vld [vmem:[#allocation12 + $0x184] sm:$0xf0]  ;;  %v7015_v35 = vld [vmem:[%s8008_s11 + $0x8] sm:$0xff] }
 0x577   :  { %v4054_v49 = vadd.f32 %v4053_v56, %v4041_v39  ;;  %v7010_v56 = vld [vmem:[#allocation12 + $0x1e4] sm:$0xf]  ;;  %v7027_v43 = vld [vmem:[%s8008_s11 + $0x68] sm:$0xff] }
 0x578   :  { %4653 = vmatpush.bf16.msra.mxu3 %v6517_v19  ;;  %v6537_v44 = vor.u32 %v7010_v56, %v6534_v42  ;;  %v7025_v56 = vld [vmem:[%s8008_s11 + $0x58] sm:$0xff]  ;;  %v7024_v42 = vld [vmem:[%s8008_s11 + $0x50] sm:$0xff] }
 0x579   :  { %v4067_v1 = vadd.f32 %v7896_v57, %v4054_v49  ;;  %v6509_v57 = vor.u32 %v7005_v15, %v6508_v8  ;;  %v6998_v49 = vld [vmem:[#allocation12 + $0x184] sm:$0xf] }
 0x57a   :  { %4691 = vmatpush.bf16.msrb.mxu2 %v6465_v40  ;;  %v7934_v45 = vpop.f32.mrf.mxu0  ;;  %v6485_v40 = vor.u32 %v6999_v27, %v6484_v30  ;;  %v6489_v0 = vor.u32 %v6998_v49, %v6486_v62 }
 0x57b   :  { %v4080_v6 = vadd.f32 %v7898_v32, %v4067_v1 }
 0x57c   :  { %v4042_v16 = vpop.f32.mrf.mxu2  ;;  %v4055_v14 = vpop.f32.mrf.mxu3  ;;  %4654 = vmatpush.bf16.msra.mxu3 %v6509_v57 }
 0x57d   :  { %v7004_v16 = vld [vmem:[#allocation12 + $0x1b4] sm:$0xf]  ;;  %v6510_v14 = vld [vmem:[#allocation12 + $0x1b8] sm:$0xf0] }
 0x57e   :  { %4692 = vmatpush.bf16.msrb.mxu2 %v6457_v4  ;;  %v7008_v4 = vld [vmem:[#allocation12 + $0x1d4] sm:$0xf]  ;;  %v6513_v20 = vor.u32 %v7004_v16, %v6510_v14 }
 0x57f   :  { %v6529_v38 = vor.u32 %v7008_v4, %v6526_v5  ;;  %v7022_v4 = vld [vmem:[%s8008_s11 + $0x40] sm:$0xff] }
 0x580   :  { %4655 = vmatpush.bf16.msra.mxu3 %v6501_v46  ;;  %v7019_v46 = vld [vmem:[%s8008_s11 + $0x28] sm:$0xff] }
 0x582   :  { %4693 = vmatpush.bf16.msrb.mxu2 %v6449_v12  ;;  %v4674_v59 = vpop.f32.mrf.mxu0 }
 0x584   :  { %4656 = vmatpush.bf16.msra.mxu3 %v6493_v28  ;;  %v7016_v28 = vld [vmem:[%s8008_s11 + $0x10] sm:$0xff] }
 0x586   :  { %4694 = vmatpush.bf16.msrb.mxu2 %v6441_v52  ;;  %v6518_v52 = vld [vmem:[#allocation12 + $0x1c8] sm:$0xf0] }
 0x587   :  { %v6521_v54 = vor.u32 %v7006_v9, %v6518_v52 }
 0x588   :  { %4657 = vmatpush.bf16.msra.mxu3 %v6485_v40  ;;  %v7014_v40 = vld [vmem:[%s8008_s11] sm:$0xff] }
 0x58a   :  { %4695 = vmatpush.bf16.msrb.mxu2 %v6433_v61 }
 0x58c   :  { %4702 = vmatpush.bf16.msrb.mxu3 %v6545_v41  ;;  %v7026_v41 = vld [vmem:[%s8008_s11 + $0x60] sm:$0xff] }
 0x58e   :  { %4696 = vmatpush.bf16.msrb.mxu2 %v6425_v13  ;;  %v6497_v13 = vor.u32 %v7000_v21, %v6494_v53 }
 0x590   :  { %4703 = vmatpush.bf16.msrb.mxu3 %v6537_v44  ;;  %v7023_v44 = vld [vmem:[%s8008_s11 + $0x48] sm:$0xff] }
 0x594   :  { %v4092_v37 = vpop.f32.mrf.mxu2  ;;  %v4105_v50 = vpop.f32.mrf.mxu3  ;;  %4704 = vmatpush.bf16.msrb.mxu3 %v6529_v38 }
 0x595   :  { %v4093_v24 = vadd.f32 %v4092_v37, %v4080_v6 }
 0x597   :  { %v4106_v10 = vadd.f32 %v4105_v50, %v4093_v24  ;;  %v4285_v24 = vld [vmem:[#allocation14] sm:$0x3] }
 0x598   :  { %4705 = vmatpush.bf16.msrb.mxu3 %v6521_v54 }
 0x599   :  { %v4215_v29 = vmax.f32 %v4106_v10, 0.0 }
 0x59b   :  { %v4219_v55 = vpack.c.bf16 %v4215_v29, %v4215_v29 }
 0x59c   :  { %v4094_v33 = vpop.f32.mrf.mxu2  ;;  %v4107_v32 = vpop.f32.mrf.mxu3  ;;  %4706 = vmatpush.bf16.msrb.mxu3 %v6513_v20 }
 0x59d   :  { %4645 = vmatmul.bf16.vlgmr.msra.gmra.mxu2 %v4219_v55  ;;  %v7018_v32 = vld [vmem:[%s8008_s11 + $0x20] sm:$0xff] }
 0x5a0   :  { %4707 = vmatpush.bf16.msrb.mxu3 %v6505_v11 }
 0x5a4   :  { %4708 = vmatpush.bf16.msrb.mxu3 %v6497_v13 }
 0x5a8   :  { %4709 = vmatpush.bf16.msrb.mxu3 %v6489_v0 }
 0x5ad   :  { %4697 = vmatmul.bf16.vlgmr.msrb.gmra.mxu2 %v4219_v55  ;;  %v7029_v55 = vld [vmem:[%s8008_s11 + $0x78] sm:$0xff] }
 0x5ae   :  { %4864 = vmatpush.bf16.msrb.mxu1 %v7029_v55 }
 0x5b4   :  { %v4144_v12 = vpop.f32.mrf.mxu2  ;;  %v4157_v31 = vpop.f32.mrf.mxu3 }
 0x5b5   :  { %v4145_v39 = vadd.f32 %v4144_v12, %v7907_v48  ;;  %v4287_v48 = vperm.slane %v4285_v24, 0 }
 0x5b7   :  { %v4158_v58 = vadd.f32 %v4157_v31, %v4145_v39  ;;  %v4621_v19 = vadd.f32 %v7931_v7, %v4287_v48  ;;  %v7020_v7 = vld [vmem:[%s8008_s11 + $0x30] sm:$0xff] }
 0x5b8   :  { %4852 = vmatpush.bf16.msrb.mxu0 %v7020_v7 }
 0x5b9   :  { %v4171_v1 = vadd.f32 %v7911_v3, %v4158_v58  ;;  %v4288_v3 = vperm.slane %v4285_v24, 1 }
 0x5bb   :  { %v4184_v59 = vadd.f32 %v7913_v63, %v4171_v1  ;;  %v4673_v63 = vadd.f32 %v7934_v45, %v4288_v3  ;;  %v7028_v45 = vld [vmem:[%s8008_s11 + $0x70] sm:$0xff]  ;;  %s7270_s11 = smov [#allocation15]  }
 0x5bc   :  { %v4146_v60 = vpop.f32.mrf.mxu2  ;;  %v4159_v61 = vpop.f32.mrf.mxu3  ;;  %4865 = vmatpush.bf16.msrb.mxu1 %v7028_v45  ;;  %4853 = vmatpush.bf16.msrb.mxu0 %v7019_v46  ;;  %s4883_s4 = sshll.u32 %s7270_s11, 4  ;;  %s4884_s4 = int_to_ptr.vmem [resolvable:$true] %s4883_s4 }
 0x5bd   :  { %v7049_v61 = vld [vmem:[%s8009_s12] ss:$0 sm:$0xff] }
 0x5c0   :  { %4854 = vmatpush.bf16.msrb.mxu0 %v7018_v32  ;;  %4866 = vmatpush.bf16.msrb.mxu1 %v7027_v43 }
 0x5c4   :  { %4855 = vmatpush.bf16.msrb.mxu0 %v7017_v17  ;;  %4867 = vmatpush.bf16.msrb.mxu1 %v7026_v41 }
 0x5c8   :  { %4856 = vmatpush.bf16.msrb.mxu0 %v7016_v28  ;;  %4868 = vmatpush.bf16.msrb.mxu1 %v7025_v56 }
 0x5cc   :  { %4857 = vmatpush.bf16.msrb.mxu0 %v7015_v35  ;;  %4869 = vmatpush.bf16.msrb.mxu1 %v7024_v42 }
 0x5d0   :  { %4858 = vmatpush.bf16.msrb.mxu0 %v7014_v40  ;;  %4870 = vmatpush.bf16.msrb.mxu1 %v7023_v44 }
 0x5d4   :  { %v4196_v51 = vpop.f32.mrf.mxu2  ;;  %v4209_v26 = vpop.f32.mrf.mxu3  ;;  %4871 = vmatpush.bf16.msrb.mxu1 %v7022_v4 }
 0x5d5   :  { %v4197_v2 = vadd.f32 %v4196_v51, %v4184_v59 }
 0x5d7   :  { %v4210_v6 = vadd.f32 %v4209_v26, %v4197_v2 }
 0x5d9   :  { %v4216_v37 = vmax.f32 %v4210_v6, 0.0 }
 0x5da   :  { %v4633_v10 = vpop.f32.mrf.mxu1 }
 0x5db   :  { %v4220_v50 = vpack.c.bf16 %v4216_v37, %v4216_v37  ;;  %v4634_v8 = vadd.f32 %v4633_v10, %v4621_v19 }
 0x5dc   :  { %v4198_v47 = vpop.f32.mrf.mxu2  ;;  %v4211_v36 = vpop.f32.mrf.mxu3 }
 0x5dd   :  { %4658 = vmatmul.bf16.vlgmr.msra.gmra.mxu3 %v4220_v50 }
 0x5e2   :  { %v4635_v15 = vpop.f32.mrf.mxu1 }
 0x5ea   :  { %v4685_v29 = vpop.f32.mrf.mxu1 }
 0x5eb   :  { %v4686_v57 = vadd.f32 %v4685_v29, %v4673_v63 }
 0x5ed   :  { %4710 = vmatmul.bf16.vlgmr.msrb.gmra.mxu3 %v4220_v50 }
 0x5f2   :  { %v4687_v23 = vpop.f32.mrf.mxu1 }
 0x620   :  { %v4646_v33 = vpop.f32.mrf.mxu2 }
 0x621   :  { %v4647_v5 = vadd.f32 %v4646_v33, %v4634_v8 }
 0x628   :  { %v4648_v25 = vpop.f32.mrf.mxu2 }
 0x630   :  { %v4698_v30 = vpop.f32.mrf.mxu2 }
 0x631   :  { %v4699_v54 = vadd.f32 %v4698_v30, %v4686_v57 }
 0x638   :  { %v4700_v27 = vpop.f32.mrf.mxu2 }
 0x660   :  { %v4659_v38 = vpop.f32.mrf.mxu3 }
 0x661   :  { %v4660_v12 = vadd.f32 %v4659_v38, %v4647_v5 }
 0x663   :  { %v4715_v31 = vmax.f32 %v4660_v12, 0.0 }
 0x665   :  { %v4717_v9 = vpack.c.bf16 %v4715_v31, %v4715_v31 }
 0x667   :  { %4859 = vmatmul.bf16.vlgmr.msrb.gmra.mxu0 %v4717_v9 }
 0x668   :  { %v4661_v52 = vpop.f32.mrf.mxu3 }
 0x670   :  { %v4711_v16 = vpop.f32.mrf.mxu3 }
 0x671   :  { %v4712_v14 = vadd.f32 %v4711_v16, %v4699_v54 }
 0x673   :  { %v4716_v20 = vmax.f32 %v4712_v14, 0.0 }
 0x675   :  { %v4718_v22 = vpack.c.bf16 %v4716_v20, %v4716_v20 }
 0x677   :  { %4872 = vmatmul.bf16.vlgmr.msrb.gmra.mxu1 %v4718_v22 }
 0x678   :  { %v4713_v34 = vpop.f32.mrf.mxu3 }
 0x6e4   :  { %v4860_v11 = vpop.f32.mrf.mxu0 }
 0x6e5   :  { %v4861_v21 = vadd.f32 %v7049_v61, %v4860_v11 }
 0x6ec   :  { %v4862_v60 = vpop.f32.mrf.mxu0 }
 0x6f4   :  { %v4873_v53 = vpop.f32.mrf.mxu1 }
 0x6f5   :  { %v4874_v13 = vadd.f32 %v4873_v53, %v4861_v21 }
 0x6f7   :  { %4877 = vst [vmem:[#allocation15] sm:$0x3] %v4874_v13 }
 0x6f8   :  { %4888 = dma.vmem_to_hbm [thread:$0]  %s4884_s4, 32, %s4886_s26, [#allocation5]  }
 0x6fc   :  { %v4875_v39 = vpop.f32.mrf.mxu1 }
 0x6fd   :  { %7252 = dma.done.wait [#allocation5], 32  }
 0x6fe   :  { %7253 = vsyncadd [#allocation5], 4294967264 }
 0x6ff   :  { %4893 = vsyncpa [#allocation4], 1 }
 0x700   :  { %4894 = vsyncpa [#allocation7], 1 }
 0x701   :  { %4895 = vsyncpa [#allocation10], 1 }
 0x702   :  { %4896 = vsyncpa [#allocation13], 1 }
 0x703   :  { %4897 = vsyncpa [#allocation5], 1 }

</bundles_post_ra>
